<compile_context>
chip_gen: v5e
topology: v5e:2x2
jax: 0.10.0
libtpu: 0.0.40
codegen_flags: <defaults>
</compile_context>

<pallas_src>
import functools

import jax
import jax.numpy as jnp
from jax.experimental import pallas as pl
from jax.experimental.pallas import tpu as pltpu


def _round_up(x, m):
    return ((x + m - 1) // m) * m


_COMPILER_PARAMS = pltpu.CompilerParams(
    dimension_semantics=("arbitrary",),
    vmem_limit_bytes=32 * 1024 * 1024)


def _full_spec(shape):
    return pl.BlockSpec(shape, lambda i: (0,) * len(shape))


# ----------------------------- in-kernel helpers ---------------------------- #

def _tap_dot(taps, w_ref):
    """sum_t taps[t] @ w_ref[t*Cp:(t+1)*Cp]  with bf16 MXU inputs, f32 accumulation.

    If the tap width is lane-aligned (multiple of 128) the taps are packed into
    one (rows, T*Cp) slab and issued as a single fat matmul (better MXU
    utilization on v6e/v7x); otherwise per-tap dots are summed (safe for
    dim < 128 configs where minor-dim concatenation is not lane-aligned).
    """
    cp = taps[0].shape[1]
    if cp % 128 == 0:
        slab = jnp.concatenate(taps, axis=1).astype(jnp.bfloat16)
        return jnp.dot(slab, w_ref[...], preferred_element_type=jnp.float32)
    acc = None
    for t, tap in enumerate(taps):
        part = jnp.dot(tap.astype(jnp.bfloat16),
                       w_ref[pl.ds(t * cp, cp), :],
                       preferred_element_type=jnp.float32)
        acc = part if acc is None else acc + part
    return acc


# ------------------------------- Pallas kernels ----------------------------- #

def _conv4tap_kernel(xs_ref, w_ref, b_ref, o_ref, *, rows, ws, relu_out):
    # xs_ref: (rows + pad, 4*Cin) f32 space-to-depth plane (whole batch stacked,
    # zero-extended at the end).  Output row m's taps are rows m + di*ws + dj,
    # (di, dj) in {0,1}^2; weight rows are grouped per tap (4*Cin each).
    # TODO(synk): for dim < 128 the (rows, Cout) output uses masked partial
    # stores (v5e lane-density note in the review); fine for Cout >= 128.
    taps = [xs_ref[pl.ds(di * ws + dj, rows), :]
            for di in range(2) for dj in range(2)]
    y = _tap_dot(taps, w_ref) + b_ref[...]
    if relu_out:
        y = jnp.maximum(y, 0.0)
    o_ref[...] = y


def _fused_res_vq_kernel(z_ref, mask_ref,
                         w3a_ref, b3a_ref, w1a_ref, b1a_ref,
                         w3b_ref, b3b_ref, w1b_ref, b1b_ref,
                         et_ref, e_ref, e2_ref,
                         o_ref, ext_ref, *, rows, eoff, wp):
    # z_ref: (rows + 2*eoff, C) f32 zero-extended, zero-padded, batch-stacked
    # latent plane.  ext_ref: same-shape f32 scratch used to stage the ReLU'd
    # 3x3-conv inputs ONCE, so the 9 taps are plain shifted slices.
    mask = mask_ref[...]                        # (rows, 1): 1 on interior pixels

    def conv3x3(w_ref):
        taps = [ext_ref[pl.ds(eoff + (dh - 1) * wp + (dw - 1), rows), :]
                for dh in range(3) for dw in range(3)]
        return _tap_dot(taps, w_ref)

    # Stage ReLU(z) once; z's pad rings / extension bands are zero and
    # relu(0) == 0, so no explicit scratch zeroing is ever needed.
    ext_ref[...] = jnp.maximum(z_ref[...], 0.0)

    z_int = z_ref[pl.ds(eoff, rows), :]

    # --- ResBlock 1: h1 = z + Conv1x1(ReLU(Conv3x3(ReLU(z)))) ---
    a1 = jnp.maximum(conv3x3(w3a_ref) + b3a_ref[...], 0.0)
    h1 = z_int + jnp.dot(a1.astype(jnp.bfloat16), w1a_ref[...],
                         preferred_element_type=jnp.float32) + b1a_ref[...]

    # Stage mask * ReLU(h1): pad-ring rows forced to zero == Conv2d zero padding
    # for ResBlock 2 (the mask multiply is required for correctness).
    ext_ref[pl.ds(eoff, rows), :] = jnp.maximum(h1, 0.0) * mask

    # --- ResBlock 2 ---
    a2 = jnp.maximum(conv3x3(w3b_ref) + b3b_ref[...], 0.0)
    h2 = h1 + jnp.dot(a2.astype(jnp.bfloat16), w1b_ref[...],
                      preferred_element_type=jnp.float32) + b1b_ref[...]

    # --- VQ nearest-code lookup (straight-through codes), all f32 ---
    # |h2|^2 dropped (argmin-invariant); codebook padded to a lane-dense K_pad
    # with +huge |e|^2 sentinels; first-index tie-break matches torch.argmin.
    # TODO(synk): chunk the (rows, K_pad) distance block over rows for the real
    # dim=256 / K=512 config to bound vreg/VMEM pressure on v7x.
    d = e2_ref[...] - 2.0 * jnp.dot(h2, et_ref[...],
                                    preferred_element_type=jnp.float32)
    dmin = jnp.min(d, axis=1, keepdims=True)
    kp = d.shape[1]
    col = jax.lax.broadcasted_iota(jnp.int32, d.shape, 1)
    idx = jnp.min(jnp.where(d <= dmin, col, kp), axis=1, keepdims=True)
    onehot = (col == idx).astype(jnp.float32)
    o_ref[...] = jnp.dot(onehot, e_ref[...], preferred_element_type=jnp.float32)


# ------------------------------ pallas_call glue ----------------------------- #

def conv4x4_s2d(x, w, b, relu_out):
    """Conv2d(Cin, Cout, kernel=4, stride=2, padding=1) [+ ReLU] on NHWC input.

    Wrapper-side data movement is a single pad + space-to-depth transpose of the
    activation (1x the input bytes; replaces the 4x im2col blow-up) and no GEMM
    operand transposes.  The kernel does a 4-tap accumulation on the s2d plane.
    """
    n, h, wdt, cin = x.shape
    cout = w.shape[1]
    hs, ws = (h + 2) // 2, (wdt + 2) // 2
    # pad-then-space-to-depth: per-block channel order (sub_row, sub_col, cin)
    xp = jnp.pad(x, ((0, 0), (1, 1), (1, 1), (0, 0)))
    s2d = xp.reshape(n, hs, 2, ws, 2, cin).transpose(0, 1, 3, 2, 4, 5)
    s2d = s2d.reshape(n, hs, ws, 4 * cin)
    rows = n * hs * ws
    eend = _round_up(ws + 1, 8)                       # covers the max tap shift
    xs = jnp.pad(s2d.reshape(rows, 4 * cin), ((0, eend), (0, 0)))
    # weight (kh, kw, ci, co) -> (di, dj, sub_row, sub_col, ci, co), bf16
    w4 = (w.reshape(2, 2, 2, 2, cin, cout).transpose(0, 2, 1, 3, 4, 5)
           .reshape(16 * cin, cout).astype(jnp.bfloat16))

    out = pl.pallas_call(
        functools.partial(_conv4tap_kernel, rows=rows, ws=ws, relu_out=relu_out),
        out_shape=jax.ShapeDtypeStruct((rows, cout), jnp.float32),
        grid=(1,),
        in_specs=[_full_spec((rows + eend, 4 * cin)),
                  _full_spec((16 * cin, cout)),
                  _full_spec((1, cout))],
        out_specs=_full_spec((rows, cout)),
        compiler_params=_COMPILER_PARAMS,
    )(xs, w4, b)
    # drop the garbage rows produced on the s2d plane's pad ring
    return out.reshape(n, hs, ws, cout)[:, :hs - 1, :ws - 1, :]


def fused_resblocks_vq(z, p, K):
    """ResBlock x2 + VQ straight-through codebook lookup, fused into one kernel."""
    n, h, wdt, c = z.shape
    hp, wp = h + 2, wdt + 2
    m = hp * wp
    rows = n * m
    eoff = _round_up(wp + 1, 8)

    z_pad = jnp.pad(z, ((0, 0), (1, 1), (1, 1), (0, 0)))
    z_ext = jnp.pad(z_pad.reshape(rows, c), ((eoff, eoff), (0, 0)))

    r = jnp.arange(m, dtype=jnp.int32)
    ii, jj = r // wp, r % wp
    mask = ((ii >= 1) & (ii <= hp - 2) & (jj >= 1) & (jj <= wp - 2))
    mask = jnp.tile(mask.astype(jnp.float32).reshape(m, 1), (n, 1))

    K_pad = _round_up(K, 128)
    emb = p["embedding"]
    emb_pad = jnp.pad(emb, ((0, K_pad - K), (0, 0)))
    e2 = jnp.pad(jnp.sum(emb * emb, axis=1), (0, K_pad - K),
                 constant_values=1e30).reshape(1, K_pad)

    bf = lambda a: a.astype(jnp.bfloat16)
    out = pl.pallas_call(
        functools.partial(_fused_res_vq_kernel, rows=rows, eoff=eoff, wp=wp),
        out_shape=jax.ShapeDtypeStruct((rows, c), jnp.float32),
        grid=(1,),
        in_specs=[_full_spec((rows + 2 * eoff, c)),
                  _full_spec((rows, 1)),
                  _full_spec((9 * c, c)), _full_spec((1, c)),
                  _full_spec((c, c)), _full_spec((1, c)),
                  _full_spec((9 * c, c)), _full_spec((1, c)),
                  _full_spec((c, c)), _full_spec((1, c)),
                  _full_spec((c, K_pad)), _full_spec((K_pad, c)),
                  _full_spec((1, K_pad))],
        out_specs=_full_spec((rows, c)),
        scratch_shapes=[pltpu.VMEM((rows + 2 * eoff, c), jnp.float32)],
        compiler_params=_COMPILER_PARAMS,
    )(z_ext, mask,
      bf(p["rb1_w1"]), p["rb1_b1"], bf(p["rb1_w2"]), p["rb1_b2"],
      bf(p["rb2_w1"]), p["rb2_b1"], bf(p["rb2_w2"]), p["rb2_b2"],
      emb_pad.T, emb_pad, e2)
    return out.reshape(n, hp, wp, c)[:, 1:-1, 1:-1, :]


# -------------------------------- parameters -------------------------------- #

def xavier_uniform(key, k, cin, cout):
    # nn.init.xavier_uniform_ for Conv2d(cin, cout, k).  NOTE: stored flattened
    # as (k*k*cin, cout) with tap order (kh, kw, ci); a real PyTorch checkpoint
    # ((cout, cin, kh, kw)) must be permuted to (kh, kw, ci, cout) before use.
    fan_in = cin * k * k
    fan_out = cout * k * k
    bound = (6.0 / (fan_in + fan_out)) ** 0.5
    return jax.random.uniform(key, (k * k * cin, cout), jnp.float32, -bound, bound)


def init_params(key, input_dim, dim, K):
    keys = jax.random.split(key, 7)
    p = {}
    p["enc_conv1_w"] = xavier_uniform(keys[0], 4, input_dim, dim)
    p["enc_conv1_b"] = jnp.zeros((1, dim), jnp.float32)
    p["enc_conv2_w"] = xavier_uniform(keys[1], 4, dim, dim)
    p["enc_conv2_b"] = jnp.zeros((1, dim), jnp.float32)
    p["rb1_w1"] = xavier_uniform(keys[2], 3, dim, dim)
    p["rb1_b1"] = jnp.zeros((1, dim), jnp.float32)
    p["rb1_w2"] = xavier_uniform(keys[3], 1, dim, dim)
    p["rb1_b2"] = jnp.zeros((1, dim), jnp.float32)
    p["rb2_w1"] = xavier_uniform(keys[4], 3, dim, dim)
    p["rb2_b1"] = jnp.zeros((1, dim), jnp.float32)
    p["rb2_w2"] = xavier_uniform(keys[5], 1, dim, dim)
    p["rb2_b2"] = jnp.zeros((1, dim), jnp.float32)
    # VQEmbedding: uniform(-1/K, 1/K)
    p["embedding"] = jax.random.uniform(keys[6], (K, dim), jnp.float32,
                                        -1.0 / K, 1.0 / K)
    return p


# ------------------------------- forward pass -------------------------------- #

def vqvae_forward(params, x_nchw, dim, K):
    del dim  # channel count is carried by the parameter shapes
    # NCHW (PyTorch) -> NHWC (kernel layout)
    x = jnp.transpose(x_nchw, (0, 2, 3, 1)).astype(jnp.float32)
    # encoder: Conv2d(input_dim, dim, 4, 2, 1) + ReLU
    h = conv4x4_s2d(x, params["enc_conv1_w"], params["enc_conv1_b"], True)
    # encoder: Conv2d(dim, dim, 4, 2, 1)
    # TODO(synk): conv2 (and the resblock stage) could consume conv1's output
    # directly in its produced layout instead of the pad/space-to-depth
    # round-trip through HBM.
    z_e = conv4x4_s2d(h, params["enc_conv2_w"], params["enc_conv2_b"], False)
    # encoder tail + codebook: fused ResBlock x2 + VQ straight-through lookup
    z_q = fused_resblocks_vq(z_e, params, K)
    # TODO(synk): the reference forward() also runs the decoder on z_q_x_st and
    # discards x_tilde; that dead decoder compute is omitted.
    return jnp.transpose(z_q, (0, 3, 1, 2))           # NHWC -> NCHW


def _conv_ref(x, w, b, relu_out):
    # XLA reference for Conv2d(k=4, s=2, p=1) on NHWC input (self-check only).
    cin = x.shape[-1]
    cout = w.shape[1]
    y = jax.lax.conv_general_dilated(
        x, w.reshape(4, 4, cin, cout), window_strides=(2, 2),
        padding=((1, 1), (1, 1)),
        dimension_numbers=("NHWC", "HWIO", "NHWC"))
    y = y + b.reshape(1, 1, 1, cout)
    return jnp.maximum(y, 0.0) if relu_out else y


if __name__ == "__main__":
    key = jax.random.PRNGKey(0)
    k_param, k_x = jax.random.split(key)

    N, input_dim, H, W = 2, 4, 16, 16
    dim, K = 32, 64                                    # small K instead of default 512

    params = init_params(k_param, input_dim, dim, K)
    x = jax.random.normal(k_x, (N, input_dim, H, W), jnp.float32)

    fwd = jax.jit(functools.partial(vqvae_forward, dim=dim, K=K))
    out = jax.block_until_ready(fwd(params, x))

    assert out.shape == (N, dim, H // 4, W // 4), out.shape
    assert out.dtype == jnp.float32
    assert bool(jnp.all(jnp.isfinite(out)))

    # every output pixel must (numerically) be one of the codebook vectors
    flat = out.transpose(0, 2, 3, 1).reshape(-1, dim)
    nearest_err = jnp.abs(flat[:, None, :] - params["embedding"][None, :, :]).max(-1).min(-1)
    assert bool(jnp.all(nearest_err < 1e-4)), float(nearest_err.max())

    # self-check of the space-to-depth conv kernels against an XLA reference
    # (inputs rounded to bf16 exactly like the kernels' MXU operands; the
    # accumulation stays f32 in both paths).
    bf_round = lambda a: a.astype(jnp.bfloat16).astype(jnp.float32)
    x_nhwc = jnp.transpose(x, (0, 2, 3, 1))
    h_pal = conv4x4_s2d(x_nhwc, params["enc_conv1_w"], params["enc_conv1_b"], True)
    h_ref = _conv_ref(bf_round(x_nhwc), bf_round(params["enc_conv1_w"]),
                      params["enc_conv1_b"], True)
    assert float(jnp.max(jnp.abs(h_pal - h_ref))) < 2e-3
    z_pal = conv4x4_s2d(h_pal, params["enc_conv2_w"], params["enc_conv2_b"], False)
    z_ref = _conv_ref(bf_round(h_pal), bf_round(params["enc_conv2_w"]),
                      params["enc_conv2_b"], False)
    assert float(jnp.max(jnp.abs(z_pal - z_ref))) < 2e-3

    print("KERNEL_OK")
</pallas_src>

<mosaic_0001>
module attributes {stable_mosaic.version = 11 : i64} {
  func.func @_conv4tap_kernel(%arg0: i32, %arg1: memref<178x16xf32, #tpu.memory_space<vmem>>, %arg2: memref<64x32xbf16, #tpu.memory_space<vmem>>, %arg3: memref<1x32xf32, #tpu.memory_space<vmem>>, %arg4: memref<162x32xf32, #tpu.memory_space<vmem>>) attributes {dimension_semantics = [#tpu.dimension_semantics<arbitrary>], iteration_bounds = array<i64: 1>, scalar_prefetch = 0 : i64, scratch_operands = 0 : i64, tpu.core_type = #tpu.core_type<tc>, window_params = [{pipeline_mode = #tpu.pipeline_mode<synchronous>, transform_indices = @transform_0, window_bounds = array<i64: 178, 16>}, {pipeline_mode = #tpu.pipeline_mode<synchronous>, transform_indices = @transform_1, window_bounds = array<i64: 64, 32>}, {pipeline_mode = #tpu.pipeline_mode<synchronous>, transform_indices = @transform_2, window_bounds = array<i64: 1, 32>}, {pipeline_mode = #tpu.pipeline_mode<synchronous>, transform_indices = @transform_3, window_bounds = array<i64: 162, 32>}]} {
    %c0 = arith.constant 0 : index
    %c0_0 = arith.constant 0 : index
    %0 = vector.load %arg1[%c0, %c0_0] : memref<178x16xf32, #tpu.memory_space<vmem>>, vector<162x16xf32>
    %c1 = arith.constant 1 : index
    %c0_1 = arith.constant 0 : index
    %1 = vector.load %arg1[%c1, %c0_1] : memref<178x16xf32, #tpu.memory_space<vmem>>, vector<162x16xf32>
    %c9 = arith.constant 9 : index
    %c0_2 = arith.constant 0 : index
    %2 = vector.load %arg1[%c9, %c0_2] : memref<178x16xf32, #tpu.memory_space<vmem>>, vector<162x16xf32>
    %c10 = arith.constant 10 : index
    %c0_3 = arith.constant 0 : index
    %3 = vector.load %arg1[%c10, %c0_3] : memref<178x16xf32, #tpu.memory_space<vmem>>, vector<162x16xf32>
    %4 = arith.truncf %0 : vector<162x16xf32> to vector<162x16xbf16>
    %c0_4 = arith.constant 0 : index
    %c0_5 = arith.constant 0 : index
    %5 = vector.load %arg2[%c0_4, %c0_5] : memref<64x32xbf16, #tpu.memory_space<vmem>>, vector<16x32xbf16>
    %cst = arith.constant dense<0.000000e+00> : vector<162x32xf32>
    %6 = tpu.matmul %4, %5, %cst {dimension_numbers = #tpu.dot_dimension_numbers<[1], [0], [0], [1], [0, 0, 1, 1], [], []>} : vector<162x16xbf16>, vector<16x32xbf16>, vector<162x32xf32> -> vector<162x32xf32>
    %7 = arith.truncf %1 : vector<162x16xf32> to vector<162x16xbf16>
    %c16 = arith.constant 16 : index
    %c0_6 = arith.constant 0 : index
    %8 = vector.load %arg2[%c16, %c0_6] : memref<64x32xbf16, #tpu.memory_space<vmem>>, vector<16x32xbf16>
    %cst_7 = arith.constant dense<0.000000e+00> : vector<162x32xf32>
    %9 = tpu.matmul %7, %8, %cst_7 {dimension_numbers = #tpu.dot_dimension_numbers<[1], [0], [0], [1], [0, 0, 1, 1], [], []>} : vector<162x16xbf16>, vector<16x32xbf16>, vector<162x32xf32> -> vector<162x32xf32>
    %10 = arith.addf %6, %9 : vector<162x32xf32>
    %11 = arith.truncf %2 : vector<162x16xf32> to vector<162x16xbf16>
    %c32 = arith.constant 32 : index
    %c0_8 = arith.constant 0 : index
    %12 = vector.load %arg2[%c32, %c0_8] : memref<64x32xbf16, #tpu.memory_space<vmem>>, vector<16x32xbf16>
    %cst_9 = arith.constant dense<0.000000e+00> : vector<162x32xf32>
    %13 = tpu.matmul %11, %12, %cst_9 {dimension_numbers = #tpu.dot_dimension_numbers<[1], [0], [0], [1], [0, 0, 1, 1], [], []>} : vector<162x16xbf16>, vector<16x32xbf16>, vector<162x32xf32> -> vector<162x32xf32>
    %14 = arith.addf %10, %13 : vector<162x32xf32>
    %15 = arith.truncf %3 : vector<162x16xf32> to vector<162x16xbf16>
    %c48 = arith.constant 48 : index
    %c0_10 = arith.constant 0 : index
    %16 = vector.load %arg2[%c48, %c0_10] : memref<64x32xbf16, #tpu.memory_space<vmem>>, vector<16x32xbf16>
    %cst_11 = arith.constant dense<0.000000e+00> : vector<162x32xf32>
    %17 = tpu.matmul %15, %16, %cst_11 {dimension_numbers = #tpu.dot_dimension_numbers<[1], [0], [0], [1], [0, 0, 1, 1], [], []>} : vector<162x16xbf16>, vector<16x32xbf16>, vector<162x32xf32> -> vector<162x32xf32>
    %18 = arith.addf %14, %17 : vector<162x32xf32>
    %c0_12 = arith.constant 0 : index
    %c0_13 = arith.constant 0 : index
    %19 = vector.load %arg3[%c0_12, %c0_13] : memref<1x32xf32, #tpu.memory_space<vmem>>, vector<1x32xf32>
    %20 = vector.broadcast %19 : vector<1x32xf32> to vector<162x32xf32>
    %21 = arith.addf %18, %20 : vector<162x32xf32>
    %cst_14 = arith.constant 0.000000e+00 : f32
    %22 = vector.broadcast %cst_14 : f32 to vector<162x32xf32>
    %23 = arith.maximumf %21, %22 : vector<162x32xf32>
    %c0_15 = arith.constant 0 : index
    %c0_16 = arith.constant 0 : index
    %24 = vector.load %arg4[%c0_15, %c0_16] : memref<162x32xf32, #tpu.memory_space<vmem>>, vector<162x32xf32>
    tpu.vector_store %arg4[%c0_15, %c0_16], %23 {strides = array<i32>} : memref<162x32xf32, #tpu.memory_space<vmem>>, vector<162x32xf32>,
    return
  }
  func.func @transform_0(%arg0: i32) -> (i32, i32) {
    %c0_i32 = arith.constant 0 : i32
    %c0_i32_0 = arith.constant 0 : i32
    %c0_i32_1 = arith.constant 0 : i32
    return %c0_i32, %c0_i32_0 : i32, i32
  }
  func.func @transform_1(%arg0: i32) -> (i32, i32) {
    %c0_i32 = arith.constant 0 : i32
    %c0_i32_0 = arith.constant 0 : i32
    %c0_i32_1 = arith.constant 0 : i32
    return %c0_i32, %c0_i32_0 : i32, i32
  }
  func.func @transform_2(%arg0: i32) -> (i32, i32) {
    %c0_i32 = arith.constant 0 : i32
    %c0_i32_0 = arith.constant 0 : i32
    %c0_i32_1 = arith.constant 0 : i32
    return %c0_i32, %c0_i32_0 : i32, i32
  }
  func.func @transform_3(%arg0: i32) -> (i32, i32) {
    %c0_i32 = arith.constant 0 : i32
    %c0_i32_0 = arith.constant 0 : i32
    %c0_i32_1 = arith.constant 0 : i32
    return %c0_i32, %c0_i32_0 : i32, i32
  }
}

module attributes {stable_mosaic.version = 11 : i64} {
  func.func @_conv4tap_kernel(%arg0: i32, %arg1: memref<58x128xf32, #tpu.memory_space<vmem>>, %arg2: memref<512x32xbf16, #tpu.memory_space<vmem>>, %arg3: memref<1x32xf32, #tpu.memory_space<vmem>>, %arg4: memref<50x32xf32, #tpu.memory_space<vmem>>) attributes {dimension_semantics = [#tpu.dimension_semantics<arbitrary>], iteration_bounds = array<i64: 1>, scalar_prefetch = 0 : i64, scratch_operands = 0 : i64, tpu.core_type = #tpu.core_type<tc>, window_params = [{pipeline_mode = #tpu.pipeline_mode<synchronous>, transform_indices = @transform_0, window_bounds = array<i64: 58, 128>}, {pipeline_mode = #tpu.pipeline_mode<synchronous>, transform_indices = @transform_1, window_bounds = array<i64: 512, 32>}, {pipeline_mode = #tpu.pipeline_mode<synchronous>, transform_indices = @transform_2, window_bounds = array<i64: 1, 32>}, {pipeline_mode = #tpu.pipeline_mode<synchronous>, transform_indices = @transform_3, window_bounds = array<i64: 50, 32>}]} {
    %c0 = arith.constant 0 : index
    %c0_0 = arith.constant 0 : index
    %0 = vector.load %arg1[%c0, %c0_0] : memref<58x128xf32, #tpu.memory_space<vmem>>, vector<50x128xf32>
    %c1 = arith.constant 1 : index
    %c0_1 = arith.constant 0 : index
    %1 = vector.load %arg1[%c1, %c0_1] : memref<58x128xf32, #tpu.memory_space<vmem>>, vector<50x128xf32>
    %c5 = arith.constant 5 : index
    %c0_2 = arith.constant 0 : index
    %2 = vector.load %arg1[%c5, %c0_2] : memref<58x128xf32, #tpu.memory_space<vmem>>, vector<50x128xf32>
    %c6 = arith.constant 6 : index
    %c0_3 = arith.constant 0 : index
    %3 = vector.load %arg1[%c6, %c0_3] : memref<58x128xf32, #tpu.memory_space<vmem>>, vector<50x128xf32>
    %4 = tpu.concatenate %0, %1, %2, %3 in 1 : vector<50x128xf32>, vector<50x128xf32>, vector<50x128xf32>, vector<50x128xf32> -> vector<50x512xf32>
    %5 = arith.truncf %4 : vector<50x512xf32> to vector<50x512xbf16>
    %c0_4 = arith.constant 0 : index
    %c0_5 = arith.constant 0 : index
    %6 = vector.load %arg2[%c0_4, %c0_5] : memref<512x32xbf16, #tpu.memory_space<vmem>>, vector<512x32xbf16>
    %cst = arith.constant dense<0.000000e+00> : vector<50x32xf32>
    %7 = tpu.matmul %5, %6, %cst {dimension_numbers = #tpu.dot_dimension_numbers<[1], [0], [0], [1], [0, 0, 1, 1], [], []>} : vector<50x512xbf16>, vector<512x32xbf16>, vector<50x32xf32> -> vector<50x32xf32>
    %c0_6 = arith.constant 0 : index
    %c0_7 = arith.constant 0 : index
    %8 = vector.load %arg3[%c0_6, %c0_7] : memref<1x32xf32, #tpu.memory_space<vmem>>, vector<1x32xf32>
    %9 = vector.broadcast %8 : vector<1x32xf32> to vector<50x32xf32>
    %10 = arith.addf %7, %9 : vector<50x32xf32>
    %c0_8 = arith.constant 0 : index
    %c0_9 = arith.constant 0 : index
    %11 = vector.load %arg4[%c0_8, %c0_9] : memref<50x32xf32, #tpu.memory_space<vmem>>, vector<50x32xf32>
    tpu.vector_store %arg4[%c0_8, %c0_9], %10 {strides = array<i32>} : memref<50x32xf32, #tpu.memory_space<vmem>>, vector<50x32xf32>,
    return
  }
  func.func @transform_0(%arg0: i32) -> (i32, i32) {
    %c0_i32 = arith.constant 0 : i32
    %c0_i32_0 = arith.constant 0 : i32
    %c0_i32_1 = arith.constant 0 : i32
    return %c0_i32, %c0_i32_0 : i32, i32
  }
  func.func @transform_1(%arg0: i32) -> (i32, i32) {
    %c0_i32 = arith.constant 0 : i32
    %c0_i32_0 = arith.constant 0 : i32
    %c0_i32_1 = arith.constant 0 : i32
    return %c0_i32, %c0_i32_0 : i32, i32
  }
  func.func @transform_2(%arg0: i32) -> (i32, i32) {
    %c0_i32 = arith.constant 0 : i32
    %c0_i32_0 = arith.constant 0 : i32
    %c0_i32_1 = arith.constant 0 : i32
    return %c0_i32, %c0_i32_0 : i32, i32
  }
  func.func @transform_3(%arg0: i32) -> (i32, i32) {
    %c0_i32 = arith.constant 0 : i32
    %c0_i32_0 = arith.constant 0 : i32
    %c0_i32_1 = arith.constant 0 : i32
    return %c0_i32, %c0_i32_0 : i32, i32
  }
}

module attributes {stable_mosaic.version = 11 : i64} {
  func.func @_fused_res_vq_kernel(%arg0: i32, %arg1: memref<88x32xf32, #tpu.memory_space<vmem>>, %arg2: memref<72x1xf32, #tpu.memory_space<vmem>>, %arg3: memref<288x32xbf16, #tpu.memory_space<vmem>>, %arg4: memref<1x32xf32, #tpu.memory_space<vmem>>, %arg5: memref<32x32xbf16, #tpu.memory_space<vmem>>, %arg6: memref<1x32xf32, #tpu.memory_space<vmem>>, %arg7: memref<288x32xbf16, #tpu.memory_space<vmem>>, %arg8: memref<1x32xf32, #tpu.memory_space<vmem>>, %arg9: memref<32x32xbf16, #tpu.memory_space<vmem>>, %arg10: memref<1x32xf32, #tpu.memory_space<vmem>>, %arg11: memref<32x128xf32, #tpu.memory_space<vmem>>, %arg12: memref<128x32xf32, #tpu.memory_space<vmem>>, %arg13: memref<1x128xf32, #tpu.memory_space<vmem>>, %arg14: memref<72x32xf32, #tpu.memory_space<vmem>>, %arg15: memref<88x32xf32, #tpu.memory_space<vmem>>) attributes {dimension_semantics = [#tpu.dimension_semantics<arbitrary>], iteration_bounds = array<i64: 1>, scalar_prefetch = 0 : i64, scratch_operands = 1 : i64, tpu.core_type = #tpu.core_type<tc>, window_params = [{pipeline_mode = #tpu.pipeline_mode<synchronous>, transform_indices = @transform_0, window_bounds = array<i64: 88, 32>}, {pipeline_mode = #tpu.pipeline_mode<synchronous>, transform_indices = @transform_1, window_bounds = array<i64: 72, 1>}, {pipeline_mode = #tpu.pipeline_mode<synchronous>, transform_indices = @transform_2, window_bounds = array<i64: 288, 32>}, {pipeline_mode = #tpu.pipeline_mode<synchronous>, transform_indices = @transform_3, window_bounds = array<i64: 1, 32>}, {pipeline_mode = #tpu.pipeline_mode<synchronous>, transform_indices = @transform_4, window_bounds = array<i64: 32, 32>}, {pipeline_mode = #tpu.pipeline_mode<synchronous>, transform_indices = @transform_5, window_bounds = array<i64: 1, 32>}, {pipeline_mode = #tpu.pipeline_mode<synchronous>, transform_indices = @transform_6, window_bounds = array<i64: 288, 32>}, {pipeline_mode = #tpu.pipeline_mode<synchronous>, transform_indices = @transform_7, window_bounds = array<i64: 1, 32>}, {pipeline_mode = #tpu.pipeline_mode<synchronous>, transform_indices = @transform_8, window_bounds = array<i64: 32, 32>}, {pipeline_mode = #tpu.pipeline_mode<synchronous>, transform_indices = @transform_9, window_bounds = array<i64: 1, 32>}, {pipeline_mode = #tpu.pipeline_mode<synchronous>, transform_indices = @transform_10, window_bounds = array<i64: 32, 128>}, {pipeline_mode = #tpu.pipeline_mode<synchronous>, transform_indices = @transform_11, window_bounds = array<i64: 128, 32>}, {pipeline_mode = #tpu.pipeline_mode<synchronous>, transform_indices = @transform_12, window_bounds = array<i64: 1, 128>}, {pipeline_mode = #tpu.pipeline_mode<synchronous>, transform_indices = @transform_13, window_bounds = array<i64: 72, 32>}]} {
    %c0 = arith.constant 0 : index
    %c0_0 = arith.constant 0 : index
    %0 = vector.load %arg2[%c0, %c0_0] : memref<72x1xf32, #tpu.memory_space<vmem>>, vector<72x1xf32>
    %c0_1 = arith.constant 0 : index
    %c0_2 = arith.constant 0 : index
    %1 = vector.load %arg1[%c0_1, %c0_2] : memref<88x32xf32, #tpu.memory_space<vmem>>, vector<88x32xf32>
    %cst = arith.constant 0.000000e+00 : f32
    %2 = vector.broadcast %cst : f32 to vector<88x32xf32>
    %3 = arith.maximumf %1, %2 : vector<88x32xf32>
    %c0_3 = arith.constant 0 : index
    %c0_4 = arith.constant 0 : index
    %4 = vector.load %arg15[%c0_3, %c0_4] : memref<88x32xf32, #tpu.memory_space<vmem>>, vector<88x32xf32>
    tpu.vector_store %arg15[%c0_3, %c0_4], %3 {strides = array<i32>} : memref<88x32xf32, #tpu.memory_space<vmem>>, vector<88x32xf32>,
    %c8 = arith.constant 8 : index
    %c0_5 = arith.constant 0 : index
    %5 = vector.load %arg1[%c8, %c0_5] : memref<88x32xf32, #tpu.memory_space<vmem>>, vector<72x32xf32>
    %c1 = arith.constant 1 : index
    %c0_6 = arith.constant 0 : index
    %6 = vector.load %arg15[%c1, %c0_6] : memref<88x32xf32, #tpu.memory_space<vmem>>, vector<72x32xf32>
    %c2 = arith.constant 2 : index
    %c0_7 = arith.constant 0 : index
    %7 = vector.load %arg15[%c2, %c0_7] : memref<88x32xf32, #tpu.memory_space<vmem>>, vector<72x32xf32>
    %c3 = arith.constant 3 : index
    %c0_8 = arith.constant 0 : index
    %8 = vector.load %arg15[%c3, %c0_8] : memref<88x32xf32, #tpu.memory_space<vmem>>, vector<72x32xf32>
    %c7 = arith.constant 7 : index
    %c0_9 = arith.constant 0 : index
    %9 = vector.load %arg15[%c7, %c0_9] : memref<88x32xf32, #tpu.memory_space<vmem>>, vector<72x32xf32>
    %c8_10 = arith.constant 8 : index
    %c0_11 = arith.constant 0 : index
    %10 = vector.load %arg15[%c8_10, %c0_11] : memref<88x32xf32, #tpu.memory_space<vmem>>, vector<72x32xf32>
    %c9 = arith.constant 9 : index
    %c0_12 = arith.constant 0 : index
    %11 = vector.load %arg15[%c9, %c0_12] : memref<88x32xf32, #tpu.memory_space<vmem>>, vector<72x32xf32>
    %c13 = arith.constant 13 : index
    %c0_13 = arith.constant 0 : index
    %12 = vector.load %arg15[%c13, %c0_13] : memref<88x32xf32, #tpu.memory_space<vmem>>, vector<72x32xf32>
    %c14 = arith.constant 14 : index
    %c0_14 = arith.constant 0 : index
    %13 = vector.load %arg15[%c14, %c0_14] : memref<88x32xf32, #tpu.memory_space<vmem>>, vector<72x32xf32>
    %c15 = arith.constant 15 : index
    %c0_15 = arith.constant 0 : index
    %14 = vector.load %arg15[%c15, %c0_15] : memref<88x32xf32, #tpu.memory_space<vmem>>, vector<72x32xf32>
    %15 = arith.truncf %6 : vector<72x32xf32> to vector<72x32xbf16>
    %c0_16 = arith.constant 0 : index
    %c0_17 = arith.constant 0 : index
    %16 = vector.load %arg3[%c0_16, %c0_17] : memref<288x32xbf16, #tpu.memory_space<vmem>>, vector<32x32xbf16>
    %cst_18 = arith.constant dense<0.000000e+00> : vector<72x32xf32>
    %17 = tpu.matmul %15, %16, %cst_18 {dimension_numbers = #tpu.dot_dimension_numbers<[1], [0], [0], [1], [0, 0, 1, 1], [], []>} : vector<72x32xbf16>, vector<32x32xbf16>, vector<72x32xf32> -> vector<72x32xf32>
    %18 = arith.truncf %7 : vector<72x32xf32> to vector<72x32xbf16>
    %c32 = arith.constant 32 : index
    %c0_19 = arith.constant 0 : index
    %19 = vector.load %arg3[%c32, %c0_19] : memref<288x32xbf16, #tpu.memory_space<vmem>>, vector<32x32xbf16>
    %cst_20 = arith.constant dense<0.000000e+00> : vector<72x32xf32>
    %20 = tpu.matmul %18, %19, %cst_20 {dimension_numbers = #tpu.dot_dimension_numbers<[1], [0], [0], [1], [0, 0, 1, 1], [], []>} : vector<72x32xbf16>, vector<32x32xbf16>, vector<72x32xf32> -> vector<72x32xf32>
    %21 = arith.addf %17, %20 : vector<72x32xf32>
    %22 = arith.truncf %8 : vector<72x32xf32> to vector<72x32xbf16>
    %c64 = arith.constant 64 : index
    %c0_21 = arith.constant 0 : index
    %23 = vector.load %arg3[%c64, %c0_21] : memref<288x32xbf16, #tpu.memory_space<vmem>>, vector<32x32xbf16>
    %cst_22 = arith.constant dense<0.000000e+00> : vector<72x32xf32>
    %24 = tpu.matmul %22, %23, %cst_22 {dimension_numbers = #tpu.dot_dimension_numbers<[1], [0], [0], [1], [0, 0, 1, 1], [], []>} : vector<72x32xbf16>, vector<32x32xbf16>, vector<72x32xf32> -> vector<72x32xf32>
    %25 = arith.addf %21, %24 : vector<72x32xf32>
    %26 = arith.truncf %9 : vector<72x32xf32> to vector<72x32xbf16>
    %c96 = arith.constant 96 : index
    %c0_23 = arith.constant 0 : index
    %27 = vector.load %arg3[%c96, %c0_23] : memref<288x32xbf16, #tpu.memory_space<vmem>>, vector<32x32xbf16>
    %cst_24 = arith.constant dense<0.000000e+00> : vector<72x32xf32>
    %28 = tpu.matmul %26, %27, %cst_24 {dimension_numbers = #tpu.dot_dimension_numbers<[1], [0], [0], [1], [0, 0, 1, 1], [], []>} : vector<72x32xbf16>, vector<32x32xbf16>, vector<72x32xf32> -> vector<72x32xf32>
    %29 = arith.addf %25, %28 : vector<72x32xf32>
    %30 = arith.truncf %10 : vector<72x32xf32> to vector<72x32xbf16>
    %c128 = arith.constant 128 : index
    %c0_25 = arith.constant 0 : index
    %31 = vector.load %arg3[%c128, %c0_25] : memref<288x32xbf16, #tpu.memory_space<vmem>>, vector<32x32xbf16>
    %cst_26 = arith.constant dense<0.000000e+00> : vector<72x32xf32>
    %32 = tpu.matmul %30, %31, %cst_26 {dimension_numbers = #tpu.dot_dimension_numbers<[1], [0], [0], [1], [0, 0, 1, 1], [], []>} : vector<72x32xbf16>, vector<32x32xbf16>, vector<72x32xf32> -> vector<72x32xf32>
    %33 = arith.addf %29, %32 : vector<72x32xf32>
    %34 = arith.truncf %11 : vector<72x32xf32> to vector<72x32xbf16>
    %c160 = arith.constant 160 : index
    %c0_27 = arith.constant 0 : index
    %35 = vector.load %arg3[%c160, %c0_27] : memref<288x32xbf16, #tpu.memory_space<vmem>>, vector<32x32xbf16>
    %cst_28 = arith.constant dense<0.000000e+00> : vector<72x32xf32>
    %36 = tpu.matmul %34, %35, %cst_28 {dimension_numbers = #tpu.dot_dimension_numbers<[1], [0], [0], [1], [0, 0, 1, 1], [], []>} : vector<72x32xbf16>, vector<32x32xbf16>, vector<72x32xf32> -> vector<72x32xf32>
    %37 = arith.addf %33, %36 : vector<72x32xf32>
    %38 = arith.truncf %12 : vector<72x32xf32> to vector<72x32xbf16>
    %c192 = arith.constant 192 : index
    %c0_29 = arith.constant 0 : index
    %39 = vector.load %arg3[%c192, %c0_29] : memref<288x32xbf16, #tpu.memory_space<vmem>>, vector<32x32xbf16>
    %cst_30 = arith.constant dense<0.000000e+00> : vector<72x32xf32>
    %40 = tpu.matmul %38, %39, %cst_30 {dimension_numbers = #tpu.dot_dimension_numbers<[1], [0], [0], [1], [0, 0, 1, 1], [], []>} : vector<72x32xbf16>, vector<32x32xbf16>, vector<72x32xf32> -> vector<72x32xf32>
    %41 = arith.addf %37, %40 : vector<72x32xf32>
    %42 = arith.truncf %13 : vector<72x32xf32> to vector<72x32xbf16>
    %c224 = arith.constant 224 : index
    %c0_31 = arith.constant 0 : index
    %43 = vector.load %arg3[%c224, %c0_31] : memref<288x32xbf16, #tpu.memory_space<vmem>>, vector<32x32xbf16>
    %cst_32 = arith.constant dense<0.000000e+00> : vector<72x32xf32>
    %44 = tpu.matmul %42, %43, %cst_32 {dimension_numbers = #tpu.dot_dimension_numbers<[1], [0], [0], [1], [0, 0, 1, 1], [], []>} : vector<72x32xbf16>, vector<32x32xbf16>, vector<72x32xf32> -> vector<72x32xf32>
    %45 = arith.addf %41, %44 : vector<72x32xf32>
    %46 = arith.truncf %14 : vector<72x32xf32> to vector<72x32xbf16>
    %c256 = arith.constant 256 : index
    %c0_33 = arith.constant 0 : index
    %47 = vector.load %arg3[%c256, %c0_33] : memref<288x32xbf16, #tpu.memory_space<vmem>>, vector<32x32xbf16>
    %cst_34 = arith.constant dense<0.000000e+00> : vector<72x32xf32>
    %48 = tpu.matmul %46, %47, %cst_34 {dimension_numbers = #tpu.dot_dimension_numbers<[1], [0], [0], [1], [0, 0, 1, 1], [], []>} : vector<72x32xbf16>, vector<32x32xbf16>, vector<72x32xf32> -> vector<72x32xf32>
    %49 = arith.addf %45, %48 : vector<72x32xf32>
    %c0_35 = arith.constant 0 : index
    %c0_36 = arith.constant 0 : index
    %50 = vector.load %arg4[%c0_35, %c0_36] : memref<1x32xf32, #tpu.memory_space<vmem>>, vector<1x32xf32>
    %51 = vector.broadcast %50 : vector<1x32xf32> to vector<72x32xf32>
    %52 = arith.addf %49, %51 : vector<72x32xf32>
    %cst_37 = arith.constant 0.000000e+00 : f32
    %53 = vector.broadcast %cst_37 : f32 to vector<72x32xf32>
    %54 = arith.maximumf %52, %53 : vector<72x32xf32>
    %55 = arith.truncf %54 : vector<72x32xf32> to vector<72x32xbf16>
    %c0_38 = arith.constant 0 : index
    %c0_39 = arith.constant 0 : index
    %56 = vector.load %arg5[%c0_38, %c0_39] : memref<32x32xbf16, #tpu.memory_space<vmem>>, vector<32x32xbf16>
    %cst_40 = arith.constant dense<0.000000e+00> : vector<72x32xf32>
    %57 = tpu.matmul %55, %56, %cst_40 {dimension_numbers = #tpu.dot_dimension_numbers<[1], [0], [0], [1], [0, 0, 1, 1], [], []>} : vector<72x32xbf16>, vector<32x32xbf16>, vector<72x32xf32> -> vector<72x32xf32>
    %58 = arith.addf %5, %57 : vector<72x32xf32>
    %c0_41 = arith.constant 0 : index
    %c0_42 = arith.constant 0 : index
    %59 = vector.load %arg6[%c0_41, %c0_42] : memref<1x32xf32, #tpu.memory_space<vmem>>, vector<1x32xf32>
    %60 = vector.broadcast %59 : vector<1x32xf32> to vector<72x32xf32>
    %61 = arith.addf %58, %60 : vector<72x32xf32>
    %cst_43 = arith.constant 0.000000e+00 : f32
    %62 = vector.broadcast %cst_43 : f32 to vector<72x32xf32>
    %63 = arith.maximumf %61, %62 : vector<72x32xf32>
    %64 = vector.broadcast %0 : vector<72x1xf32> to vector<72x32xf32>
    %65 = arith.mulf %63, %64 : vector<72x32xf32>
    %c8_44 = arith.constant 8 : index
    %c0_45 = arith.constant 0 : index
    %66 = vector.load %arg15[%c8_44, %c0_45] : memref<88x32xf32, #tpu.memory_space<vmem>>, vector<72x32xf32>
    tpu.vector_store %arg15[%c8_44, %c0_45], %65 {strides = array<i32>} : memref<88x32xf32, #tpu.memory_space<vmem>>, vector<72x32xf32>,
    %c1_46 = arith.constant 1 : index
    %c0_47 = arith.constant 0 : index
    %67 = vector.load %arg15[%c1_46, %c0_47] : memref<88x32xf32, #tpu.memory_space<vmem>>, vector<72x32xf32>
    %c2_48 = arith.constant 2 : index
    %c0_49 = arith.constant 0 : index
    %68 = vector.load %arg15[%c2_48, %c0_49] : memref<88x32xf32, #tpu.memory_space<vmem>>, vector<72x32xf32>
    %c3_50 = arith.constant 3 : index
    %c0_51 = arith.constant 0 : index
    %69 = vector.load %arg15[%c3_50, %c0_51] : memref<88x32xf32, #tpu.memory_space<vmem>>, vector<72x32xf32>
    %c7_52 = arith.constant 7 : index
    %c0_53 = arith.constant 0 : index
    %70 = vector.load %arg15[%c7_52, %c0_53] : memref<88x32xf32, #tpu.memory_space<vmem>>, vector<72x32xf32>
    %c8_54 = arith.constant 8 : index
    %c0_55 = arith.constant 0 : index
    %71 = vector.load %arg15[%c8_54, %c0_55] : memref<88x32xf32, #tpu.memory_space<vmem>>, vector<72x32xf32>
    %c9_56 = arith.constant 9 : index
    %c0_57 = arith.constant 0 : index
    %72 = vector.load %arg15[%c9_56, %c0_57] : memref<88x32xf32, #tpu.memory_space<vmem>>, vector<72x32xf32>
    %c13_58 = arith.constant 13 : index
    %c0_59 = arith.constant 0 : index
    %73 = vector.load %arg15[%c13_58, %c0_59] : memref<88x32xf32, #tpu.memory_space<vmem>>, vector<72x32xf32>
    %c14_60 = arith.constant 14 : index
    %c0_61 = arith.constant 0 : index
    %74 = vector.load %arg15[%c14_60, %c0_61] : memref<88x32xf32, #tpu.memory_space<vmem>>, vector<72x32xf32>
    %c15_62 = arith.constant 15 : index
    %c0_63 = arith.constant 0 : index
    %75 = vector.load %arg15[%c15_62, %c0_63] : memref<88x32xf32, #tpu.memory_space<vmem>>, vector<72x32xf32>
    %76 = arith.truncf %67 : vector<72x32xf32> to vector<72x32xbf16>
    %c0_64 = arith.constant 0 : index
    %c0_65 = arith.constant 0 : index
    %77 = vector.load %arg7[%c0_64, %c0_65] : memref<288x32xbf16, #tpu.memory_space<vmem>>, vector<32x32xbf16>
    %cst_66 = arith.constant dense<0.000000e+00> : vector<72x32xf32>
    %78 = tpu.matmul %76, %77, %cst_66 {dimension_numbers = #tpu.dot_dimension_numbers<[1], [0], [0], [1], [0, 0, 1, 1], [], []>} : vector<72x32xbf16>, vector<32x32xbf16>, vector<72x32xf32> -> vector<72x32xf32>
    %79 = arith.truncf %68 : vector<72x32xf32> to vector<72x32xbf16>
    %c32_67 = arith.constant 32 : index
    %c0_68 = arith.constant 0 : index
    %80 = vector.load %arg7[%c32_67, %c0_68] : memref<288x32xbf16, #tpu.memory_space<vmem>>, vector<32x32xbf16>
    %cst_69 = arith.constant dense<0.000000e+00> : vector<72x32xf32>
    %81 = tpu.matmul %79, %80, %cst_69 {dimension_numbers = #tpu.dot_dimension_numbers<[1], [0], [0], [1], [0, 0, 1, 1], [], []>} : vector<72x32xbf16>, vector<32x32xbf16>, vector<72x32xf32> -> vector<72x32xf32>
    %82 = arith.addf %78, %81 : vector<72x32xf32>
    %83 = arith.truncf %69 : vector<72x32xf32> to vector<72x32xbf16>
    %c64_70 = arith.constant 64 : index
    %c0_71 = arith.constant 0 : index
    %84 = vector.load %arg7[%c64_70, %c0_71] : memref<288x32xbf16, #tpu.memory_space<vmem>>, vector<32x32xbf16>
    %cst_72 = arith.constant dense<0.000000e+00> : vector<72x32xf32>
    %85 = tpu.matmul %83, %84, %cst_72 {dimension_numbers = #tpu.dot_dimension_numbers<[1], [0], [0], [1], [0, 0, 1, 1], [], []>} : vector<72x32xbf16>, vector<32x32xbf16>, vector<72x32xf32> -> vector<72x32xf32>
    %86 = arith.addf %82, %85 : vector<72x32xf32>
    %87 = arith.truncf %70 : vector<72x32xf32> to vector<72x32xbf16>
    %c96_73 = arith.constant 96 : index
    %c0_74 = arith.constant 0 : index
    %88 = vector.load %arg7[%c96_73, %c0_74] : memref<288x32xbf16, #tpu.memory_space<vmem>>, vector<32x32xbf16>
    %cst_75 = arith.constant dense<0.000000e+00> : vector<72x32xf32>
    %89 = tpu.matmul %87, %88, %cst_75 {dimension_numbers = #tpu.dot_dimension_numbers<[1], [0], [0], [1], [0, 0, 1, 1], [], []>} : vector<72x32xbf16>, vector<32x32xbf16>, vector<72x32xf32> -> vector<72x32xf32>
    %90 = arith.addf %86, %89 : vector<72x32xf32>
    %91 = arith.truncf %71 : vector<72x32xf32> to vector<72x32xbf16>
    %c128_76 = arith.constant 128 : index
    %c0_77 = arith.constant 0 : index
    %92 = vector.load %arg7[%c128_76, %c0_77] : memref<288x32xbf16, #tpu.memory_space<vmem>>, vector<32x32xbf16>
    %cst_78 = arith.constant dense<0.000000e+00> : vector<72x32xf32>
    %93 = tpu.matmul %91, %92, %cst_78 {dimension_numbers = #tpu.dot_dimension_numbers<[1], [0], [0], [1], [0, 0, 1, 1], [], []>} : vector<72x32xbf16>, vector<32x32xbf16>, vector<72x32xf32> -> vector<72x32xf32>
    %94 = arith.addf %90, %93 : vector<72x32xf32>
    %95 = arith.truncf %72 : vector<72x32xf32> to vector<72x32xbf16>
    %c160_79 = arith.constant 160 : index
    %c0_80 = arith.constant 0 : index
    %96 = vector.load %arg7[%c160_79, %c0_80] : memref<288x32xbf16, #tpu.memory_space<vmem>>, vector<32x32xbf16>
    %cst_81 = arith.constant dense<0.000000e+00> : vector<72x32xf32>
    %97 = tpu.matmul %95, %96, %cst_81 {dimension_numbers = #tpu.dot_dimension_numbers<[1], [0], [0], [1], [0, 0, 1, 1], [], []>} : vector<72x32xbf16>, vector<32x32xbf16>, vector<72x32xf32> -> vector<72x32xf32>
    %98 = arith.addf %94, %97 : vector<72x32xf32>
    %99 = arith.truncf %73 : vector<72x32xf32> to vector<72x32xbf16>
    %c192_82 = arith.constant 192 : index
    %c0_83 = arith.constant 0 : index
    %100 = vector.load %arg7[%c192_82, %c0_83] : memref<288x32xbf16, #tpu.memory_space<vmem>>, vector<32x32xbf16>
    %cst_84 = arith.constant dense<0.000000e+00> : vector<72x32xf32>
    %101 = tpu.matmul %99, %100, %cst_84 {dimension_numbers = #tpu.dot_dimension_numbers<[1], [0], [0], [1], [0, 0, 1, 1], [], []>} : vector<72x32xbf16>, vector<32x32xbf16>, vector<72x32xf32> -> vector<72x32xf32>
    %102 = arith.addf %98, %101 : vector<72x32xf32>
    %103 = arith.truncf %74 : vector<72x32xf32> to vector<72x32xbf16>
    %c224_85 = arith.constant 224 : index
    %c0_86 = arith.constant 0 : index
    %104 = vector.load %arg7[%c224_85, %c0_86] : memref<288x32xbf16, #tpu.memory_space<vmem>>, vector<32x32xbf16>
    %cst_87 = arith.constant dense<0.000000e+00> : vector<72x32xf32>
    %105 = tpu.matmul %103, %104, %cst_87 {dimension_numbers = #tpu.dot_dimension_numbers<[1], [0], [0], [1], [0, 0, 1, 1], [], []>} : vector<72x32xbf16>, vector<32x32xbf16>, vector<72x32xf32> -> vector<72x32xf32>
    %106 = arith.addf %102, %105 : vector<72x32xf32>
    %107 = arith.truncf %75 : vector<72x32xf32> to vector<72x32xbf16>
    %c256_88 = arith.constant 256 : index
    %c0_89 = arith.constant 0 : index
    %108 = vector.load %arg7[%c256_88, %c0_89] : memref<288x32xbf16, #tpu.memory_space<vmem>>, vector<32x32xbf16>
    %cst_90 = arith.constant dense<0.000000e+00> : vector<72x32xf32>
    %109 = tpu.matmul %107, %108, %cst_90 {dimension_numbers = #tpu.dot_dimension_numbers<[1], [0], [0], [1], [0, 0, 1, 1], [], []>} : vector<72x32xbf16>, vector<32x32xbf16>, vector<72x32xf32> -> vector<72x32xf32>
    %110 = arith.addf %106, %109 : vector<72x32xf32>
    %c0_91 = arith.constant 0 : index
    %c0_92 = arith.constant 0 : index
    %111 = vector.load %arg8[%c0_91, %c0_92] : memref<1x32xf32, #tpu.memory_space<vmem>>, vector<1x32xf32>
    %112 = vector.broadcast %111 : vector<1x32xf32> to vector<72x32xf32>
    %113 = arith.addf %110, %112 : vector<72x32xf32>
    %cst_93 = arith.constant 0.000000e+00 : f32
    %114 = vector.broadcast %cst_93 : f32 to vector<72x32xf32>
    %115 = arith.maximumf %113, %114 : vector<72x32xf32>
    %116 = arith.truncf %115 : vector<72x32xf32> to vector<72x32xbf16>
    %c0_94 = arith.constant 0 : index
    %c0_95 = arith.constant 0 : index
    %117 = vector.load %arg9[%c0_94, %c0_95] : memref<32x32xbf16, #tpu.memory_space<vmem>>, vector<32x32xbf16>
    %cst_96 = arith.constant dense<0.000000e+00> : vector<72x32xf32>
    %118 = tpu.matmul %116, %117, %cst_96 {dimension_numbers = #tpu.dot_dimension_numbers<[1], [0], [0], [1], [0, 0, 1, 1], [], []>} : vector<72x32xbf16>, vector<32x32xbf16>, vector<72x32xf32> -> vector<72x32xf32>
    %119 = arith.addf %61, %118 : vector<72x32xf32>
    %c0_97 = arith.constant 0 : index
    %c0_98 = arith.constant 0 : index
    %120 = vector.load %arg10[%c0_97, %c0_98] : memref<1x32xf32, #tpu.memory_space<vmem>>, vector<1x32xf32>
    %121 = vector.broadcast %120 : vector<1x32xf32> to vector<72x32xf32>
    %122 = arith.addf %119, %121 : vector<72x32xf32>
    %c0_99 = arith.constant 0 : index
    %c0_100 = arith.constant 0 : index
    %123 = vector.load %arg13[%c0_99, %c0_100] : memref<1x128xf32, #tpu.memory_space<vmem>>, vector<1x128xf32>
    %c0_101 = arith.constant 0 : index
    %c0_102 = arith.constant 0 : index
    %124 = vector.load %arg11[%c0_101, %c0_102] : memref<32x128xf32, #tpu.memory_space<vmem>>, vector<32x128xf32>
    %cst_103 = arith.constant dense<0.000000e+00> : vector<72x128xf32>
    %125 = tpu.matmul %122, %124, %cst_103 {dimension_numbers = #tpu.dot_dimension_numbers<[1], [0], [0], [1], [0, 0, 1, 1], [], []>} : vector<72x32xf32>, vector<32x128xf32>, vector<72x128xf32> -> vector<72x128xf32>
    %cst_104 = arith.constant 2.000000e+00 : f32
    %126 = vector.broadcast %cst_104 : f32 to vector<72x128xf32>
    %127 = arith.mulf %126, %125 : vector<72x128xf32>
    %128 = vector.broadcast %123 : vector<1x128xf32> to vector<72x128xf32>
    %129 = arith.subf %128, %127 : vector<72x128xf32>
    %cst_105 = arith.constant dense<0x7F800000> : vector<72xf32>
    %130 = vector.multi_reduction <minimumf>, %129, %cst_105 [1] : vector<72x128xf32> to vector<72xf32>
    %131 = vector.shape_cast %130 : vector<72xf32> to vector<72x1xf32>
    %132 = tpu.iota {dimensions = array<i32: 1>} : vector<72x128xi32>
    %133 = vector.broadcast %131 : vector<72x1xf32> to vector<72x128xf32>
    %134 = arith.cmpf ole, %129, %133 : vector<72x128xf32>
    %c128_i32 = arith.constant 128 : i32
    %135 = vector.broadcast %c128_i32 : i32 to vector<72x128xi32>
    %136 = arith.select %134, %132, %135 : vector<72x128xi1>, vector<72x128xi32>
    %cst_106 = arith.constant dense<2147483647> : vector<72xi32>
    %137 = vector.multi_reduction <minsi>, %136, %cst_106 [1] : vector<72x128xi32> to vector<72xi32>
    %138 = vector.shape_cast %137 : vector<72xi32> to vector<72x1xi32>
    %139 = vector.broadcast %138 : vector<72x1xi32> to vector<72x128xi32>
    %140 = arith.cmpi eq, %132, %139 : vector<72x128xi32>
    %141 = arith.extui %140 : vector<72x128xi1> to vector<72x128xi32>
    %142 = arith.sitofp %141 : vector<72x128xi32> to vector<72x128xf32>
    %c0_107 = arith.constant 0 : index
    %c0_108 = arith.constant 0 : index
    %143 = vector.load %arg12[%c0_107, %c0_108] : memref<128x32xf32, #tpu.memory_space<vmem>>, vector<128x32xf32>
    %cst_109 = arith.constant dense<0.000000e+00> : vector<72x32xf32>
    %144 = tpu.matmul %142, %143, %cst_109 {dimension_numbers = #tpu.dot_dimension_numbers<[1], [0], [0], [1], [0, 0, 1, 1], [], []>} : vector<72x128xf32>, vector<128x32xf32>, vector<72x32xf32> -> vector<72x32xf32>
    %c0_110 = arith.constant 0 : index
    %c0_111 = arith.constant 0 : index
    %145 = vector.load %arg14[%c0_110, %c0_111] : memref<72x32xf32, #tpu.memory_space<vmem>>, vector<72x32xf32>
    tpu.vector_store %arg14[%c0_110, %c0_111], %144 {strides = array<i32>} : memref<72x32xf32, #tpu.memory_space<vmem>>, vector<72x32xf32>,
    return
  }
  func.func @transform_0(%arg0: i32) -> (i32, i32) {
    %c0_i32 = arith.constant 0 : i32
    %c0_i32_0 = arith.constant 0 : i32
    %c0_i32_1 = arith.constant 0 : i32
    return %c0_i32, %c0_i32_0 : i32, i32
  }
  func.func @transform_1(%arg0: i32) -> (i32, i32) {
    %c0_i32 = arith.constant 0 : i32
    %c0_i32_0 = arith.constant 0 : i32
    %c0_i32_1 = arith.constant 0 : i32
    return %c0_i32, %c0_i32_0 : i32, i32
  }
  func.func @transform_2(%arg0: i32) -> (i32, i32) {
    %c0_i32 = arith.constant 0 : i32
    %c0_i32_0 = arith.constant 0 : i32
    %c0_i32_1 = arith.constant 0 : i32
    return %c0_i32, %c0_i32_0 : i32, i32
  }
  func.func @transform_3(%arg0: i32) -> (i32, i32) {
    %c0_i32 = arith.constant 0 : i32
    %c0_i32_0 = arith.constant 0 : i32
    %c0_i32_1 = arith.constant 0 : i32
    return %c0_i32, %c0_i32_0 : i32, i32
  }
  func.func @transform_4(%arg0: i32) -> (i32, i32) {
    %c0_i32 = arith.constant 0 : i32
    %c0_i32_0 = arith.constant 0 : i32
    %c0_i32_1 = arith.constant 0 : i32
    return %c0_i32, %c0_i32_0 : i32, i32
  }
  func.func @transform_5(%arg0: i32) -> (i32, i32) {
    %c0_i32 = arith.constant 0 : i32
    %c0_i32_0 = arith.constant 0 : i32
    %c0_i32_1 = arith.constant 0 : i32
    return %c0_i32, %c0_i32_0 : i32, i32
  }
  func.func @transform_6(%arg0: i32) -> (i32, i32) {
    %c0_i32 = arith.constant 0 : i32
    %c0_i32_0 = arith.constant 0 : i32
    %c0_i32_1 = arith.constant 0 : i32
    return %c0_i32, %c0_i32_0 : i32, i32
  }
  func.func @transform_7(%arg0: i32) -> (i32, i32) {
    %c0_i32 = arith.constant 0 : i32
    %c0_i32_0 = arith.constant 0 : i32
    %c0_i32_1 = arith.constant 0 : i32
    return %c0_i32, %c0_i32_0 : i32, i32
  }
  func.func @transform_8(%arg0: i32) -> (i32, i32) {
    %c0_i32 = arith.constant 0 : i32
    %c0_i32_0 = arith.constant 0 : i32
    %c0_i32_1 = arith.constant 0 : i32
    return %c0_i32, %c0_i32_0 : i32, i32
  }
  func.func @transform_9(%arg0: i32) -> (i32, i32) {
    %c0_i32 = arith.constant 0 : i32
    %c0_i32_0 = arith.constant 0 : i32
    %c0_i32_1 = arith.constant 0 : i32
    return %c0_i32, %c0_i32_0 : i32, i32
  }
  func.func @transform_10(%arg0: i32) -> (i32, i32) {
    %c0_i32 = arith.constant 0 : i32
    %c0_i32_0 = arith.constant 0 : i32
    %c0_i32_1 = arith.constant 0 : i32
    return %c0_i32, %c0_i32_0 : i32, i32
  }
  func.func @transform_11(%arg0: i32) -> (i32, i32) {
    %c0_i32 = arith.constant 0 : i32
    %c0_i32_0 = arith.constant 0 : i32
    %c0_i32_1 = arith.constant 0 : i32
    return %c0_i32, %c0_i32_0 : i32, i32
  }
  func.func @transform_12(%arg0: i32) -> (i32, i32) {
    %c0_i32 = arith.constant 0 : i32
    %c0_i32_0 = arith.constant 0 : i32
    %c0_i32_1 = arith.constant 0 : i32
    return %c0_i32, %c0_i32_0 : i32, i32
  }
  func.func @transform_13(%arg0: i32) -> (i32, i32) {
    %c0_i32 = arith.constant 0 : i32
    %c0_i32_0 = arith.constant 0 : i32
    %c0_i32_1 = arith.constant 0 : i32
    return %c0_i32, %c0_i32_0 : i32, i32
  }
}

</mosaic_0001>

<bundles_post_ra>
// kernel: vqvae_forward.4
= control target key start
LH: loop header
LB: loop body
LE: loop exit
PB: predicated region body
PF: predicated region fallthrough
CT: control target
= control target key end

     0   :  { %vm430_vm0 = vcmask 261120   ;;  %vm437_vm1 = vcmask 254976   ;;  %s834_s1 = inlined_call_operand.vmem [shape: bf16[512,32], index: 1, kind: input, shape index: {}]   ;;  %s835_s2 = inlined_call_operand.vmem [shape: f32[1,32], index: 2, kind: input, shape index: {}]   ;;  %s836_s0 = inlined_call_operand.vmem [shape: f32[58,128], index: 0, kind: input, shape index: {}]   ;;  %s837_s3 = inlined_call_operand.vmem [shape: f32[50,32], index: 3, kind: output, shape index: {}]  }
   0x1   :  { %v578_v0 = vld [vmem:[%s834_s1 + $0x38] sm:$0xff]  ;;  %v577_v4 = vld [vmem:[%s834_s1 + $0x30] sm:$0xff]  ;;  %v576_v8 = vld [vmem:[%s834_s1 + $0x28] sm:$0xff] }
   0x2   :  { %v586_v1 = vld [vmem:[%s834_s1 + $0x78] sm:$0xff]  ;;  %318 = vmatpush.bf16.msra.mxu0 %v578_v0  ;;  %v585_v5 = vld [vmem:[%s834_s1 + $0x70] sm:$0xff]  ;;  %v584_v9 = vld [vmem:[%s834_s1 + $0x68] sm:$0xff] }
   0x3   :  { %v594_v2 = vld [vmem:[%s834_s1 + $0xb8] sm:$0xff]  ;;  %346 = vmatpush.bf16.msra.mxu1 %v586_v1  ;;  %v593_v6 = vld [vmem:[%s834_s1 + $0xb0] sm:$0xff]  ;;  %v592_v10 = vld [vmem:[%s834_s1 + $0xa8] sm:$0xff] }
   0x4   :  { %v602_v3 = vld [vmem:[%s834_s1 + $0xf8] sm:$0xff]  ;;  %374 = vmatpush.bf16.msra.mxu2 %v594_v2  ;;  %v601_v7 = vld [vmem:[%s834_s1 + $0xf0] sm:$0xff]  ;;  %v600_v11 = vld [vmem:[%s834_s1 + $0xe8] sm:$0xff] }
   0x5   :  { %402 = vmatpush.bf16.msra.mxu3 %v602_v3  ;;  %v575_v12 = vld [vmem:[%s834_s1 + $0x20] sm:$0xff]  ;;  %v574_v16 = vld [vmem:[%s834_s1 + $0x18] sm:$0xff]  ;;  %v573_v20 = vld [vmem:[%s834_s1 + $0x10] sm:$0xff] }
   0x6   :  { %319 = vmatpush.bf16.msra.mxu0 %v577_v4  ;;  %v583_v13 = vld [vmem:[%s834_s1 + $0x60] sm:$0xff]  ;;  %v582_v17 = vld [vmem:[%s834_s1 + $0x58] sm:$0xff]  ;;  %v581_v21 = vld [vmem:[%s834_s1 + $0x50] sm:$0xff] }
   0x7   :  { %347 = vmatpush.bf16.msra.mxu1 %v585_v5  ;;  %v591_v14 = vld [vmem:[%s834_s1 + $0xa0] sm:$0xff]  ;;  %v590_v18 = vld [vmem:[%s834_s1 + $0x98] sm:$0xff]  ;;  %v589_v22 = vld [vmem:[%s834_s1 + $0x90] sm:$0xff] }
   0x8   :  { %375 = vmatpush.bf16.msra.mxu2 %v593_v6  ;;  %v599_v15 = vld [vmem:[%s834_s1 + $0xe0] sm:$0xff]  ;;  %v598_v19 = vld [vmem:[%s834_s1 + $0xd8] sm:$0xff]  ;;  %v597_v23 = vld [vmem:[%s834_s1 + $0xd0] sm:$0xff] }
   0x9   :  { %403 = vmatpush.bf16.msra.mxu3 %v601_v7  ;;  %v572_v24 = vld [vmem:[%s834_s1 + $0x8] sm:$0xff]  ;;  %v571_v28 = vld [vmem:[%s834_s1] sm:$0xff]  ;;  %v16_v44 = vld [vmem:[%s836_s0 + $0x10] sm:$0xff] }
   0xa   :  { %320 = vmatpush.bf16.msra.mxu0 %v576_v8  ;;  %v580_v25 = vld [vmem:[%s834_s1 + $0x48] sm:$0xff]  ;;  %v579_v29 = vld [vmem:[%s834_s1 + $0x40] sm:$0xff]  ;;  %v17_v45 = vld [vmem:[%s836_s0 + $0x18] sm:$0xff] }
   0xb   :  { %348 = vmatpush.bf16.msra.mxu1 %v584_v9  ;;  %v588_v26 = vld [vmem:[%s834_s1 + $0x88] sm:$0xff]  ;;  %v587_v30 = vld [vmem:[%s834_s1 + $0x80] sm:$0xff]  ;;  %v23_v46 = vld [vmem:[%s836_s0 + $0x11] sm:$0xff]  ;;  %v46_v52 = vpack.c.bf16 %v17_v45, %v16_v44 }
   0xc   :  { %376 = vmatpush.bf16.msra.mxu2 %v592_v10  ;;  %v596_v27 = vld [vmem:[%s834_s1 + $0xc8] sm:$0xff]  ;;  %v595_v31 = vld [vmem:[%s834_s1 + $0xc0] sm:$0xff]  ;;  %v30_v48 = vld [vmem:[%s836_s0 + $0x15] sm:$0xff] }
   0xd   :  { %404 = vmatpush.bf16.msra.mxu3 %v600_v11  ;;  %v14_v32 = vld [vmem:[%s836_s0] sm:$0xff]  ;;  %v15_v33 = vld [vmem:[%s836_s0 + $0x8] sm:$0xff]  ;;  %v37_v50 = vld [vmem:[%s836_s0 + $0x16] sm:$0xff] }
   0xe   :  { %321 = vmatpush.bf16.msra.mxu0 %v575_v12  ;;  %v21_v34 = vld [vmem:[%s836_s0 + $0x1] sm:$0xff]  ;;  %v22_v35 = vld [vmem:[%s836_s0 + $0x9] sm:$0xff]  ;;  %v42_v40 = vpack.c.bf16 %v15_v33, %v14_v32  ;;  %v24_v47 = vld [vmem:[%s836_s0 + $0x19] sm:$0xff] }
   0xf   :  { %349 = vmatpush.bf16.msra.mxu1 %v583_v13  ;;  %v28_v36 = vld [vmem:[%s836_s0 + $0x5] sm:$0xff]  ;;  %v29_v37 = vld [vmem:[%s836_s0 + $0xd] sm:$0xff]  ;;  %v43_v41 = vpack.c.bf16 %v22_v35, %v21_v34  ;;  %v31_v49 = vld [vmem:[%s836_s0 + $0x1d] sm:$0xff]  ;;  %v47_v53 = vpack.c.bf16 %v24_v47, %v23_v46 }
  0x10   :  { %377 = vmatpush.bf16.msra.mxu2 %v591_v14  ;;  %v35_v38 = vld [vmem:[%s836_s0 + $0x6] sm:$0xff]  ;;  %v36_v39 = vld [vmem:[%s836_s0 + $0xe] sm:$0xff]  ;;  %v44_v42 = vpack.c.bf16 %v29_v37, %v28_v36  ;;  %v38_v51 = vld [vmem:[%s836_s0 + $0x1e] sm:$0xff]  ;;  %v48_v54 = vpack.c.bf16 %v31_v49, %v30_v48 }
  0x11   :  { %405 = vmatpush.bf16.msra.mxu3 %v599_v15  ;;  %v45_v43 = vpack.c.bf16 %v36_v39, %v35_v38  ;;  %v49_v55 = vpack.c.bf16 %v38_v51, %v37_v50  ;;  %v18_v56 = vld [vmem:[%s836_s0 + $0x20] sm:$0xff]  ;;  %v19_v57 = vld [vmem:[%s836_s0 + $0x28] sm:$0xff]  ;;  %v20_v4 = vld [vmem:[%s836_s0 + $0x30] sm:$0x3] }
  0x12   :  { %322 = vmatpush.bf16.msra.mxu0 %v574_v16  ;;  %v25_v58 = vld [vmem:[%s836_s0 + $0x21] sm:$0xff]  ;;  %v26_v59 = vld [vmem:[%s836_s0 + $0x29] sm:$0xff]  ;;  %v50_v0 = vpack.c.bf16 %v19_v57, %v18_v56  ;;  %v27_v5 = vld [vmem:[%s836_s0 + $0x31] sm:$0x3]  ;;  %v54_v8 = vpack.c.bf16 %v20_v4, %v20_v4 }
  0x13   :  { %350 = vmatpush.bf16.msra.mxu1 %v582_v17  ;;  %v32_v60 = vld [vmem:[%s836_s0 + $0x25] sm:$0xff]  ;;  %v33_v61 = vld [vmem:[%s836_s0 + $0x2d] sm:$0xff]  ;;  %v51_v1 = vpack.c.bf16 %v26_v59, %v25_v58  ;;  %v34_v6 = vld [vmem:[%s836_s0 + $0x35] sm:$0x3]  ;;  %v55_v9 = vpack.c.bf16 %v27_v5, %v27_v5 }
  0x14   :  { %378 = vmatpush.bf16.msra.mxu2 %v590_v18  ;;  %v39_v62 = vld [vmem:[%s836_s0 + $0x26] sm:$0xff]  ;;  %v40_v63 = vld [vmem:[%s836_s0 + $0x2e] sm:$0xff]  ;;  %v52_v2 = vpack.c.bf16 %v33_v61, %v32_v60  ;;  %v41_v7 = vld [vmem:[%s836_s0 + $0x36] sm:$0x3]  ;;  %v56_v10 = vpack.c.bf16 %v34_v6, %v34_v6 }
  0x15   :  { %406 = vmatpush.bf16.msra.mxu3 %v598_v19  ;;  %v53_v3 = vpack.c.bf16 %v40_v63, %v39_v62  ;;  %v57_v11 = vpack.c.bf16 %v41_v7, %v41_v7  ;;  %v603_v12 = vld [vmem:[%s835_s2] ss:$0 sm:$0xff] }
  0x16   :  { %323 = vmatpush.bf16.msra.mxu0 %v573_v20 }
  0x17   :  { %351 = vmatpush.bf16.msra.mxu1 %v581_v21 }
  0x18   :  { %379 = vmatpush.bf16.msra.mxu2 %v589_v22 }
  0x19   :  { %407 = vmatpush.bf16.msra.mxu3 %v597_v23 }
  0x1a   :  { %324 = vmatpush.bf16.msra.mxu0 %v572_v24 }
  0x1b   :  { %352 = vmatpush.bf16.msra.mxu1 %v580_v25 }
  0x1c   :  { %380 = vmatpush.bf16.msra.mxu2 %v588_v26 }
  0x1d   :  { %408 = vmatpush.bf16.msra.mxu3 %v596_v27 }
  0x1e   :  { %325 = vmatpush.bf16.msra.mxu0 %v571_v28 }
  0x1f   :  { %353 = vmatpush.bf16.msra.mxu1 %v579_v29 }
  0x20   :  { %381 = vmatpush.bf16.msra.mxu2 %v587_v30 }
  0x21   :  { %409 = vmatpush.bf16.msra.mxu3 %v595_v31  ;;  %326 = vmatmul.bf16.vlgmr.msra.gmra.mxu0 %v42_v40 }
  0x22   :  { %354 = vmatmul.bf16.vlgmr.msra.gmra.mxu1 %v43_v41 }
  0x23   :  { %382 = vmatmul.bf16.vlgmr.msra.gmra.mxu2 %v44_v42 }
  0x24   :  { %410 = vmatmul.bf16.vlgmr.msra.gmra.mxu3 %v45_v43 }
  0x31   :  { %331 = vmatmul.bf16.gmra.mxu0 %v46_v52 }
  0x32   :  { %359 = vmatmul.bf16.gmra.mxu1 %v47_v53 }
  0x33   :  { %387 = vmatmul.bf16.gmra.mxu2 %v48_v54 }
  0x34   :  { %415 = vmatmul.bf16.gmra.mxu3 %v49_v55 }
  0x41   :  { %336 = vmatmul.bf16.gmra.mxu0 %v50_v0 }
  0x42   :  { %364 = vmatmul.bf16.gmra.mxu1 %v51_v1 }
  0x43   :  { %392 = vmatmul.bf16.gmra.mxu2 %v52_v2 }
  0x44   :  { %420 = vmatmul.bf16.gmra.mxu3 %v53_v3 }
  0x51   :  { %341 = vmatmul.bf16.gmra.mxu0 %v54_v8 }
  0x52   :  { %369 = vmatmul.bf16.gmra.mxu1 %v55_v9 }
  0x53   :  { %397 = vmatmul.bf16.gmra.mxu2 %v56_v10 }
  0x54   :  { %425 = vmatmul.bf16.gmra.mxu3 %v57_v11 }
  0x9e   :  { %v327_v13 = vpop.f32.mrf.mxu0 }
  0x9f   :  { %v355_v14 = vpop.f32.mrf.mxu1  ;;  %v328_v15 = vadd.f32 %v603_v12, %v327_v13 }
  0xa1   :  { %v356_v16 = vadd.f32 %v355_v14, %v328_v15 }
  0xa6   :  { %v383_v17 = vpop.f32.mrf.mxu2  ;;  %v329_v20 = vpop.f32.mrf.mxu0 }
  0xa7   :  { %v411_v18 = vpop.f32.mrf.mxu3  ;;  %v384_v19 = vadd.f32 %v383_v17, %v356_v16  ;;  %v357_v21 = vpop.f32.mrf.mxu1  ;;  %v330_v23 = vadd.f32 %v603_v12, %v329_v20 }
  0xa9   :  { %v412_v22 = vadd.f32 %v411_v18, %v384_v19  ;;  %v358_v24 = vadd.f32 %v357_v21, %v330_v23 }
  0xab   :  { %431 = vst.msk [vmem:[%s837_s3] sm:$0xff] %vm430_vm0, %v412_v22 }
  0xae   :  { %v385_v25 = vpop.f32.mrf.mxu2  ;;  %v332_v28 = vpop.f32.mrf.mxu0 }
  0xaf   :  { %v413_v26 = vpop.f32.mrf.mxu3  ;;  %v386_v27 = vadd.f32 %v385_v25, %v358_v24  ;;  %v360_v29 = vpop.f32.mrf.mxu1  ;;  %v333_v30 = vadd.f32 %v603_v12, %v332_v28 }
  0xb1   :  { %v414_v31 = vadd.f32 %v413_v26, %v386_v27  ;;  %v361_v32 = vadd.f32 %v360_v29, %v333_v30 }
  0xb3   :  { %432 = vst.msk [vmem:[%s837_s3 + $0x8] sm:$0xff] %vm430_vm0, %v414_v31 }
  0xb6   :  { %v388_v33 = vpop.f32.mrf.mxu2  ;;  %v334_v36 = vpop.f32.mrf.mxu0 }
  0xb7   :  { %v416_v34 = vpop.f32.mrf.mxu3  ;;  %v389_v35 = vadd.f32 %v388_v33, %v361_v32  ;;  %v362_v37 = vpop.f32.mrf.mxu1  ;;  %v335_v39 = vadd.f32 %v603_v12, %v334_v36 }
  0xb9   :  { %v417_v38 = vadd.f32 %v416_v34, %v389_v35  ;;  %v363_v40 = vadd.f32 %v362_v37, %v335_v39 }
  0xbb   :  { %433 = vst.msk [vmem:[%s837_s3 + $0x10] sm:$0xff] %vm430_vm0, %v417_v38 }
  0xbe   :  { %v390_v41 = vpop.f32.mrf.mxu2  ;;  %v337_v44 = vpop.f32.mrf.mxu0 }
  0xbf   :  { %v418_v42 = vpop.f32.mrf.mxu3  ;;  %v391_v43 = vadd.f32 %v390_v41, %v363_v40  ;;  %v365_v45 = vpop.f32.mrf.mxu1  ;;  %v338_v46 = vadd.f32 %v603_v12, %v337_v44 }
  0xc1   :  { %v419_v47 = vadd.f32 %v418_v42, %v391_v43  ;;  %v366_v48 = vadd.f32 %v365_v45, %v338_v46 }
  0xc3   :  { %434 = vst.msk [vmem:[%s837_s3 + $0x18] sm:$0xff] %vm430_vm0, %v419_v47 }
  0xc6   :  { %v393_v49 = vpop.f32.mrf.mxu2  ;;  %v339_v52 = vpop.f32.mrf.mxu0 }
  0xc7   :  { %v421_v50 = vpop.f32.mrf.mxu3  ;;  %v394_v51 = vadd.f32 %v393_v49, %v366_v48  ;;  %v367_v53 = vpop.f32.mrf.mxu1  ;;  %v340_v55 = vadd.f32 %v603_v12, %v339_v52 }
  0xc9   :  { %v422_v54 = vadd.f32 %v421_v50, %v394_v51  ;;  %v368_v56 = vadd.f32 %v367_v53, %v340_v55 }
  0xcb   :  { %435 = vst.msk [vmem:[%s837_s3 + $0x20] sm:$0xff] %vm430_vm0, %v422_v54 }
  0xce   :  { %v395_v57 = vpop.f32.mrf.mxu2  ;;  %v342_v60 = vpop.f32.mrf.mxu0 }
  0xcf   :  { %v423_v58 = vpop.f32.mrf.mxu3  ;;  %v396_v59 = vadd.f32 %v395_v57, %v368_v56  ;;  %v370_v61 = vpop.f32.mrf.mxu1  ;;  %v343_v62 = vadd.f32 %v603_v12, %v342_v60 }
  0xd1   :  { %v424_v63 = vadd.f32 %v423_v58, %v396_v59  ;;  %v371_v0 = vadd.f32 %v370_v61, %v343_v62 }
  0xd3   :  { %436 = vst.msk [vmem:[%s837_s3 + $0x28] sm:$0xff] %vm430_vm0, %v424_v63 }
  0xd6   :  { %v398_v1 = vpop.f32.mrf.mxu2  ;;  %v344_v4 = vpop.f32.mrf.mxu0 }
  0xd7   :  { %v426_v2 = vpop.f32.mrf.mxu3  ;;  %v399_v3 = vadd.f32 %v398_v1, %v371_v0  ;;  %v372_v5 = vpop.f32.mrf.mxu1 }
  0xd9   :  { %v427_v6 = vadd.f32 %v426_v2, %v399_v3 }
  0xdb   :  { %438 = vst.msk [vmem:[%s837_s3 + $0x30] sm:$0x3] %vm437_vm1, %v427_v6 }
  0xde   :  { %v400_v7 = vpop.f32.mrf.mxu2 }
  0xdf   :  { %v428_v8 = vpop.f32.mrf.mxu3 }

// kernel: vqvae_forward.3
= control target key start
LH: loop header
LB: loop body
LE: loop exit
PB: predicated region body
PF: predicated region fallthrough
CT: control target
= control target key end

     0   :  { %vm112_vm0 = vcmask 130048   ;;  %vm629_vm1 = vcmask 261120   ;;  %vm650_vm2 = vcmask 254976   ;;  %s1101_s1 = inlined_call_operand.vmem [shape: bf16[64,32], index: 1, kind: input, shape index: {}]   ;;  %s1102_s0 = inlined_call_operand.vmem [shape: f32[178,16], index: 0, kind: input, shape index: {}]   ;;  %s1103_s2 = inlined_call_operand.vmem [shape: f32[1,32], index: 2, kind: input, shape index: {}]   ;;  %s1104_s3 = inlined_call_operand.vmem [shape: f32[162,32], index: 3, kind: output, shape index: {}]  }
   0x1   :  { %v717_v0 = vld [vmem:[%s1101_s1 + $0x8] sm:$0xff]  ;;  %v716_v1 = vld [vmem:[%s1101_s1] sm:$0xff]  ;;  %v718_v2 = vld [vmem:[%s1101_s1 + $0x10] sm:$0xff] }
   0x2   :  { %v719_v3 = vld [vmem:[%s1101_s1 + $0x18] sm:$0xff]  ;;  %v36_v4 = vld [vmem:[%s1102_s0 + $0x1] sm:$0xff]  ;;  %v37_v5 = vld [vmem:[%s1102_s0 + $0x9] sm:$0xff]  ;;  %153 = vmatpush.bf16.msra.mxu0 %v717_v0  ;;  %255 = vmatpush.bf16.msra.mxu1 %v716_v1 }
   0x3   :  { %v93_v6 = vpack.c.bf16 %v37_v5, %v36_v4  ;;  %v15_v7 = vld [vmem:[%s1102_s0] sm:$0xff]  ;;  %v16_v8 = vld [vmem:[%s1102_s0 + $0x8] sm:$0xff]  ;;  %v38_v9 = vld [vmem:[%s1102_s0 + $0x11] sm:$0xff]  ;;  %370 = vmatpush.bf16.msra.mxu2 %v718_v2  ;;  %506 = vmatpush.bf16.msra.mxu3 %v719_v3 }
   0x4   :  { %v80_v10 = vpack.c.bf16 %v16_v8, %v15_v7  ;;  %v311_v11 = vpack.c.bf16 %v38_v9, %v37_v5  ;;  %v59_v12 = vld [vmem:[%s1102_s0 + $0xa] sm:$0xff]  ;;  %v60_v13 = vld [vmem:[%s1102_s0 + $0x12] sm:$0xff]  ;;  %v40_v18 = vld [vmem:[%s1102_s0 + $0x21] sm:$0xff] }
   0x5   :  { %v447_v14 = vpack.c.bf16 %v60_v13, %v59_v12  ;;  %660 = vmatmul.msk.bf16.vlgmr.msra.gmra.mxu0 %vm112_vm0, %v93_v6  ;;  %v39_v15 = vld [vmem:[%s1102_s0 + $0x19] sm:$0xff]  ;;  %v17_v16 = vld [vmem:[%s1102_s0 + $0x10] sm:$0xff]  ;;  %v62_v20 = vld [vmem:[%s1102_s0 + $0x22] sm:$0xff] }
   0x6   :  { %675 = vmatmul.msk.bf16.vlgmr.msra.gmra.mxu1 %vm112_vm0, %v80_v10  ;;  %690 = vmatmul.msk.bf16.vlgmr.msra.gmra.mxu2 %vm112_vm0, %v311_v11  ;;  %v18_v17 = vld [vmem:[%s1102_s0 + $0x18] sm:$0xff]  ;;  %v94_v21 = vpack.c.bf16 %v39_v15, %v38_v9  ;;  %v312_v23 = vpack.c.bf16 %v40_v18, %v39_v15  ;;  %v41_v25 = vld [vmem:[%s1102_s0 + $0x29] sm:$0xff]  ;;  %v19_v26 = vld [vmem:[%s1102_s0 + $0x20] sm:$0xff] }
   0x7   :  { %705 = vmatmul.msk.bf16.vlgmr.msra.gmra.mxu3 %vm112_vm0, %v447_v14  ;;  %v61_v19 = vld [vmem:[%s1102_s0 + $0x1a] sm:$0xff]  ;;  %v81_v22 = vpack.c.bf16 %v18_v17, %v17_v16  ;;  %v20_v27 = vld [vmem:[%s1102_s0 + $0x28] sm:$0xff]  ;;  %v42_v28 = vld [vmem:[%s1102_s0 + $0x31] sm:$0xff]  ;;  %v95_v31 = vpack.c.bf16 %v41_v25, %v40_v18 }
   0x8   :  { %v448_v24 = vpack.c.bf16 %v62_v20, %v61_v19  ;;  %v63_v29 = vld [vmem:[%s1102_s0 + $0x2a] sm:$0xff]  ;;  %v64_v30 = vld [vmem:[%s1102_s0 + $0x32] sm:$0xff]  ;;  %v82_v32 = vpack.c.bf16 %v20_v27, %v19_v26  ;;  %v313_v33 = vpack.c.bf16 %v42_v28, %v41_v25  ;;  %v44_v38 = vld [vmem:[%s1102_s0 + $0x41] sm:$0xff] }
   0x9   :  { %v449_v34 = vpack.c.bf16 %v64_v30, %v63_v29  ;;  %v43_v35 = vld [vmem:[%s1102_s0 + $0x39] sm:$0xff]  ;;  %v21_v36 = vld [vmem:[%s1102_s0 + $0x30] sm:$0xff]  ;;  %v66_v40 = vld [vmem:[%s1102_s0 + $0x42] sm:$0xff] }
   0xa   :  { %v22_v37 = vld [vmem:[%s1102_s0 + $0x38] sm:$0xff]  ;;  %v96_v41 = vpack.c.bf16 %v43_v35, %v42_v28  ;;  %v314_v43 = vpack.c.bf16 %v44_v38, %v43_v35  ;;  %v45_v45 = vld [vmem:[%s1102_s0 + $0x49] sm:$0xff]  ;;  %v23_v46 = vld [vmem:[%s1102_s0 + $0x40] sm:$0xff] }
   0xb   :  { %v65_v39 = vld [vmem:[%s1102_s0 + $0x3a] sm:$0xff]  ;;  %v83_v42 = vpack.c.bf16 %v22_v37, %v21_v36  ;;  %v24_v47 = vld [vmem:[%s1102_s0 + $0x48] sm:$0xff]  ;;  %v46_v48 = vld [vmem:[%s1102_s0 + $0x51] sm:$0xff]  ;;  %v97_v51 = vpack.c.bf16 %v45_v45, %v44_v38 }
   0xc   :  { %v450_v44 = vpack.c.bf16 %v66_v40, %v65_v39  ;;  %v67_v49 = vld [vmem:[%s1102_s0 + $0x4a] sm:$0xff]  ;;  %v68_v50 = vld [vmem:[%s1102_s0 + $0x52] sm:$0xff]  ;;  %v84_v52 = vpack.c.bf16 %v24_v47, %v23_v46  ;;  %v315_v53 = vpack.c.bf16 %v46_v48, %v45_v45  ;;  %v48_v58 = vld [vmem:[%s1102_s0 + $0x61] sm:$0xff] }
   0xd   :  { %v451_v54 = vpack.c.bf16 %v68_v50, %v67_v49  ;;  %v47_v55 = vld [vmem:[%s1102_s0 + $0x59] sm:$0xff]  ;;  %v25_v56 = vld [vmem:[%s1102_s0 + $0x50] sm:$0xff]  ;;  %v70_v60 = vld [vmem:[%s1102_s0 + $0x62] sm:$0xff] }
   0xe   :  { %v26_v57 = vld [vmem:[%s1102_s0 + $0x58] sm:$0xff]  ;;  %v98_v61 = vpack.c.bf16 %v47_v55, %v46_v48  ;;  %v316_v63 = vpack.c.bf16 %v48_v58, %v47_v55  ;;  %v49_v1 = vld [vmem:[%s1102_s0 + $0x69] sm:$0xff]  ;;  %v27_v2 = vld [vmem:[%s1102_s0 + $0x60] sm:$0xff] }
   0xf   :  { %v69_v59 = vld [vmem:[%s1102_s0 + $0x5a] sm:$0xff]  ;;  %v85_v62 = vpack.c.bf16 %v26_v57, %v25_v56  ;;  %v28_v3 = vld [vmem:[%s1102_s0 + $0x68] sm:$0xff]  ;;  %v50_v4 = vld [vmem:[%s1102_s0 + $0x71] sm:$0xff]  ;;  %v99_v7 = vpack.c.bf16 %v49_v1, %v48_v58 }
  0x10   :  { %v452_v0 = vpack.c.bf16 %v70_v60, %v69_v59  ;;  %v71_v5 = vld [vmem:[%s1102_s0 + $0x6a] sm:$0xff]  ;;  %v72_v6 = vld [vmem:[%s1102_s0 + $0x72] sm:$0xff]  ;;  %v86_v8 = vpack.c.bf16 %v28_v3, %v27_v2  ;;  %v317_v9 = vpack.c.bf16 %v50_v4, %v49_v1  ;;  %v52_v14 = vld [vmem:[%s1102_s0 + $0x81] sm:$0xff] }
  0x11   :  { %v453_v10 = vpack.c.bf16 %v72_v6, %v71_v5  ;;  %v51_v11 = vld [vmem:[%s1102_s0 + $0x79] sm:$0xff]  ;;  %v29_v12 = vld [vmem:[%s1102_s0 + $0x70] sm:$0xff]  ;;  %v74_v16 = vld [vmem:[%s1102_s0 + $0x82] sm:$0xff] }
  0x12   :  { %v30_v13 = vld [vmem:[%s1102_s0 + $0x78] sm:$0xff]  ;;  %v100_v17 = vpack.c.bf16 %v51_v11, %v50_v4  ;;  %v318_v19 = vpack.c.bf16 %v52_v14, %v51_v11  ;;  %v75_v25 = vld [vmem:[%s1102_s0 + $0x8a] sm:$0xff]  ;;  %v957_v37 = vld [vmem:[%s1103_s2] ss:$0 sm:$0xff] }
  0x13   :  { %v73_v15 = vld [vmem:[%s1102_s0 + $0x7a] sm:$0xff]  ;;  %v87_v18 = vpack.c.bf16 %v30_v13, %v29_v12  ;;  %v76_v26 = vld [vmem:[%s1102_s0 + $0x92] sm:$0xff]  ;;  %v78_v47 = vld [vmem:[%s1102_s0 + $0xa2] sm:$0xff] }
  0x14   :  { %v454_v20 = vpack.c.bf16 %v74_v16, %v73_v15  ;;  %v57_v45 = vld [vmem:[%s1102_s0 + $0xa1] sm:$0xff] }
  0x15   :  { %661 = vmatmul.msk.bf16.gmra.mxu0 %vm112_vm0, %v94_v21  ;;  %v53_v21 = vld [vmem:[%s1102_s0 + $0x89] sm:$0xff]  ;;  %v77_v46 = vld [vmem:[%s1102_s0 + $0x9a] sm:$0xff] }
  0x16   :  { %676 = vmatmul.msk.bf16.gmra.mxu1 %vm112_vm0, %v81_v22  ;;  %691 = vmatmul.msk.bf16.gmra.mxu2 %vm112_vm0, %v312_v23  ;;  %v31_v22 = vld [vmem:[%s1102_s0 + $0x80] sm:$0xff]  ;;  %v32_v23 = vld [vmem:[%s1102_s0 + $0x88] sm:$0xff]  ;;  %v101_v27 = vpack.c.bf16 %v53_v21, %v52_v14  ;;  %v456_v58 = vpack.c.bf16 %v78_v47, %v77_v46 }
  0x17   :  { %706 = vmatmul.msk.bf16.gmra.mxu3 %vm112_vm0, %v448_v24  ;;  %v54_v24 = vld [vmem:[%s1102_s0 + $0x91] sm:$0xff]  ;;  %v88_v28 = vpack.c.bf16 %v32_v23, %v31_v22  ;;  %v56_v6 = vld [vmem:[%s1102_s0 + $0xa1] sm:$0x3] }
  0x18   :  { %v103_v14 = vpack.c.bf16 %v56_v6, %v56_v6 }
  0x25   :  { %662 = vmatmul.msk.bf16.gmra.mxu0 %vm112_vm0, %v95_v31  ;;  %v319_v31 = vpack.c.bf16 %v54_v24, %v53_v21 }
  0x26   :  { %677 = vmatmul.msk.bf16.gmra.mxu1 %vm112_vm0, %v82_v32  ;;  %692 = vmatmul.msk.bf16.gmra.mxu2 %vm112_vm0, %v313_v33  ;;  %v455_v32 = vpack.c.bf16 %v76_v26, %v75_v25 }
  0x27   :  { %707 = vmatmul.msk.bf16.gmra.mxu3 %vm112_vm0, %v449_v34 }
  0x35   :  { %663 = vmatmul.msk.bf16.gmra.mxu0 %vm112_vm0, %v96_v41 }
  0x36   :  { %678 = vmatmul.msk.bf16.gmra.mxu1 %vm112_vm0, %v83_v42  ;;  %693 = vmatmul.msk.bf16.gmra.mxu2 %vm112_vm0, %v314_v43  ;;  %v55_v42 = vld [vmem:[%s1102_s0 + $0x99] sm:$0xff]  ;;  %v33_v43 = vld [vmem:[%s1102_s0 + $0x90] sm:$0xff] }
  0x37   :  { %708 = vmatmul.msk.bf16.gmra.mxu3 %vm112_vm0, %v450_v44  ;;  %v34_v44 = vld [vmem:[%s1102_s0 + $0x98] sm:$0xff]  ;;  %v320_v57 = vpack.c.bf16 %v57_v45, %v55_v42 }
  0x45   :  { %664 = vmatmul.msk.bf16.gmra.mxu0 %vm112_vm0, %v97_v51 }
  0x46   :  { %679 = vmatmul.msk.bf16.gmra.mxu1 %vm112_vm0, %v84_v52  ;;  %694 = vmatmul.msk.bf16.gmra.mxu2 %vm112_vm0, %v315_v53  ;;  %v102_v52 = vpack.c.bf16 %v55_v42, %v54_v24  ;;  %v89_v53 = vpack.c.bf16 %v34_v44, %v33_v43 }
  0x47   :  { %709 = vmatmul.msk.bf16.gmra.mxu3 %vm112_vm0, %v451_v54 }
  0x55   :  { %665 = vmatmul.msk.bf16.gmra.mxu0 %vm112_vm0, %v98_v61 }
  0x56   :  { %680 = vmatmul.msk.bf16.gmra.mxu1 %vm112_vm0, %v85_v62  ;;  %695 = vmatmul.msk.bf16.gmra.mxu2 %vm112_vm0, %v316_v63 }
  0x57   :  { %710 = vmatmul.msk.bf16.gmra.mxu3 %vm112_vm0, %v452_v0 }
  0x65   :  { %666 = vmatmul.msk.bf16.gmra.mxu0 %vm112_vm0, %v99_v7  ;;  %v35_v7 = vld [vmem:[%s1102_s0 + $0xa0] sm:$0x3] }
  0x66   :  { %681 = vmatmul.msk.bf16.gmra.mxu1 %vm112_vm0, %v86_v8  ;;  %696 = vmatmul.msk.bf16.gmra.mxu2 %vm112_vm0, %v317_v9  ;;  %v58_v8 = vld [vmem:[%s1102_s0 + $0xa9] sm:$0x3]  ;;  %v90_v15 = vpack.c.bf16 %v35_v7, %v35_v7 }
  0x67   :  { %711 = vmatmul.msk.bf16.gmra.mxu3 %vm112_vm0, %v453_v10  ;;  %v79_v9 = vld [vmem:[%s1102_s0 + $0xaa] sm:$0x3] }
  0x75   :  { %667 = vmatmul.msk.bf16.gmra.mxu0 %vm112_vm0, %v100_v17 }
  0x76   :  { %682 = vmatmul.msk.bf16.gmra.mxu1 %vm112_vm0, %v87_v18  ;;  %697 = vmatmul.msk.bf16.gmra.mxu2 %vm112_vm0, %v318_v19  ;;  %v321_v19 = vpack.c.bf16 %v58_v8, %v58_v8 }
  0x77   :  { %712 = vmatmul.msk.bf16.gmra.mxu3 %vm112_vm0, %v454_v20  ;;  %v457_v20 = vpack.c.bf16 %v79_v9, %v79_v9 }
  0x82   :  { %v155_v29 = vpop.f32.mrf.mxu0 }
  0x83   :  { %v257_v30 = vpop.f32.mrf.mxu1 }
  0x84   :  { %v258_v33 = vadd.f32 %v257_v30, %v155_v29 }
  0x85   :  { %668 = vmatmul.msk.bf16.gmra.mxu0 %vm112_vm0, %v101_v27 }
  0x86   :  { %683 = vmatmul.msk.bf16.gmra.mxu1 %vm112_vm0, %v88_v28  ;;  %698 = vmatmul.msk.bf16.gmra.mxu2 %vm112_vm0, %v319_v31 }
  0x87   :  { %713 = vmatmul.msk.bf16.gmra.mxu3 %vm112_vm0, %v455_v32 }
  0x89   :  { %v372_v34 = vpop.f32.mrf.mxu2 }
  0x8a   :  { %v508_v35 = vpop.f32.mrf.mxu3  ;;  %v426_v36 = vadd.f32 %v372_v34, %v258_v33  ;;  %v157_v38 = vpop.f32.mrf.mxu0 }
  0x8b   :  { %v259_v39 = vpop.f32.mrf.mxu1 }
  0x8c   :  { %v562_v40 = vadd.f32 %v508_v35, %v426_v36  ;;  %v260_v49 = vadd.f32 %v259_v39, %v157_v38 }
  0x8e   :  { %v587_v41 = vadd.f32 %v957_v37, %v562_v40 }
  0x90   :  { %v608_v48 = vmax.f32 %v587_v41, 0.0 }
  0x91   :  { %v374_v50 = vpop.f32.mrf.mxu2 }
  0x92   :  { %v510_v51 = vpop.f32.mrf.mxu3  ;;  %630 = vst.msk [vmem:[%s1104_s3] sm:$0xff] %vm629_vm1, %v608_v48  ;;  %v427_v54 = vadd.f32 %v374_v50, %v260_v49  ;;  %v160_v55 = vpop.f32.mrf.mxu0 }
  0x93   :  { %v262_v56 = vpop.f32.mrf.mxu1 }
  0x94   :  { %v563_v59 = vadd.f32 %v510_v51, %v427_v54  ;;  %v263_v61 = vadd.f32 %v262_v56, %v160_v55 }
  0x95   :  { %669 = vmatmul.msk.bf16.gmra.mxu0 %vm112_vm0, %v102_v52 }
  0x96   :  { %684 = vmatmul.msk.bf16.gmra.mxu1 %vm112_vm0, %v89_v53  ;;  %v588_v60 = vadd.f32 %v957_v37, %v563_v59  ;;  %699 = vmatmul.msk.bf16.gmra.mxu2 %vm112_vm0, %v320_v57 }
  0x97   :  { %714 = vmatmul.msk.bf16.gmra.mxu3 %vm112_vm0, %v456_v58 }
  0x98   :  { %v609_v62 = vmax.f32 %v588_v60, 0.0 }
  0x99   :  { %v377_v63 = vpop.f32.mrf.mxu2 }
  0x9a   :  { %v513_v0 = vpop.f32.mrf.mxu3  ;;  %631 = vst.msk [vmem:[%s1104_s3 + $0x8] sm:$0xff] %vm629_vm1, %v609_v62  ;;  %v428_v1 = vadd.f32 %v377_v63, %v263_v61  ;;  %v162_v2 = vpop.f32.mrf.mxu0 }
  0x9b   :  { %v264_v3 = vpop.f32.mrf.mxu1 }
  0x9c   :  { %v564_v4 = vadd.f32 %v513_v0, %v428_v1  ;;  %v265_v11 = vadd.f32 %v264_v3, %v162_v2 }
  0x9e   :  { %v589_v5 = vadd.f32 %v957_v37, %v564_v4 }
  0xa0   :  { %v610_v10 = vmax.f32 %v589_v5, 0.0 }
  0xa1   :  { %v379_v12 = vpop.f32.mrf.mxu2 }
  0xa2   :  { %v515_v13 = vpop.f32.mrf.mxu3  ;;  %632 = vst.msk [vmem:[%s1104_s3 + $0x10] sm:$0xff] %vm629_vm1, %v610_v10  ;;  %v429_v16 = vadd.f32 %v379_v12, %v265_v11  ;;  %v165_v17 = vpop.f32.mrf.mxu0 }
  0xa3   :  { %v267_v18 = vpop.f32.mrf.mxu1 }
  0xa4   :  { %v565_v21 = vadd.f32 %v515_v13, %v429_v16  ;;  %v268_v23 = vadd.f32 %v267_v18, %v165_v17 }
  0xa5   :  { %670 = vmatmul.msk.bf16.gmra.mxu0 %vm112_vm0, %v103_v14 }
  0xa6   :  { %685 = vmatmul.msk.bf16.gmra.mxu1 %vm112_vm0, %v90_v15  ;;  %v590_v22 = vadd.f32 %v957_v37, %v565_v21  ;;  %700 = vmatmul.msk.bf16.gmra.mxu2 %vm112_vm0, %v321_v19 }
  0xa7   :  { %715 = vmatmul.msk.bf16.gmra.mxu3 %vm112_vm0, %v457_v20 }
  0xa8   :  { %v611_v24 = vmax.f32 %v590_v22, 0.0 }
  0xa9   :  { %v382_v25 = vpop.f32.mrf.mxu2 }
  0xaa   :  { %v518_v26 = vpop.f32.mrf.mxu3  ;;  %633 = vst.msk [vmem:[%s1104_s3 + $0x18] sm:$0xff] %vm629_vm1, %v611_v24  ;;  %v430_v27 = vadd.f32 %v382_v25, %v268_v23  ;;  %v167_v28 = vpop.f32.mrf.mxu0 }
  0xab   :  { %v269_v29 = vpop.f32.mrf.mxu1 }
  0xac   :  { %v566_v30 = vadd.f32 %v518_v26, %v430_v27  ;;  %v270_v33 = vadd.f32 %v269_v29, %v167_v28 }
  0xae   :  { %v591_v31 = vadd.f32 %v957_v37, %v566_v30 }
  0xb0   :  { %v612_v32 = vmax.f32 %v591_v31, 0.0 }
  0xb1   :  { %v384_v34 = vpop.f32.mrf.mxu2 }
  0xb2   :  { %v520_v35 = vpop.f32.mrf.mxu3  ;;  %634 = vst.msk [vmem:[%s1104_s3 + $0x20] sm:$0xff] %vm629_vm1, %v612_v32  ;;  %v431_v36 = vadd.f32 %v384_v34, %v270_v33  ;;  %v170_v38 = vpop.f32.mrf.mxu0 }
  0xb3   :  { %v272_v39 = vpop.f32.mrf.mxu1 }
  0xb4   :  { %v567_v40 = vadd.f32 %v520_v35, %v431_v36  ;;  %v273_v42 = vadd.f32 %v272_v39, %v170_v38 }
  0xb6   :  { %v592_v41 = vadd.f32 %v957_v37, %v567_v40 }
  0xb8   :  { %v613_v43 = vmax.f32 %v592_v41, 0.0 }
  0xb9   :  { %v387_v44 = vpop.f32.mrf.mxu2 }
  0xba   :  { %v523_v45 = vpop.f32.mrf.mxu3  ;;  %635 = vst.msk [vmem:[%s1104_s3 + $0x28] sm:$0xff] %vm629_vm1, %v613_v43  ;;  %v432_v46 = vadd.f32 %v387_v44, %v273_v42  ;;  %v172_v47 = vpop.f32.mrf.mxu0 }
  0xbb   :  { %v274_v48 = vpop.f32.mrf.mxu1 }
  0xbc   :  { %v568_v49 = vadd.f32 %v523_v45, %v432_v46  ;;  %v275_v52 = vadd.f32 %v274_v48, %v172_v47 }
  0xbe   :  { %v593_v50 = vadd.f32 %v957_v37, %v568_v49 }
  0xc0   :  { %v614_v51 = vmax.f32 %v593_v50, 0.0 }
  0xc1   :  { %v389_v53 = vpop.f32.mrf.mxu2 }
  0xc2   :  { %v525_v54 = vpop.f32.mrf.mxu3  ;;  %636 = vst.msk [vmem:[%s1104_s3 + $0x30] sm:$0xff] %vm629_vm1, %v614_v51  ;;  %v433_v55 = vadd.f32 %v389_v53, %v275_v52  ;;  %v175_v56 = vpop.f32.mrf.mxu0 }
  0xc3   :  { %v277_v57 = vpop.f32.mrf.mxu1 }
  0xc4   :  { %v569_v58 = vadd.f32 %v525_v54, %v433_v55  ;;  %v278_v60 = vadd.f32 %v277_v57, %v175_v56 }
  0xc6   :  { %v594_v59 = vadd.f32 %v957_v37, %v569_v58 }
  0xc8   :  { %v615_v61 = vmax.f32 %v594_v59, 0.0 }
  0xc9   :  { %v392_v62 = vpop.f32.mrf.mxu2 }
  0xca   :  { %v528_v63 = vpop.f32.mrf.mxu3  ;;  %637 = vst.msk [vmem:[%s1104_s3 + $0x38] sm:$0xff] %vm629_vm1, %v615_v61  ;;  %v434_v0 = vadd.f32 %v392_v62, %v278_v60  ;;  %v177_v1 = vpop.f32.mrf.mxu0 }
  0xcb   :  { %v279_v2 = vpop.f32.mrf.mxu1 }
  0xcc   :  { %v570_v3 = vadd.f32 %v528_v63, %v434_v0  ;;  %v280_v6 = vadd.f32 %v279_v2, %v177_v1 }
  0xce   :  { %v595_v4 = vadd.f32 %v957_v37, %v570_v3 }
  0xd0   :  { %v616_v5 = vmax.f32 %v595_v4, 0.0 }
  0xd1   :  { %v394_v7 = vpop.f32.mrf.mxu2 }
  0xd2   :  { %v530_v8 = vpop.f32.mrf.mxu3  ;;  %638 = vst.msk [vmem:[%s1104_s3 + $0x40] sm:$0xff] %vm629_vm1, %v616_v5  ;;  %v435_v9 = vadd.f32 %v394_v7, %v280_v6  ;;  %v180_v10 = vpop.f32.mrf.mxu0 }
  0xd3   :  { %v282_v11 = vpop.f32.mrf.mxu1 }
  0xd4   :  { %v571_v12 = vadd.f32 %v530_v8, %v435_v9  ;;  %v283_v14 = vadd.f32 %v282_v11, %v180_v10 }
  0xd6   :  { %v596_v13 = vadd.f32 %v957_v37, %v571_v12 }
  0xd8   :  { %v617_v15 = vmax.f32 %v596_v13, 0.0 }
  0xd9   :  { %v397_v16 = vpop.f32.mrf.mxu2 }
  0xda   :  { %v533_v17 = vpop.f32.mrf.mxu3  ;;  %639 = vst.msk [vmem:[%s1104_s3 + $0x48] sm:$0xff] %vm629_vm1, %v617_v15  ;;  %v436_v18 = vadd.f32 %v397_v16, %v283_v14  ;;  %v182_v19 = vpop.f32.mrf.mxu0 }
  0xdb   :  { %v284_v20 = vpop.f32.mrf.mxu1 }
  0xdc   :  { %v572_v21 = vadd.f32 %v533_v17, %v436_v18  ;;  %v285_v24 = vadd.f32 %v284_v20, %v182_v19 }
  0xde   :  { %v597_v22 = vadd.f32 %v957_v37, %v572_v21 }
  0xe0   :  { %v618_v23 = vmax.f32 %v597_v22, 0.0 }
  0xe1   :  { %v399_v25 = vpop.f32.mrf.mxu2 }
  0xe2   :  { %v535_v26 = vpop.f32.mrf.mxu3  ;;  %640 = vst.msk [vmem:[%s1104_s3 + $0x50] sm:$0xff] %vm629_vm1, %v618_v23  ;;  %v437_v27 = vadd.f32 %v399_v25, %v285_v24  ;;  %v185_v28 = vpop.f32.mrf.mxu0 }
  0xe3   :  { %v287_v29 = vpop.f32.mrf.mxu1 }
  0xe4   :  { %v573_v30 = vadd.f32 %v535_v26, %v437_v27  ;;  %v288_v32 = vadd.f32 %v287_v29, %v185_v28 }
  0xe6   :  { %v598_v31 = vadd.f32 %v957_v37, %v573_v30 }
  0xe8   :  { %v619_v33 = vmax.f32 %v598_v31, 0.0 }
  0xe9   :  { %v402_v34 = vpop.f32.mrf.mxu2 }
  0xea   :  { %v538_v35 = vpop.f32.mrf.mxu3  ;;  %641 = vst.msk [vmem:[%s1104_s3 + $0x58] sm:$0xff] %vm629_vm1, %v619_v33  ;;  %v438_v36 = vadd.f32 %v402_v34, %v288_v32  ;;  %v187_v38 = vpop.f32.mrf.mxu0 }
  0xeb   :  { %v289_v39 = vpop.f32.mrf.mxu1 }
  0xec   :  { %v574_v40 = vadd.f32 %v538_v35, %v438_v36  ;;  %v290_v43 = vadd.f32 %v289_v39, %v187_v38 }
  0xee   :  { %v599_v41 = vadd.f32 %v957_v37, %v574_v40 }
  0xf0   :  { %v620_v42 = vmax.f32 %v599_v41, 0.0 }
  0xf1   :  { %v404_v44 = vpop.f32.mrf.mxu2 }
  0xf2   :  { %v540_v45 = vpop.f32.mrf.mxu3  ;;  %642 = vst.msk [vmem:[%s1104_s3 + $0x60] sm:$0xff] %vm629_vm1, %v620_v42  ;;  %v439_v46 = vadd.f32 %v404_v44, %v290_v43  ;;  %v190_v47 = vpop.f32.mrf.mxu0 }
  0xf3   :  { %v292_v48 = vpop.f32.mrf.mxu1 }
  0xf4   :  { %v575_v49 = vadd.f32 %v540_v45, %v439_v46  ;;  %v293_v51 = vadd.f32 %v292_v48, %v190_v47 }
  0xf6   :  { %v600_v50 = vadd.f32 %v957_v37, %v575_v49 }
  0xf8   :  { %v621_v52 = vmax.f32 %v600_v50, 0.0 }
  0xf9   :  { %v407_v53 = vpop.f32.mrf.mxu2 }
  0xfa   :  { %v543_v54 = vpop.f32.mrf.mxu3  ;;  %643 = vst.msk [vmem:[%s1104_s3 + $0x68] sm:$0xff] %vm629_vm1, %v621_v52  ;;  %v440_v55 = vadd.f32 %v407_v53, %v293_v51  ;;  %v192_v56 = vpop.f32.mrf.mxu0 }
  0xfb   :  { %v294_v57 = vpop.f32.mrf.mxu1 }
  0xfc   :  { %v576_v58 = vadd.f32 %v543_v54, %v440_v55  ;;  %v295_v61 = vadd.f32 %v294_v57, %v192_v56 }
  0xfe   :  { %v601_v59 = vadd.f32 %v957_v37, %v576_v58 }
 0x100   :  { %v622_v60 = vmax.f32 %v601_v59, 0.0 }
 0x101   :  { %v409_v62 = vpop.f32.mrf.mxu2 }
 0x102   :  { %v545_v63 = vpop.f32.mrf.mxu3  ;;  %644 = vst.msk [vmem:[%s1104_s3 + $0x70] sm:$0xff] %vm629_vm1, %v622_v60  ;;  %v441_v0 = vadd.f32 %v409_v62, %v295_v61  ;;  %v195_v1 = vpop.f32.mrf.mxu0 }
 0x103   :  { %v297_v2 = vpop.f32.mrf.mxu1 }
 0x104   :  { %v577_v3 = vadd.f32 %v545_v63, %v441_v0  ;;  %v298_v5 = vadd.f32 %v297_v2, %v195_v1 }
 0x106   :  { %v602_v4 = vadd.f32 %v957_v37, %v577_v3 }
 0x108   :  { %v623_v6 = vmax.f32 %v602_v4, 0.0 }
 0x109   :  { %v412_v7 = vpop.f32.mrf.mxu2 }
 0x10a   :  { %v548_v8 = vpop.f32.mrf.mxu3  ;;  %645 = vst.msk [vmem:[%s1104_s3 + $0x78] sm:$0xff] %vm629_vm1, %v623_v6  ;;  %v442_v9 = vadd.f32 %v412_v7, %v298_v5  ;;  %v197_v10 = vpop.f32.mrf.mxu0 }
 0x10b   :  { %v299_v11 = vpop.f32.mrf.mxu1 }
 0x10c   :  { %v578_v12 = vadd.f32 %v548_v8, %v442_v9  ;;  %v300_v15 = vadd.f32 %v299_v11, %v197_v10 }
 0x10e   :  { %v603_v13 = vadd.f32 %v957_v37, %v578_v12 }
 0x110   :  { %v624_v14 = vmax.f32 %v603_v13, 0.0 }
 0x111   :  { %v414_v16 = vpop.f32.mrf.mxu2 }
 0x112   :  { %v550_v17 = vpop.f32.mrf.mxu3  ;;  %646 = vst.msk [vmem:[%s1104_s3 + $0x80] sm:$0xff] %vm629_vm1, %v624_v14  ;;  %v443_v18 = vadd.f32 %v414_v16, %v300_v15  ;;  %v200_v19 = vpop.f32.mrf.mxu0 }
 0x113   :  { %v302_v20 = vpop.f32.mrf.mxu1 }
 0x114   :  { %v579_v21 = vadd.f32 %v550_v17, %v443_v18  ;;  %v303_v23 = vadd.f32 %v302_v20, %v200_v19 }
 0x116   :  { %v604_v22 = vadd.f32 %v957_v37, %v579_v21 }
 0x118   :  { %v625_v24 = vmax.f32 %v604_v22, 0.0 }
 0x119   :  { %v417_v25 = vpop.f32.mrf.mxu2 }
 0x11a   :  { %v553_v26 = vpop.f32.mrf.mxu3  ;;  %647 = vst.msk [vmem:[%s1104_s3 + $0x88] sm:$0xff] %vm629_vm1, %v625_v24  ;;  %v444_v27 = vadd.f32 %v417_v25, %v303_v23  ;;  %v202_v28 = vpop.f32.mrf.mxu0 }
 0x11b   :  { %v304_v29 = vpop.f32.mrf.mxu1 }
 0x11c   :  { %v580_v30 = vadd.f32 %v553_v26, %v444_v27  ;;  %v305_v33 = vadd.f32 %v304_v29, %v202_v28 }
 0x11e   :  { %v605_v31 = vadd.f32 %v957_v37, %v580_v30 }
 0x120   :  { %v626_v32 = vmax.f32 %v605_v31, 0.0 }
 0x121   :  { %v419_v34 = vpop.f32.mrf.mxu2 }
 0x122   :  { %v555_v35 = vpop.f32.mrf.mxu3  ;;  %648 = vst.msk [vmem:[%s1104_s3 + $0x90] sm:$0xff] %vm629_vm1, %v626_v32  ;;  %v445_v36 = vadd.f32 %v419_v34, %v305_v33  ;;  %v205_v38 = vpop.f32.mrf.mxu0 }
 0x123   :  { %v307_v39 = vpop.f32.mrf.mxu1 }
 0x124   :  { %v581_v40 = vadd.f32 %v555_v35, %v445_v36  ;;  %v308_v42 = vadd.f32 %v307_v39, %v205_v38 }
 0x126   :  { %v606_v41 = vadd.f32 %v957_v37, %v581_v40 }
 0x128   :  { %v627_v43 = vmax.f32 %v606_v41, 0.0 }
 0x129   :  { %v422_v44 = vpop.f32.mrf.mxu2 }
 0x12a   :  { %v558_v45 = vpop.f32.mrf.mxu3  ;;  %649 = vst.msk [vmem:[%s1104_s3 + $0x98] sm:$0xff] %vm629_vm1, %v627_v43  ;;  %v446_v46 = vadd.f32 %v422_v44, %v308_v42  ;;  %v207_v47 = vpop.f32.mrf.mxu0 }
 0x12b   :  { %v309_v48 = vpop.f32.mrf.mxu1 }
 0x12c   :  { %v582_v49 = vadd.f32 %v558_v45, %v446_v46 }
 0x12e   :  { %v607_v50 = vadd.f32 %v957_v37, %v582_v49 }
 0x130   :  { %v628_v51 = vmax.f32 %v607_v50, 0.0 }
 0x131   :  { %v424_v52 = vpop.f32.mrf.mxu2 }
 0x132   :  { %v560_v53 = vpop.f32.mrf.mxu3  ;;  %651 = vst.msk [vmem:[%s1104_s3 + $0xa0] sm:$0x3] %vm650_vm2, %v628_v51 }

// kernel: vqvae_forward.5
= control target key start
LH: loop header
LB: loop body
LE: loop exit
PB: predicated region body
PF: predicated region fallthrough
CT: control target
= control target key end

     0   :  { %vm76_vm0 = vcmask 261120   ;;  %s3583_s2 = inlined_call_operand.vmem [shape: bf16[288,32], index: 2, kind: input, shape index: {}]   ;;  %s3584_s0 = inlined_call_operand.vmem [shape: f32[88,32], index: 0, kind: input, shape index: {}]   ;;  %s3585_s3 = inlined_call_operand.vmem [shape: f32[1,32], index: 3, kind: input, shape index: {}]   ;;  %s3586_s4 = inlined_call_operand.vmem [shape: bf16[32,32], index: 4, kind: input, shape index: {}]   ;;  %s3587_s5 = inlined_call_operand.vmem [shape: f32[1,32], index: 5, kind: input, shape index: {}]   ;;  %s3588_s1 = inlined_call_operand.vmem [shape: f32[72,1], index: 1, kind: input, shape index: {}]   ;;  %s3589_s6 = inlined_call_operand.vmem [shape: bf16[288,32], index: 6, kind: input, shape index: {}]   ;;  %s3590_s7 = inlined_call_operand.vmem [shape: f32[1,32], index: 7, kind: input, shape index: {}]   ;;  %s3591_s8 = inlined_call_operand.vmem [shape: bf16[32,32], index: 8, kind: input, shape index: {}]   ;;  %s3592_s9 = inlined_call_operand.vmem [shape: f32[1,32], index: 9, kind: input, shape index: {}]   ;;  %s3593_s10 = inlined_call_operand.vmem [shape: f32[32,128], index: 10, kind: input, shape index: {}]   ;;  %s3594_s12 = inlined_call_operand.vmem [shape: f32[1,128], index: 12, kind: input, shape index: {}]   ;;  %s3595_s11 = inlined_call_operand.vmem [shape: f32[128,32], index: 11, kind: input, shape index: {}]   ;;  %s3596_s13 = inlined_call_operand.vmem [shape: f32[72,32], index: 13, kind: output, shape index: {}]  }
   0x1   :  { %v2544_v0 = vld [vmem:[%s3583_s2 + $0x18] sm:$0xff]  ;;  %v2542_v1 = vld [vmem:[%s3583_s2 + $0x8] sm:$0xff]  ;;  %v2543_v2 = vld [vmem:[%s3583_s2 + $0x10] sm:$0xff] }
   0x2   :  { %v54_v3 = vld [vmem:[%s3584_s0] sm:$0xff]  ;;  %v2682_v4 = vld [vmem:[%s3584_s0 + $0x8] sm:$0xff]  ;;  %213 = vmatpush.bf16.msra.mxu0 %v2544_v0  ;;  %2581 = vmatpush.bf16.msra.mxu2 %v2544_v0  ;;  %v2687_v5 = vld [vmem:[%s3584_s0 + $0x10] sm:$0xff] }
   0x3   :  { %v65_v6 = vmax.f32 %v54_v3, 0.0  ;;  %v66_v7 = vmax.f32 %v2682_v4, 0.0  ;;  %v60_v8 = vld [vmem:[%s3584_s0 + $0x30] sm:$0xff]  ;;  %v61_v9 = vld [vmem:[%s3584_s0 + $0x38] sm:$0xff]  ;;  %273 = vmatpush.bf16.msra.mxu1 %v2542_v1  ;;  %2583 = vmatpush.bf16.msra.mxu3 %v2542_v1  ;;  %v2541_v10 = vld [vmem:[%s3583_s2] sm:$0xff]  ;;  %v67_v11 = vmax.f32 %v2687_v5, 0.0 }
   0x4   :  { %v62_v12 = vld [vmem:[%s3584_s0 + $0x40] sm:$0xff]  ;;  %v71_v13 = vmax.f32 %v60_v8, 0.0  ;;  %v2550_v14 = vld [vmem:[%s3583_s2 + $0x48] sm:$0xff]  ;;  %v72_v15 = vmax.f32 %v61_v9, 0.0  ;;  %v2713_v17 = vld [vmem:[%s3584_s0 + $0x18] sm:$0xff] }
   0x5   :  { %77 = vst.msk [vmem:[#allocation2] sm:$0xff] %vm76_vm0, %v65_v6  ;;  %v2546_v16 = vld [vmem:[%s3583_s2 + $0x28] sm:$0xff]  ;;  %v2718_v18 = vld [vmem:[%s3584_s0 + $0x20] sm:$0xff]  ;;  %v73_v19 = vmax.f32 %v62_v12, 0.0  ;;  %v2548_v20 = vld [vmem:[%s3583_s2 + $0x38] sm:$0xff]  ;;  %v68_v22 = vmax.f32 %v2713_v17, 0.0 }
   0x6   :  { %78 = vst.msk [vmem:[#allocation2 + $0x8] sm:$0xff] %vm76_vm0, %v66_v7  ;;  %v63_v21 = vld [vmem:[%s3584_s0 + $0x48] sm:$0xff]  ;;  %214 = vmatpush.bf16.msra.mxu0 %v2543_v2  ;;  %2582 = vmatpush.bf16.msra.mxu2 %v2543_v2  ;;  %v69_v24 = vmax.f32 %v2718_v18, 0.0  ;;  %v2545_v26 = vld [vmem:[%s3583_s2 + $0x20] sm:$0xff]  ;;  %v2547_v28 = vld [vmem:[%s3583_s2 + $0x30] sm:$0xff] }
   0x7   :  { %79 = vst.msk [vmem:[#allocation2 + $0x10] sm:$0xff] %vm76_vm0, %v67_v11  ;;  %v2732_v23 = vld [vmem:[%s3584_s0 + $0x28] sm:$0xff]  ;;  %274 = vmatpush.bf16.msra.mxu1 %v2541_v10  ;;  %2584 = vmatpush.bf16.msra.mxu3 %v2541_v10  ;;  %v74_v25 = vmax.f32 %v63_v21, 0.0  ;;  %v2549_v27 = vld [vmem:[%s3583_s2 + $0x40] sm:$0xff]  ;;  %v2556_v43 = vld [vmem:[%s3583_s2 + $0x78] sm:$0xff] }
   0x8   :  { %83 = vst.msk [vmem:[#allocation2 + $0x30] sm:$0xff] %vm76_vm0, %v71_v13  ;;  %v70_v29 = vmax.f32 %v2732_v23, 0.0  ;;  %v2554_v42 = vld [vmem:[%s3583_s2 + $0x68] sm:$0xff]  ;;  %v2552_v44 = vld [vmem:[%s3583_s2 + $0x58] sm:$0xff]  ;;  %v2551_v46 = vld [vmem:[%s3583_s2 + $0x50] sm:$0xff] }
   0x9   :  { %84 = vst.msk [vmem:[#allocation2 + $0x38] sm:$0xff] %vm76_vm0, %v72_v15  ;;  %v2558_v56 = vld [vmem:[%s3583_s2 + $0x88] sm:$0xff]  ;;  %v2553_v7 = vld [vmem:[%s3583_s2 + $0x60] sm:$0xff] }
   0xa   :  { %498 = vmatpush.bf16.msrb.mxu0 %v2550_v14  ;;  %342 = vmatpush.bf16.msrb.mxu2 %v2546_v16  ;;  %85 = vst.msk [vmem:[#allocation2 + $0x40] sm:$0xff] %vm76_vm0, %v73_v19  ;;  %v2557_v21 = vld [vmem:[%s3583_s2 + $0x80] sm:$0xff] }
   0xb   :  { %420 = vmatpush.bf16.msrb.mxu3 %v2548_v20  ;;  %80 = vst.msk [vmem:[#allocation2 + $0x18] sm:$0xff] %vm76_vm0, %v68_v22  ;;  %576 = vmatpush.bf16.msrb.mxu1 %v2552_v44  ;;  %v2555_v20 = vld [vmem:[%s3583_s2 + $0x70] sm:$0xff] }
   0xc   :  { %81 = vst.msk [vmem:[#allocation2 + $0x20] sm:$0xff] %vm76_vm0, %v69_v24 }
   0xd   :  { %v106_v30 = vld [vmem:[#allocation2 + $0x2] sm:$0xff]  ;;  %86 = vst.msk [vmem:[#allocation2 + $0x48] sm:$0xff] %vm76_vm0, %v74_v25 }
   0xe   :  { %v97_v31 = vld [vmem:[#allocation2 + $0x1] sm:$0xff]  ;;  %343 = vmatpush.bf16.msrb.mxu2 %v2545_v26  ;;  %499 = vmatpush.bf16.msrb.mxu0 %v2549_v27  ;;  %v107_v32 = vld [vmem:[#allocation2 + $0xa] sm:$0xff]  ;;  %82 = vst.msk [vmem:[#allocation2 + $0x28] sm:$0xff] %vm76_vm0, %v70_v29 }
   0xf   :  { %v2751_v33 = vld [vmem:[#allocation2 + $0x9] sm:$0xff]  ;;  %421 = vmatpush.bf16.msrb.mxu3 %v2547_v28  ;;  %v171_v34 = vpack.c.bf16 %v107_v32, %v106_v30  ;;  %577 = vmatpush.bf16.msrb.mxu1 %v2551_v46 }
  0x10   :  { %v162_v35 = vpack.c.bf16 %v2751_v33, %v97_v31  ;;  %v112_v36 = vld [vmem:[#allocation2 + $0x32] sm:$0xff]  ;;  %v115_v61 = vld [vmem:[#allocation2 + $0x3] sm:$0xff] }
  0x11   :  { %v2755_v37 = vld [vmem:[#allocation2 + $0x31] sm:$0xff]  ;;  %2262 = vmatmul.msk.bf16.vlgmr.msra.gmra.mxu0 %vm76_vm0, %v171_v34  ;;  %v113_v38 = vld [vmem:[#allocation2 + $0x3a] sm:$0xff]  ;;  %v124_v1 = vld [vmem:[#allocation2 + $0x7] sm:$0xff] }
  0x12   :  { %2275 = vmatmul.msk.bf16.vlgmr.msra.gmra.mxu1 %vm76_vm0, %v162_v35  ;;  %v2759_v39 = vld [vmem:[#allocation2 + $0x39] sm:$0xff]  ;;  %v174_v40 = vpack.c.bf16 %v113_v38, %v112_v36  ;;  %v99_v48 = vld [vmem:[#allocation2 + $0x11] sm:$0xff]  ;;  %810 = vmatpush.bf16.msra.mxu0 %v2558_v56  ;;  %v133_v8 = vld [vmem:[#allocation2 + $0x8] sm:$0xff] }
  0x13   :  { %v165_v41 = vpack.c.bf16 %v2759_v39, %v2755_v37  ;;  %v108_v45 = vld [vmem:[#allocation2 + $0x12] sm:$0xff]  ;;  %v109_v47 = vld [vmem:[#allocation2 + $0x1a] sm:$0xff]  ;;  %v534_v15 = vpack.c.bf16 %v99_v48, %v2751_v33 }
  0x14   :  { %2265 = vmatmul.msk.bf16.vlgmr.msra.gmra.mxu2 %vm76_vm0, %v174_v40  ;;  %v100_v49 = vld [vmem:[#allocation2 + $0x19] sm:$0xff]  ;;  %v172_v50 = vpack.c.bf16 %v109_v47, %v108_v45  ;;  %v114_v51 = vld [vmem:[#allocation2 + $0x42] sm:$0xff]  ;;  %v116_v0 = vld [vmem:[#allocation2 + $0xb] sm:$0xff] }
  0x15   :  { %2278 = vmatmul.msk.bf16.vlgmr.msra.gmra.mxu3 %vm76_vm0, %v165_v41  ;;  %654 = vmatpush.bf16.msra.mxu2 %v2554_v42  ;;  %v163_v52 = vpack.c.bf16 %v100_v49, %v99_v48  ;;  %v2777_v53 = vld [vmem:[#allocation2 + $0x41] sm:$0xff]  ;;  %v175_v54 = vpack.c.bf16 %v114_v51, %v114_v51  ;;  %v111_v58 = vld [vmem:[#allocation2 + $0x2a] sm:$0xff]  ;;  %v300_v3 = vpack.c.bf16 %v116_v0, %v115_v61  ;;  %v117_v10 = vld [vmem:[#allocation2 + $0x13] sm:$0xff] }
  0x16   :  { %732 = vmatpush.bf16.msra.mxu3 %v2556_v43  ;;  %v166_v55 = vpack.c.bf16 %v2777_v53, %v2777_v53  ;;  %v110_v57 = vld [vmem:[#allocation2 + $0x22] sm:$0xff]  ;;  %v2788_v2 = vld [vmem:[#allocation2 + $0xf] sm:$0xff]  ;;  %v2798_v12 = vld [vmem:[#allocation2 + $0x17] sm:$0xff]  ;;  %811 = vmatpush.bf16.msra.mxu0 %v2557_v21 }
  0x17   :  { %v101_v59 = vld [vmem:[#allocation2 + $0x21] sm:$0xff]  ;;  %v102_v60 = vld [vmem:[#allocation2 + $0x29] sm:$0xff]  ;;  %v173_v62 = vpack.c.bf16 %v111_v58, %v110_v57  ;;  %v378_v6 = vpack.c.bf16 %v2788_v2, %v124_v1  ;;  %v135_v22 = vld [vmem:[#allocation2 + $0x18] sm:$0xff] }
  0x18   :  { %v164_v63 = vpack.c.bf16 %v102_v60, %v101_v59  ;;  %v134_v9 = vld [vmem:[#allocation2 + $0x10] sm:$0xff]  ;;  %v118_v11 = vld [vmem:[#allocation2 + $0x1b] sm:$0xff]  ;;  %v119_v25 = vld [vmem:[#allocation2 + $0x23] sm:$0xff]  ;;  %v535_v30 = vpack.c.bf16 %v101_v59, %v100_v49  ;;  %v536_v44 = vpack.c.bf16 %v2755_v37, %v102_v60  ;;  %v537_v37 = vpack.c.bf16 %v2777_v53, %v2759_v39 }
  0x19   :  { %655 = vmatpush.bf16.msra.mxu2 %v2553_v7  ;;  %v2800_v13 = vld [vmem:[#allocation2 + $0x1f] sm:$0xff]  ;;  %v456_v14 = vpack.c.bf16 %v134_v9, %v133_v8  ;;  %v301_v16 = vpack.c.bf16 %v118_v11, %v117_v10  ;;  %v120_v26 = vld [vmem:[#allocation2 + $0x2b] sm:$0xff]  ;;  %v121_v38 = vld [vmem:[#allocation2 + $0x33] sm:$0xff] }
  0x1a   :  { %v379_v19 = vpack.c.bf16 %v2800_v13, %v2798_v12  ;;  %733 = vmatpush.bf16.msra.mxu3 %v2555_v20  ;;  %v136_v24 = vld [vmem:[#allocation2 + $0x20] sm:$0xff]  ;;  %v2817_v28 = vld [vmem:[#allocation2 + $0x2f] sm:$0xff]  ;;  %v302_v31 = vpack.c.bf16 %v120_v26, %v119_v25  ;;  %v2829_v41 = vld [vmem:[#allocation2 + $0x37] sm:$0xff] }
  0x1b   :  { %v2815_v27 = vld [vmem:[#allocation2 + $0x27] sm:$0xff]  ;;  %v457_v29 = vpack.c.bf16 %v136_v24, %v135_v22  ;;  %v64_v33 = vld [vmem:[%s3584_s0 + $0x50] sm:$0xff]  ;;  %v122_v40 = vld [vmem:[#allocation2 + $0x3b] sm:$0xff] }
  0x1c   :  { %v380_v32 = vpack.c.bf16 %v2817_v28, %v2815_v27  ;;  %v137_v34 = vld [vmem:[#allocation2 + $0x28] sm:$0xff]  ;;  %v138_v35 = vld [vmem:[#allocation2 + $0x30] sm:$0xff]  ;;  %v75_v36 = vmax.f32 %v64_v33, 0.0  ;;  %v2831_v42 = vld [vmem:[#allocation2 + $0x3f] sm:$0xff]  ;;  %v303_v45 = vpack.c.bf16 %v122_v40, %v121_v38  ;;  %v769_v24 = vpack.c.bf16 %v2815_v27, %v2800_v13 }
  0x1d   :  { %v458_v43 = vpack.c.bf16 %v138_v35, %v137_v34  ;;  %v381_v46 = vpack.c.bf16 %v2831_v42, %v2829_v41  ;;  %v139_v47 = vld [vmem:[#allocation2 + $0x38] sm:$0xff]  ;;  %v140_v48 = vld [vmem:[#allocation2 + $0x40] sm:$0xff]  ;;  %v143_v57 = vld [vmem:[#allocation2 + $0xd] sm:$0xff] }
  0x1e   :  { %87 = vst.msk [vmem:[#allocation2 + $0x50] sm:$0xff] %vm76_vm0, %v75_v36  ;;  %v123_v49 = vld [vmem:[#allocation2 + $0x43] sm:$0xff]  ;;  %v459_v51 = vpack.c.bf16 %v140_v48, %v139_v47  ;;  %v144_v59 = vld [vmem:[#allocation2 + $0x15] sm:$0xff] }
  0x1f   :  { %v152_v60 = vld [vmem:[#allocation2 + $0xe] sm:$0xff]  ;;  %v153_v61 = vld [vmem:[#allocation2 + $0x16] sm:$0xff]  ;;  %v612_v53 = vpack.c.bf16 %v144_v59, %v143_v57  ;;  %v146_v0 = vld [vmem:[#allocation2 + $0x25] sm:$0xff] }
  0x20   :  { %v154_v1 = vld [vmem:[#allocation2 + $0x1e] sm:$0xff]  ;;  %v156_v21 = vld [vmem:[#allocation2 + $0x2e] sm:$0xff]  ;;  %v157_v22 = vld [vmem:[#allocation2 + $0x36] sm:$0xff] }
  0x21   :  { %2263 = vmatmul.msk.bf16.gmra.mxu0 %vm76_vm0, %v172_v50  ;;  %v2840_v50 = vld [vmem:[#allocation2 + $0x47] sm:$0xff]  ;;  %v692_v33 = vpack.c.bf16 %v157_v22, %v156_v21  ;;  %v149_v38 = vld [vmem:[#allocation2 + $0x3d] sm:$0xff] }
  0x22   :  { %2276 = vmatmul.msk.bf16.gmra.mxu1 %vm76_vm0, %v163_v52  ;;  %v304_v52 = vpack.c.bf16 %v123_v49, %v123_v49  ;;  %v150_v40 = vld [vmem:[#allocation2 + $0x45] sm:$0xff] }
  0x24   :  { %2266 = vmatmul.msk.bf16.gmra.mxu2 %vm76_vm0, %v175_v54  ;;  %v382_v54 = vpack.c.bf16 %v2840_v50, %v2840_v50 }
  0x25   :  { %2279 = vmatmul.msk.bf16.gmra.mxu3 %vm76_vm0, %v166_v55  ;;  %v141_v55 = vld [vmem:[#allocation2 + $0x48] sm:$0xff] }
  0x26   :  { %v142_v56 = vld [vmem:[#allocation2 + $0x49] sm:$0xff]  ;;  %v460_v58 = vpack.c.bf16 %v141_v55, %v141_v55 }
  0x27   :  { %v538_v39 = vpack.c.bf16 %v142_v56, %v142_v56  ;;  %v151_v59 = vld [vmem:[#allocation2 + $0x4d] sm:$0xff] }
  0x31   :  { %2264 = vmatmul.msk.bf16.gmra.mxu0 %vm76_vm0, %v173_v62  ;;  %v690_v62 = vpack.c.bf16 %v153_v61, %v152_v60  ;;  %v771_v60 = vpack.c.bf16 %v2840_v50, %v2831_v42  ;;  %v160_v61 = vld [vmem:[#allocation2 + $0x4e] sm:$0xff] }
  0x32   :  { %2277 = vmatmul.msk.bf16.gmra.mxu1 %vm76_vm0, %v164_v63  ;;  %v145_v63 = vld [vmem:[#allocation2 + $0x1d] sm:$0xff] }
  0x33   :  { %v613_v10 = vpack.c.bf16 %v146_v0, %v145_v63 }
  0x34   :  { %2288 = vmatmul.msk.bf16.vlgmr.msrb.gmra.mxu2 %vm76_vm0, %v300_v3  ;;  %v155_v3 = vld [vmem:[#allocation2 + $0x26] sm:$0xff] }
  0x35   :  { %2301 = vmatmul.msk.bf16.vlgmr.msrb.gmra.mxu3 %vm76_vm0, %v378_v6  ;;  %v768_v6 = vpack.c.bf16 %v2798_v12, %v2788_v2  ;;  %v691_v11 = vpack.c.bf16 %v155_v3, %v154_v1  ;;  %v147_v2 = vld [vmem:[#allocation2 + $0x2d] sm:$0xff]  ;;  %v148_v12 = vld [vmem:[#allocation2 + $0x35] sm:$0xff]  ;;  %v616_v1 = vpack.c.bf16 %v151_v59, %v151_v59  ;;  %v694_v3 = vpack.c.bf16 %v160_v61, %v160_v61 }
  0x41   :  { %2314 = vmatmul.msk.bf16.vlgmr.msrb.gmra.mxu0 %vm76_vm0, %v456_v14 }
  0x42   :  { %2327 = vmatmul.msk.bf16.vlgmr.msrb.gmra.mxu1 %vm76_vm0, %v534_v15 }
  0x44   :  { %2289 = vmatmul.msk.bf16.gmra.mxu2 %vm76_vm0, %v301_v16 }
  0x45   :  { %2302 = vmatmul.msk.bf16.gmra.mxu3 %vm76_vm0, %v379_v19 }
  0x51   :  { %2315 = vmatmul.msk.bf16.gmra.mxu0 %vm76_vm0, %v457_v29 }
  0x52   :  { %2328 = vmatmul.msk.bf16.gmra.mxu1 %vm76_vm0, %v535_v30 }
  0x54   :  { %2290 = vmatmul.msk.bf16.gmra.mxu2 %vm76_vm0, %v302_v31 }
  0x55   :  { %2303 = vmatmul.msk.bf16.gmra.mxu3 %vm76_vm0, %v380_v32  ;;  %v614_v32 = vpack.c.bf16 %v148_v12, %v147_v2 }
  0x61   :  { %2316 = vmatmul.msk.bf16.gmra.mxu0 %vm76_vm0, %v458_v43  ;;  %v158_v43 = vld [vmem:[#allocation2 + $0x3e] sm:$0xff] }
  0x62   :  { %2329 = vmatmul.msk.bf16.gmra.mxu1 %vm76_vm0, %v536_v44  ;;  %v159_v44 = vld [vmem:[#allocation2 + $0x46] sm:$0xff] }
  0x64   :  { %2291 = vmatmul.msk.bf16.gmra.mxu2 %vm76_vm0, %v303_v45  ;;  %v770_v45 = vpack.c.bf16 %v2829_v41, %v2817_v28 }
  0x65   :  { %2304 = vmatmul.msk.bf16.gmra.mxu3 %vm76_vm0, %v381_v46 }
  0x71   :  { %2317 = vmatmul.msk.bf16.gmra.mxu0 %vm76_vm0, %v459_v51 }
  0x72   :  { %2330 = vmatmul.msk.bf16.gmra.mxu1 %vm76_vm0, %v537_v37  ;;  %v615_v37 = vpack.c.bf16 %v150_v40, %v149_v38 }
  0x74   :  { %2292 = vmatmul.msk.bf16.gmra.mxu2 %vm76_vm0, %v304_v52  ;;  %v693_v52 = vpack.c.bf16 %v159_v44, %v158_v43 }
  0x75   :  { %2305 = vmatmul.msk.bf16.gmra.mxu3 %vm76_vm0, %v382_v54  ;;  %v2560_v54 = vld [vmem:[%s3586_s4 + $0x8] sm:$0xff] }
  0x76   :  { %910 = vmatpush.bf16.msra.mxu1 %v2560_v54 }
  0x81   :  { %2318 = vmatmul.msk.bf16.gmra.mxu0 %vm76_vm0, %v460_v58 }
  0x82   :  { %2331 = vmatmul.msk.bf16.gmra.mxu1 %vm76_vm0, %v538_v39 }
  0x84   :  { %2340 = vmatmul.msk.bf16.vlgmr.msra.gmra.mxu2 %vm76_vm0, %v612_v53 }
  0x85   :  { %2353 = vmatmul.msk.bf16.vlgmr.msra.gmra.mxu3 %vm76_vm0, %v690_v62 }
  0x8e   :  { %v216_v7 = vpop.f32.mrf.mxu0 }
  0x8f   :  { %v276_v8 = vpop.f32.mrf.mxu1 }
  0x90   :  { %v277_v9 = vadd.f32 %v276_v8, %v216_v7 }
  0x91   :  { %2366 = vmatmul.msk.bf16.vlgmr.msra.gmra.mxu0 %vm76_vm0, %v768_v6 }
  0x94   :  { %2341 = vmatmul.msk.bf16.gmra.mxu2 %vm76_vm0, %v613_v10 }
  0x95   :  { %2354 = vmatmul.msk.bf16.gmra.mxu3 %vm76_vm0, %v691_v11  ;;  %v161_v11 = vld [vmem:[#allocation2 + $0x4f] sm:$0xff] }
  0x96   :  { %v2859_v14 = vpop.f32.mrf.mxu0 }
  0x97   :  { %v2861_v15 = vpop.f32.mrf.mxu1  ;;  %v231_v16 = vpop.f32.mrf.mxu2 }
  0x98   :  { %v291_v19 = vpop.f32.mrf.mxu3 }
  0x99   :  { %v2863_v20 = vadd.f32 %v291_v19, %v231_v16  ;;  %v772_v16 = vpack.c.bf16 %v161_v11, %v161_v11  ;;  %v2595_v11 = vmov 0  }
  0x9a   :  { %2587 = vset.pattern.permute.xlu0 %v2595_v11  ;;  %2588 = vset.pattern.permute.xlu1 %v2595_v11 }
  0x9b   :  { %2589 = vset.pattern.permute.xlu2 %v2595_v11 }
  0x9e   :  { %v221_v25 = vpop.f32.mrf.mxu0 }
  0x9f   :  { %v281_v26 = vpop.f32.mrf.mxu1  ;;  %v2867_v29 = vpop.f32.mrf.mxu2 }
  0xa0   :  { %v2869_v30 = vpop.f32.mrf.mxu3  ;;  %v282_v31 = vadd.f32 %v281_v26, %v221_v25 }
  0xa1   :  { %2367 = vmatmul.msk.bf16.gmra.mxu0 %vm76_vm0, %v769_v24 }
  0xa4   :  { %2342 = vmatmul.msk.bf16.gmra.mxu2 %vm76_vm0, %v614_v32 }
  0xa5   :  { %2355 = vmatmul.msk.bf16.gmra.mxu3 %vm76_vm0, %v692_v33 }
  0xa6   :  { %v2874_v34 = vpop.f32.mrf.mxu0 }
  0xa7   :  { %v2876_v35 = vpop.f32.mrf.mxu1  ;;  %v236_v13 = vpop.f32.mrf.mxu2 }
  0xa8   :  { %v296_v27 = vpop.f32.mrf.mxu3 }
  0xa9   :  { %v2878_v36 = vadd.f32 %v296_v27, %v236_v13  ;;  %v2559_v27 = vld [vmem:[%s3586_s4] sm:$0xff] }
  0xaa   :  { %911 = vmatpush.bf16.msra.mxu1 %v2559_v27 }
  0xae   :  { %v226_v46 = vpop.f32.mrf.mxu0 }
  0xaf   :  { %v286_v47 = vpop.f32.mrf.mxu1  ;;  %v238_v48 = vpop.f32.mrf.mxu2 }
  0xb0   :  { %v298_v49 = vpop.f32.mrf.mxu3  ;;  %v287_v51 = vadd.f32 %v286_v47, %v226_v46 }
  0xb1   :  { %2368 = vmatmul.msk.bf16.gmra.mxu0 %vm76_vm0, %v770_v45 }
  0xb4   :  { %2343 = vmatmul.msk.bf16.gmra.mxu2 %vm76_vm0, %v615_v37 }
  0xb5   :  { %2356 = vmatmul.msk.bf16.gmra.mxu3 %vm76_vm0, %v693_v52 }
  0xb6   :  { %v2888_v55 = vpop.f32.mrf.mxu0 }
  0xb7   :  { %v2890_v28 = vpop.f32.mrf.mxu1  ;;  %v345_v41 = vpop.f32.mrf.mxu2 }
  0xb8   :  { %v423_v56 = vpop.f32.mrf.mxu3  ;;  %v369_v57 = vadd.f32 %v345_v41, %v277_v9 }
  0xba   :  { %v447_v58 = vadd.f32 %v423_v56, %v369_v57 }
  0xbe   :  { %v501_v39 = vpop.f32.mrf.mxu0 }
  0xbf   :  { %v579_v53 = vpop.f32.mrf.mxu1  ;;  %v2894_v62 = vpop.f32.mrf.mxu2  ;;  %v525_v0 = vadd.f32 %v501_v39, %v447_v58 }
  0xc0   :  { %v2896_v63 = vpop.f32.mrf.mxu3 }
  0xc1   :  { %v2898_v6 = vadd.f32 %v579_v53, %v525_v0  ;;  %2369 = vmatmul.msk.bf16.gmra.mxu0 %vm76_vm0, %v771_v60 }
  0xc4   :  { %2344 = vmatmul.msk.bf16.gmra.mxu2 %vm76_vm0, %v616_v1 }
  0xc5   :  { %2357 = vmatmul.msk.bf16.gmra.mxu3 %vm76_vm0, %v694_v3 }
  0xc6   :  { %v2903_v7 = vpop.f32.mrf.mxu0 }
  0xc7   :  { %v2905_v42 = vpop.f32.mrf.mxu1  ;;  %v350_v50 = vpop.f32.mrf.mxu2 }
  0xc8   :  { %v428_v8 = vpop.f32.mrf.mxu3  ;;  %v371_v9 = vadd.f32 %v350_v50, %v282_v31 }
  0xca   :  { %v449_v10 = vadd.f32 %v428_v8, %v371_v9 }
  0xce   :  { %v506_v19 = vpop.f32.mrf.mxu0 }
  0xcf   :  { %v584_v2 = vpop.f32.mrf.mxu1  ;;  %v2907_v12 = vpop.f32.mrf.mxu2  ;;  %v527_v22 = vadd.f32 %v506_v19, %v449_v10  ;;  %v279_v19 = vadd.f32 %v2861_v15, %v2859_v14 }
  0xd0   :  { %v2909_v21 = vpop.f32.mrf.mxu3 }
  0xd1   :  { %v2911_v24 = vadd.f32 %v584_v2, %v527_v22  ;;  %2370 = vmatmul.msk.bf16.gmra.mxu0 %vm76_vm0, %v772_v16  ;;  %v45_v16 = vld [vmem:[%s3588_s1] sm:$0xff] }
  0xd2   :  { %970 = vperm.xlu0 %2587, %v45_v16  }
  0xd6   :  { %v2914_v25 = vpop.f32.mrf.mxu0 }
  0xd7   :  { %v2916_v26 = vpop.f32.mrf.mxu1  ;;  %v355_v32 = vpop.f32.mrf.mxu2 }
  0xd8   :  { %v433_v31 = vpop.f32.mrf.mxu3  ;;  %v373_v33 = vadd.f32 %v355_v32, %v287_v51 }
  0xda   :  { %v451_v13 = vadd.f32 %v433_v31, %v373_v33 }
  0xde   :  { %v511_v38 = vpop.f32.mrf.mxu0 }
  0xdf   :  { %v589_v40 = vpop.f32.mrf.mxu1  ;;  %v2921_v43 = vpop.f32.mrf.mxu2  ;;  %v529_v45 = vadd.f32 %v511_v38, %v451_v13  ;;  %v46_v13 = vld [vmem:[%s3588_s1 + $0x8] sm:$0xff] }
  0xe0   :  { %v2923_v44 = vpop.f32.mrf.mxu3  ;;  %975 = vperm.xlu0 %2587, %v46_v13  }
  0xe1   :  { %v2925_v46 = vadd.f32 %v589_v40, %v529_v45 }
  0xe6   :  { %v2927_v47 = vpop.f32.mrf.mxu0 }
  0xe7   :  { %v2929_v48 = vpop.f32.mrf.mxu1  ;;  %v360_v49 = vpop.f32.mrf.mxu2 }
  0xe8   :  { %v438_v51 = vpop.f32.mrf.mxu3  ;;  %v375_v37 = vadd.f32 %v360_v49, %v2863_v20 }
  0xea   :  { %v453_v52 = vadd.f32 %v438_v51, %v375_v37  ;;  %v51_v51 = vld [vmem:[%s3588_s1 + $0x30] sm:$0xff] }
  0xeb   :  { %1000 = vperm.xlu0 %2587, %v51_v51  }
  0xee   :  { %v516_v54 = vpop.f32.mrf.mxu0 }
  0xef   :  { %v594_v41 = vpop.f32.mrf.mxu1  ;;  %v2932_v56 = vpop.f32.mrf.mxu2  ;;  %v531_v58 = vadd.f32 %v516_v54, %v453_v52 }
  0xf0   :  { %v2934_v57 = vpop.f32.mrf.mxu3 }
  0xf1   :  { %v2936_v59 = vadd.f32 %v594_v41, %v531_v58 }
  0xf6   :  { %v2938_v60 = vpop.f32.mrf.mxu0 }
  0xf7   :  { %v2940_v61 = vpop.f32.mrf.mxu1  ;;  %v365_v39 = vpop.f32.mrf.mxu2 }
  0xf8   :  { %v443_v53 = vpop.f32.mrf.mxu3  ;;  %v377_v0 = vadd.f32 %v365_v39, %v2878_v36  ;;  %v370_v36 = vadd.f32 %v2894_v62, %v279_v19 }
  0xfa   :  { %v455_v1 = vadd.f32 %v443_v53, %v377_v0  ;;  %v448_v33 = vadd.f32 %v2896_v63, %v370_v36  ;;  %v47_v63 = vld [vmem:[%s3588_s1 + $0x10] sm:$0xff]  ;;  %v52_v36 = vld [vmem:[%s3588_s1 + $0x38] sm:$0xff] }
  0xfb   :  { %980 = vperm.xlu1 %2588, %v47_v63  }
  0xfc   :  { %v526_v27 = vadd.f32 %v2903_v7, %v448_v33  ;;  %v284_v7 = vadd.f32 %v2876_v35, %v2874_v34  ;;  %v48_v35 = vld [vmem:[%s3588_s1 + $0x18] sm:$0xff] }
  0xfe   :  { %v521_v20 = vpop.f32.mrf.mxu0  ;;  %v604_v15 = vadd.f32 %v2905_v42, %v526_v27  ;;  %v372_v42 = vadd.f32 %v2907_v12, %v284_v7 }
  0xff   :  { %v599_v3 = vpop.f32.mrf.mxu1  ;;  %v367_v50 = vpop.f32.mrf.mxu2  ;;  %v533_v9 = vadd.f32 %v521_v20, %v455_v1 }
 0x100   :  { %v445_v8 = vpop.f32.mrf.mxu3  ;;  %v450_v0 = vadd.f32 %v2909_v21, %v372_v42 }
 0x101   :  { %v2943_v10 = vadd.f32 %v599_v3, %v533_v9 }
 0x102   :  { %v528_v1 = vadd.f32 %v2914_v25, %v450_v0  ;;  %v289_v25 = vadd.f32 %v2890_v28, %v2888_v55 }
 0x103   :  { %985 = vperm.xlu1 %2588, %v48_v35  }
 0x104   :  { %v606_v9 = vadd.f32 %v2916_v26, %v528_v1 }
 0x106   :  { %v523_v2 = vpop.f32.mrf.mxu0 }
 0x107   :  { %v601_v22 = vpop.f32.mrf.mxu1  ;;  %v657_v32 = vpop.f32.mrf.mxu2 }
 0x108   :  { %v735_v31 = vpop.f32.mrf.mxu3  ;;  %v681_v38 = vadd.f32 %v657_v32, %v2898_v6  ;;  %v2969_v6 = vld [vmem:[%s3585_s3] ss:$0 sm:$0xff] }
 0x10a   :  { %v759_v45 = vadd.f32 %v735_v31, %v681_v38 }
 0x10b   :  { %1005 = vperm.xlu1 %2588, %v52_v36  }
 0x10e   :  { %v813_v14 = vpop.f32.mrf.mxu0 }
 0x10f   :  { %v659_v40 = vpop.f32.mrf.mxu2  ;;  %v837_v37 = vadd.f32 %v813_v14, %v759_v45 }
 0x110   :  { %v737_v62 = vpop.f32.mrf.mxu3  ;;  %v682_v49 = vadd.f32 %v659_v40, %v604_v15 }
 0x111   :  { %v850_v41 = vadd.f32 %v2969_v6, %v837_v37 }
 0x112   :  { %v760_v52 = vadd.f32 %v737_v62, %v682_v49 }
 0x113   :  { %v859_v20 = vmax.f32 %v850_v41, 0.0 }
 0x116   :  { %v815_v54 = vpop.f32.mrf.mxu0 }
 0x117   :  { %v662_v58 = vpop.f32.mrf.mxu2  ;;  %v838_v53 = vadd.f32 %v815_v54, %v760_v52 }
 0x118   :  { %v740_v39 = vpop.f32.mrf.mxu3  ;;  %v683_v12 = vadd.f32 %v662_v58, %v2911_v24  ;;  %v374_v24 = vadd.f32 %v2921_v43, %v289_v25 }
 0x119   :  { %v851_v34 = vadd.f32 %v2969_v6, %v838_v53 }
 0x11a   :  { %v761_v21 = vadd.f32 %v740_v39, %v683_v12  ;;  %v452_v27 = vadd.f32 %v2923_v44, %v374_v24  ;;  %v294_v44 = vadd.f32 %v2869_v30, %v2867_v29 }
 0x11b   :  { %v860_v3 = vmax.f32 %v851_v34, 0.0 }
 0x11c   :  { %v530_v14 = vadd.f32 %v2927_v47, %v452_v27  ;;  %v376_v47 = vadd.f32 %v2932_v56, %v294_v44 }
 0x11d   :  { %v868_v50 = vpack.c.bf16 %v860_v3, %v859_v20 }
 0x11e   :  { %v818_v8 = vpop.f32.mrf.mxu0  ;;  %v608_v43 = vadd.f32 %v2929_v48, %v530_v14  ;;  %v454_v58 = vadd.f32 %v2934_v57, %v376_v47  ;;  %v50_v57 = vld [vmem:[%s3588_s1 + $0x28] sm:$0xff] }
 0x11f   :  { %v664_v11 = vpop.f32.mrf.mxu2  ;;  %2379 = vmatmul.msk.bf16.vlgmr.msra.gmra.mxu1 %vm76_vm0, %v868_v50  ;;  %v839_v2 = vadd.f32 %v818_v8, %v761_v21  ;;  %v53_v8 = vld [vmem:[%s3588_s1 + $0x40] sm:$0xff] }
 0x120   :  { %v742_v16 = vpop.f32.mrf.mxu3  ;;  %v684_v19 = vadd.f32 %v664_v11, %v606_v9  ;;  %v532_v29 = vadd.f32 %v2938_v60, %v454_v58  ;;  %v2564_v60 = vld [vmem:[%s3589_s6 + $0x18] sm:$0xff] }
 0x121   :  { %v852_v26 = vadd.f32 %v2969_v6, %v839_v2  ;;  %1147 = vmatpush.bf16.msrb.mxu2 %v2564_v60 }
 0x122   :  { %v762_v22 = vadd.f32 %v742_v16, %v684_v19  ;;  %v610_v35 = vadd.f32 %v2940_v61, %v532_v29 }
 0x123   :  { %v861_v15 = vmax.f32 %v852_v26, 0.0 }
 0x126   :  { %v820_v32 = vpop.f32.mrf.mxu0 }
 0x127   :  { %v667_v31 = vpop.f32.mrf.mxu2  ;;  %v840_v13 = vadd.f32 %v820_v32, %v762_v22 }
 0x128   :  { %v745_v33 = vpop.f32.mrf.mxu3  ;;  %v685_v55 = vadd.f32 %v667_v31, %v2925_v46  ;;  %v49_v46 = vld [vmem:[%s3588_s1 + $0x20] sm:$0xff] }
 0x129   :  { %v853_v38 = vadd.f32 %v2969_v6, %v840_v13  ;;  %990 = vperm.xlu2 %2589, %v49_v46  }
 0x12a   :  { %v763_v63 = vadd.f32 %v745_v33, %v685_v55  ;;  %v2568_v55 = vld [vmem:[%s3589_s6 + $0x38] sm:$0xff] }
 0x12b   :  { %v862_v40 = vmax.f32 %v853_v38, 0.0  ;;  %1354 = vmatpush.bf16.msrb.mxu1 %v2568_v55  ;;  %v2569_v55 = vld [vmem:[%s3589_s6 + $0x40] sm:$0xff] }
 0x12d   :  { %v869_v28 = vpack.c.bf16 %v862_v40, %v861_v15  ;;  %v2566_v40 = vld [vmem:[%s3589_s6 + $0x28] sm:$0xff] }
 0x12e   :  { %v823_v62 = vpop.f32.mrf.mxu0  ;;  %1276 = vmatpush.bf16.msrb.mxu0 %v2566_v40 }
 0x12f   :  { %v669_v45 = vpop.f32.mrf.mxu2  ;;  %2380 = vmatmul.msk.bf16.gmra.mxu1 %vm76_vm0, %v869_v28  ;;  %v841_v7 = vadd.f32 %v823_v62, %v763_v63  ;;  %v2565_v28 = vld [vmem:[%s3589_s6 + $0x20] sm:$0xff]  ;;  %v2567_v62 = vld [vmem:[%s3589_s6 + $0x30] sm:$0xff]  ;;  %v2570_v63 = vld [vmem:[%s3589_s6 + $0x48] sm:$0xff] }
 0x130   :  { %v747_v49 = vpop.f32.mrf.mxu3  ;;  %v686_v51 = vadd.f32 %v669_v45, %v608_v43  ;;  %1355 = vmatpush.bf16.msrb.mxu1 %v2567_v62  ;;  %v3047_v43 = vld [vmem:[%s3587_s5] ss:$0 sm:$0xff] }
 0x131   :  { %v854_v48 = vadd.f32 %v2969_v6, %v841_v7  ;;  %995 = vperm.xlu2 %2589, %v50_v57  }
 0x132   :  { %v764_v37 = vadd.f32 %v747_v49, %v686_v51  ;;  %1277 = vmatpush.bf16.msrb.mxu0 %v2565_v28 }
 0x133   :  { %v863_v30 = vmax.f32 %v854_v48, 0.0 }
 0x136   :  { %v825_v42 = vpop.f32.mrf.mxu0 }
 0x137   :  { %v672_v52 = vpop.f32.mrf.mxu2  ;;  %v842_v41 = vadd.f32 %v825_v42, %v764_v37 }
 0x138   :  { %v750_v54 = vpop.f32.mrf.mxu3  ;;  %v687_v53 = vadd.f32 %v672_v52, %v2936_v59  ;;  %v2563_v59 = vld [vmem:[%s3589_s6 + $0x10] sm:$0xff] }
 0x139   :  { %v855_v39 = vadd.f32 %v2969_v6, %v842_v41  ;;  %1148 = vmatpush.bf16.msrb.mxu2 %v2563_v59  ;;  %1010 = vperm.xlu2 %2589, %v53_v8  }
 0x13a   :  { %v765_v3 = vadd.f32 %v750_v54, %v687_v53 }
 0x13b   :  { %v864_v56 = vmax.f32 %v855_v39, 0.0 }
 0x13d   :  { %v870_v0 = vpack.c.bf16 %v864_v56, %v863_v30  ;;  %1432 = vmatpush.bf16.msra.mxu2 %v2570_v63 }
 0x13e   :  { %v828_v34 = vpop.f32.mrf.mxu0 }
 0x13f   :  { %v674_v1 = vpop.f32.mrf.mxu2  ;;  %2381 = vmatmul.msk.bf16.gmra.mxu1 %vm76_vm0, %v870_v0  ;;  %v843_v61 = vadd.f32 %v828_v34, %v765_v3 }
 0x140   :  { %v752_v20 = vpop.f32.mrf.mxu3  ;;  %v688_v12 = vadd.f32 %v674_v1, %v610_v35 }
 0x141   :  { %v856_v11 = vadd.f32 %v2969_v6, %v843_v61  ;;  %1433 = vmatpush.bf16.msra.mxu2 %v2569_v55 }
 0x142   :  { %v766_v50 = vadd.f32 %v752_v20, %v688_v12 }
 0x143   :  { %v865_v2 = vmax.f32 %v856_v11, 0.0 }
 0x144   :  { %v971_v44 = vpop.permute.xlu0 %970 }
 0x146   :  { %v830_v9 = vpop.f32.mrf.mxu0 }
 0x147   :  { %v677_v16 = vpop.f32.mrf.mxu2  ;;  %v844_v19 = vadd.f32 %v830_v9, %v766_v50 }
 0x148   :  { %v755_v21 = vpop.f32.mrf.mxu3  ;;  %v689_v36 = vadd.f32 %v677_v16, %v2943_v10  ;;  %v2562_v10 = vld [vmem:[%s3589_s6 + $0x8] sm:$0xff] }
 0x149   :  { %v857_v25 = vadd.f32 %v2969_v6, %v844_v19  ;;  %1207 = vmatpush.bf16.msrb.mxu3 %v2562_v10 }
 0x14a   :  { %v767_v22 = vadd.f32 %v755_v21, %v689_v36 }
 0x14b   :  { %v866_v24 = vmax.f32 %v857_v25, 0.0 }
 0x14d   :  { %v871_v32 = vpack.c.bf16 %v866_v24, %v865_v2 }
 0x14e   :  { %v833_v26 = vpop.f32.mrf.mxu0 }
 0x14f   :  { %v845_v31 = vadd.f32 %v833_v26, %v767_v22  ;;  %2382 = vmatmul.msk.bf16.gmra.mxu1 %vm76_vm0, %v871_v32  ;;  %v679_v33 = vpop.f32.mrf.mxu2  ;;  %v93_v22 = vld [vmem:[%s3584_s0 + $0x30] sm:$0xff] }
 0x150   :  { %v757_v13 = vpop.f32.mrf.mxu3 }
 0x151   :  { %v858_v27 = vadd.f32 %v2969_v6, %v845_v31  ;;  %v2561_v6 = vld [vmem:[%s3589_s6] sm:$0xff] }
 0x152   :  { %1208 = vmatpush.bf16.msrb.mxu3 %v2561_v6  ;;  %v976_v48 = vpop.permute.xlu0 %975 }
 0x153   :  { %v867_v14 = vmax.f32 %v858_v27, 0.0 }
 0x155   :  { %v872_v15 = vpack.c.bf16 %v867_v14, %v867_v14 }
 0x156   :  { %v835_v38 = vpop.f32.mrf.mxu0 }
 0x15f   :  { %2383 = vmatmul.msk.bf16.gmra.mxu1 %vm76_vm0, %v872_v15 }
 0x16d   :  { %v981_v39 = vpop.permute.xlu1 %980 }
 0x175   :  { %v986_v50 = vpop.permute.xlu1 %985 }
 0x183   :  { %v991_v2 = vpop.permute.xlu2 %990 }
 0x19c   :  { %v913_v45 = vpop.f32.mrf.mxu1 }
 0x19d   :  { %v937_v49 = vadd.f32 %v913_v45, %v2682_v4  ;;  %v996_v45 = vpop.permute.xlu2 %995 }
 0x19f   :  { %v3054_v51 = vadd.f32 %v3047_v43, %v937_v49  ;;  %v94_v49 = vld [vmem:[%s3584_s0 + $0x38] sm:$0xff] }
 0x1a1   :  { %v959_v7 = vmax.f32 %v3054_v51, 0.0 }
 0x1a3   :  { %v1013_v47 = vmul.f32 %v971_v44, %v959_v7 }
 0x1a4   :  { %v915_v37 = vpop.f32.mrf.mxu1 }
 0x1a5   :  { %1022 = vst.msk [vmem:[#allocation2 + $0x8] sm:$0xff] %vm76_vm0, %v1013_v47  ;;  %v938_v46 = vadd.f32 %v915_v37, %v2687_v5 }
 0x1a7   :  { %v3060_v42 = vadd.f32 %v3047_v43, %v938_v46 }
 0x1a9   :  { %v960_v4 = vmax.f32 %v3060_v42, 0.0 }
 0x1ab   :  { %v1014_v52 = vmul.f32 %v976_v48, %v960_v4 }
 0x1ac   :  { %v918_v54 = vpop.f32.mrf.mxu1  ;;  %v1040_v5 = vld [vmem:[#allocation2 + $0x2] sm:$0xff] }
 0x1ad   :  { %1023 = vst.msk [vmem:[#allocation2 + $0x10] sm:$0xff] %vm76_vm0, %v1014_v52  ;;  %v939_v41 = vadd.f32 %v918_v54, %v2713_v17  ;;  %v1031_v56 = vld [vmem:[#allocation2 + $0x1] sm:$0xff]  ;;  %v1001_v54 = vpop.permute.xlu0 %1000 }
 0x1ae   :  { %v1049_v53 = vld [vmem:[#allocation2 + $0x3] sm:$0xff] }
 0x1af   :  { %v3066_v58 = vadd.f32 %v3047_v43, %v939_v41  ;;  %v1058_v3 = vld [vmem:[#allocation2 + $0x7] sm:$0xff] }
 0x1b0   :  { %v95_v41 = vld [vmem:[%s3584_s0 + $0x40] sm:$0xff] }
 0x1b1   :  { %v961_v29 = vmax.f32 %v3066_v58, 0.0 }
 0x1b3   :  { %v1015_v30 = vmul.f32 %v981_v39, %v961_v29 }
 0x1b4   :  { %v920_v0 = vpop.f32.mrf.mxu1  ;;  %v1041_v34 = vld [vmem:[#allocation2 + $0xa] sm:$0xff] }
 0x1b5   :  { %v3069_v35 = vld [vmem:[#allocation2 + $0x9] sm:$0xff]  ;;  %1024 = vst.msk [vmem:[#allocation2 + $0x18] sm:$0xff] %vm76_vm0, %v1015_v30  ;;  %v940_v20 = vadd.f32 %v920_v0, %v2718_v18  ;;  %v1105_v17 = vpack.c.bf16 %v1041_v34, %v1040_v5 }
 0x1b6   :  { %v1050_v1 = vld [vmem:[#allocation2 + $0xb] sm:$0xff]  ;;  %v1096_v57 = vpack.c.bf16 %v3069_v35, %v1031_v56 }
 0x1b7   :  { %v1234_v60 = vpack.c.bf16 %v1050_v1, %v1049_v53  ;;  %v3074_v12 = vld [vmem:[#allocation2 + $0xf] sm:$0xff]  ;;  %v3078_v61 = vadd.f32 %v3047_v43, %v940_v20  ;;  %2392 = vmatmul.msk.bf16.vlgmr.msrb.gmra.mxu2 %vm76_vm0, %v1105_v17 }
 0x1b8   :  { %v1312_v59 = vpack.c.bf16 %v3074_v12, %v1058_v3  ;;  %2405 = vmatmul.msk.bf16.vlgmr.msrb.gmra.mxu3 %vm76_vm0, %v1096_v57 }
 0x1b9   :  { %2418 = vmatmul.msk.bf16.vlgmr.msrb.gmra.mxu0 %vm76_vm0, %v1234_v60  ;;  %v962_v18 = vmax.f32 %v3078_v61, 0.0 }
 0x1ba   :  { %2431 = vmatmul.msk.bf16.vlgmr.msrb.gmra.mxu1 %vm76_vm0, %v1312_v59  ;;  %v2572_v59 = vld [vmem:[%s3589_s6 + $0x58] sm:$0xff] }
 0x1bb   :  { %v1016_v8 = vmul.f32 %v986_v50, %v962_v18  ;;  %v2574_v18 = vld [vmem:[%s3589_s6 + $0x68] sm:$0xff]  ;;  %v2576_v50 = vld [vmem:[%s3589_s6 + $0x78] sm:$0xff]  ;;  %1510 = vmatpush.bf16.msra.mxu3 %v2572_v59  ;;  %v1068_v59 = vld [vmem:[#allocation2 + $0x10] sm:$0xff] }
 0x1bc   :  { %v923_v9 = vpop.f32.mrf.mxu1  ;;  %v3085_v11 = vld [vmem:[#allocation2 + $0x11] sm:$0xff]  ;;  %1588 = vmatpush.bf16.msra.mxu0 %v2574_v18  ;;  %1666 = vmatpush.bf16.msra.mxu1 %v2576_v50 }
 0x1bd   :  { %1025 = vst.msk [vmem:[#allocation2 + $0x20] sm:$0xff] %vm76_vm0, %v1016_v8  ;;  %v941_v16 = vadd.f32 %v923_v9, %v2732_v23  ;;  %v1468_v21 = vpack.c.bf16 %v3085_v11, %v3069_v35  ;;  %v3091_v19 = vld [vmem:[#allocation2 + $0x17] sm:$0xff]  ;;  %v1006_v9 = vpop.permute.xlu1 %1005 }
 0x1be   :  { %v1702_v36 = vpack.c.bf16 %v3091_v19, %v3074_v12  ;;  %v1042_v23 = vld [vmem:[#allocation2 + $0x12] sm:$0xff] }
 0x1bf   :  { %v3096_v25 = vadd.f32 %v3047_v43, %v941_v16  ;;  %v1051_v26 = vld [vmem:[#allocation2 + $0x13] sm:$0xff]  ;;  %v96_v16 = vld [vmem:[%s3584_s0 + $0x48] sm:$0xff] }
 0x1c0   :  { %v1078_v18 = vld [vmem:[#allocation2 + $0x15] sm:$0xff] }
 0x1c1   :  { %v963_v24 = vmax.f32 %v3096_v25, 0.0  ;;  %v1087_v50 = vld [vmem:[#allocation2 + $0x16] sm:$0xff] }
 0x1c3   :  { %v1017_v32 = vmul.f32 %v991_v2, %v963_v24  ;;  %v2571_v2 = vld [vmem:[%s3589_s6 + $0x50] sm:$0xff]  ;;  %v2573_v24 = vld [vmem:[%s3589_s6 + $0x60] sm:$0xff] }
 0x1c4   :  { %v925_v31 = vpop.f32.mrf.mxu1  ;;  %v1043_v33 = vld [vmem:[#allocation2 + $0x1a] sm:$0xff]  ;;  %1511 = vmatpush.bf16.msra.mxu3 %v2571_v2  ;;  %1589 = vmatpush.bf16.msra.mxu0 %v2573_v24  ;;  %v1086_v2 = vld [vmem:[#allocation2 + $0xe] sm:$0xff] }
 0x1c5   :  { %v3102_v13 = vld [vmem:[#allocation2 + $0x19] sm:$0xff]  ;;  %1026 = vst.msk [vmem:[#allocation2 + $0x28] sm:$0xff] %vm76_vm0, %v1017_v32  ;;  %v942_v38 = vadd.f32 %v925_v31, %v93_v22  ;;  %v1106_v14 = vpack.c.bf16 %v1043_v33, %v1042_v23  ;;  %v2575_v32 = vld [vmem:[%s3589_s6 + $0x70] sm:$0xff] }
 0x1c6   :  { %v1052_v27 = vld [vmem:[#allocation2 + $0x1b] sm:$0xff]  ;;  %v1097_v15 = vpack.c.bf16 %v3102_v13, %v3085_v11  ;;  %1667 = vmatpush.bf16.msra.mxu1 %v2575_v32 }
 0x1c7   :  { %v1235_v10 = vpack.c.bf16 %v1052_v27, %v1051_v26  ;;  %v3107_v40 = vld [vmem:[#allocation2 + $0x1f] sm:$0xff]  ;;  %v3115_v28 = vadd.f32 %v3047_v43, %v942_v38  ;;  %2393 = vmatmul.msk.bf16.gmra.mxu2 %vm76_vm0, %v1106_v14 }
 0x1c8   :  { %v1313_v6 = vpack.c.bf16 %v3107_v40, %v3091_v19  ;;  %2406 = vmatmul.msk.bf16.gmra.mxu3 %vm76_vm0, %v1097_v15  ;;  %v2577_v32 = vld [vmem:[%s3589_s6 + $0x80] sm:$0xff] }
 0x1c9   :  { %2419 = vmatmul.msk.bf16.gmra.mxu0 %vm76_vm0, %v1235_v10  ;;  %v964_v62 = vmax.f32 %v3115_v28, 0.0  ;;  %v1011_v10 = vpop.permute.xlu2 %1010 }
 0x1ca   :  { %2432 = vmatmul.msk.bf16.gmra.mxu1 %vm76_vm0, %v1313_v6 }
 0x1cb   :  { %v1018_v63 = vmul.f32 %v996_v45, %v964_v62 }
 0x1cc   :  { %v928_v44 = vpop.f32.mrf.mxu1  ;;  %v3125_v7 = vld [vmem:[#allocation2 + $0x21] sm:$0xff] }
 0x1cd   :  { %1027 = vst.msk [vmem:[#allocation2 + $0x30] sm:$0xff] %vm76_vm0, %v1018_v63  ;;  %v943_v47 = vadd.f32 %v928_v44, %v94_v49  ;;  %v3128_v37 = vld [vmem:[#allocation2 + $0x27] sm:$0xff]  ;;  %v1469_v46 = vpack.c.bf16 %v3125_v7, %v3102_v13 }
 0x1ce   :  { %v1703_v4 = vpack.c.bf16 %v3128_v37, %v3107_v40  ;;  %v1044_v29 = vld [vmem:[#allocation2 + $0x22] sm:$0xff] }
 0x1cf   :  { %v3135_v48 = vadd.f32 %v3047_v43, %v943_v47  ;;  %v1053_v30 = vld [vmem:[#allocation2 + $0x23] sm:$0xff] }
 0x1d1   :  { %v965_v52 = vmax.f32 %v3135_v48, 0.0 }
 0x1d3   :  { %v1019_v39 = vmul.f32 %v1001_v54, %v965_v52 }
 0x1d4   :  { %v930_v5 = vpop.f32.mrf.mxu1  ;;  %v1045_v56 = vld [vmem:[#allocation2 + $0x2a] sm:$0xff] }
 0x1d5   :  { %v3141_v53 = vld [vmem:[#allocation2 + $0x29] sm:$0xff]  ;;  %1028 = vst.msk [vmem:[#allocation2 + $0x38] sm:$0xff] %vm76_vm0, %v1019_v39  ;;  %v944_v34 = vadd.f32 %v930_v5, %v95_v41  ;;  %v1107_v1 = vpack.c.bf16 %v1045_v56, %v1044_v29 }
 0x1d6   :  { %v1054_v0 = vld [vmem:[#allocation2 + $0x2b] sm:$0xff]  ;;  %v1098_v20 = vpack.c.bf16 %v3141_v53, %v3125_v7 }
 0x1d7   :  { %v1236_v17 = vpack.c.bf16 %v1054_v0, %v1053_v30  ;;  %v3146_v57 = vld [vmem:[#allocation2 + $0x2f] sm:$0xff]  ;;  %v3151_v3 = vadd.f32 %v3047_v43, %v944_v34  ;;  %2394 = vmatmul.msk.bf16.gmra.mxu2 %vm76_vm0, %v1107_v1 }
 0x1d8   :  { %v1314_v60 = vpack.c.bf16 %v3146_v57, %v3128_v37  ;;  %2407 = vmatmul.msk.bf16.gmra.mxu3 %vm76_vm0, %v1098_v20  ;;  %v2578_v39 = vld [vmem:[%s3589_s6 + $0x88] sm:$0xff]  ;;  %v1072_v11 = vld [vmem:[#allocation2 + $0x30] sm:$0xff] }
 0x1d9   :  { %2420 = vmatmul.msk.bf16.gmra.mxu0 %vm76_vm0, %v1236_v17  ;;  %v966_v8 = vmax.f32 %v3151_v3, 0.0  ;;  %1744 = vmatpush.bf16.msrb.mxu2 %v2578_v39 }
 0x1da   :  { %2433 = vmatmul.msk.bf16.gmra.mxu1 %vm76_vm0, %v1314_v60 }
 0x1db   :  { %v1020_v22 = vmul.f32 %v1006_v9, %v966_v8  ;;  %v1067_v8 = vld [vmem:[#allocation2 + $0x8] sm:$0xff] }
 0x1dc   :  { %v933_v23 = vpop.f32.mrf.mxu1  ;;  %v3179_v26 = vld [vmem:[#allocation2 + $0x31] sm:$0xff]  ;;  %v1390_v9 = vpack.c.bf16 %v1068_v59, %v1067_v8 }
 0x1dd   :  { %1029 = vst.msk [vmem:[#allocation2 + $0x40] sm:$0xff] %vm76_vm0, %v1020_v22  ;;  %v945_v31 = vadd.f32 %v933_v23, %v96_v16  ;;  %v3182_v33 = vld [vmem:[#allocation2 + $0x37] sm:$0xff]  ;;  %v1470_v27 = vpack.c.bf16 %v3179_v26, %v3141_v53  ;;  %v1077_v16 = vld [vmem:[#allocation2 + $0xd] sm:$0xff]  ;;  %v1624_v22 = vpack.c.bf16 %v1087_v50, %v1086_v2  ;;  %1745 = vmatpush.bf16.msrb.mxu2 %v2577_v32  ;;  %v1070_v23 = vld [vmem:[#allocation2 + $0x20] sm:$0xff] }
 0x1de   :  { %v1704_v38 = vpack.c.bf16 %v3182_v33, %v3146_v57  ;;  %v1046_v6 = vld [vmem:[#allocation2 + $0x32] sm:$0xff]  ;;  %v1546_v24 = vpack.c.bf16 %v1078_v18, %v1077_v16 }
 0x1df   :  { %v3189_v14 = vadd.f32 %v3047_v43, %v945_v31  ;;  %v1055_v62 = vld [vmem:[#allocation2 + $0x33] sm:$0xff]  ;;  %v1080_v31 = vld [vmem:[#allocation2 + $0x25] sm:$0xff] }
 0x1e1   :  { %v967_v15 = vmax.f32 %v3189_v14, 0.0 }
 0x1e3   :  { %v1021_v55 = vmul.f32 %v1011_v10, %v967_v15  ;;  %v1089_v15 = vld [vmem:[#allocation2 + $0x26] sm:$0xff]  ;;  %v1069_v10 = vld [vmem:[#allocation2 + $0x18] sm:$0xff] }
 0x1e4   :  { %v935_v45 = vpop.f32.mrf.mxu1  ;;  %v1047_v49 = vld [vmem:[#allocation2 + $0x3a] sm:$0xff] }
 0x1e5   :  { %v3192_v63 = vld [vmem:[#allocation2 + $0x39] sm:$0xff]  ;;  %1030 = vst.msk [vmem:[#allocation2 + $0x48] sm:$0xff] %vm76_vm0, %v1021_v55  ;;  %v1108_v47 = vpack.c.bf16 %v1047_v49, %v1046_v6  ;;  %v1391_v55 = vpack.c.bf16 %v1070_v23, %v1069_v10 }
 0x1e6   :  { %v1056_v44 = vld [vmem:[#allocation2 + $0x3b] sm:$0xff]  ;;  %v1099_v52 = vpack.c.bf16 %v3192_v63, %v3179_v26 }
 0x1e7   :  { %v1237_v43 = vpack.c.bf16 %v1056_v44, %v1055_v62  ;;  %v3197_v54 = vld [vmem:[#allocation2 + $0x3f] sm:$0xff]  ;;  %2395 = vmatmul.msk.bf16.gmra.mxu2 %vm76_vm0, %v1108_v47  ;;  %v1091_v49 = vld [vmem:[#allocation2 + $0x36] sm:$0xff]  ;;  %v1071_v44 = vld [vmem:[#allocation2 + $0x28] sm:$0xff] }
 0x1e8   :  { %v1315_v41 = vpack.c.bf16 %v3197_v54, %v3182_v33  ;;  %2408 = vmatmul.msk.bf16.gmra.mxu3 %vm76_vm0, %v1099_v52  ;;  %v1079_v6 = vld [vmem:[#allocation2 + $0x1d] sm:$0xff]  ;;  %v1392_v47 = vpack.c.bf16 %v1072_v11, %v1071_v44  ;;  %v1081_v52 = vld [vmem:[#allocation2 + $0x2d] sm:$0xff] }
 0x1e9   :  { %2421 = vmatmul.msk.bf16.gmra.mxu0 %vm76_vm0, %v1237_v43  ;;  %v1088_v62 = vld [vmem:[#allocation2 + $0x1e] sm:$0xff]  ;;  %v1547_v45 = vpack.c.bf16 %v1080_v31, %v1079_v6  ;;  %v1090_v43 = vld [vmem:[#allocation2 + $0x2e] sm:$0xff] }
 0x1ea   :  { %2434 = vmatmul.msk.bf16.gmra.mxu1 %vm76_vm0, %v1315_v41  ;;  %v1625_v35 = vpack.c.bf16 %v1089_v15, %v1088_v62  ;;  %v1626_v39 = vpack.c.bf16 %v1091_v49, %v1090_v43  ;;  %v1074_v13 = vld [vmem:[#allocation2 + $0x40] sm:$0xff] }
 0x1ec   :  { %v3208_v29 = vld [vmem:[#allocation2 + $0x41] sm:$0xff] }
 0x1ed   :  { %v3210_v30 = vld [vmem:[#allocation2 + $0x47] sm:$0xff]  ;;  %v1471_v5 = vpack.c.bf16 %v3208_v29, %v3192_v63  ;;  %v1100_v20 = vpack.c.bf16 %v3208_v29, %v3208_v29 }
 0x1ee   :  { %v1705_v56 = vpack.c.bf16 %v3210_v30, %v3197_v54  ;;  %v1048_v0 = vld [vmem:[#allocation2 + $0x42] sm:$0xff]  ;;  %v1316_v60 = vpack.c.bf16 %v3210_v30, %v3210_v30  ;;  %v1085_v29 = vld [vmem:[#allocation2 + $0x4d] sm:$0xff] }
 0x1ef   :  { %v1057_v34 = vld [vmem:[#allocation2 + $0x43] sm:$0xff]  ;;  %v1109_v1 = vpack.c.bf16 %v1048_v0, %v1048_v0  ;;  %v1073_v0 = vld [vmem:[#allocation2 + $0x38] sm:$0xff]  ;;  %v1550_v31 = vpack.c.bf16 %v1085_v29, %v1085_v29 }
 0x1f0   :  { %v1238_v17 = vpack.c.bf16 %v1057_v34, %v1057_v34  ;;  %v1084_v7 = vld [vmem:[#allocation2 + $0x45] sm:$0xff] }
 0x1f1   :  { %v1075_v2 = vld [vmem:[#allocation2 + $0x48] sm:$0xff] }
 0x1f2   :  { %v1076_v63 = vld [vmem:[#allocation2 + $0x49] sm:$0xff]  ;;  %v1394_v32 = vpack.c.bf16 %v1075_v2, %v1075_v2 }
 0x1f3   :  { %v1472_v23 = vpack.c.bf16 %v1076_v63, %v1076_v63 }
 0x1f7   :  { %2396 = vmatmul.msk.bf16.gmra.mxu2 %vm76_vm0, %v1109_v1 }
 0x1f8   :  { %2409 = vmatmul.msk.bf16.gmra.mxu3 %vm76_vm0, %v1100_v20  ;;  %v1393_v20 = vpack.c.bf16 %v1074_v13, %v1073_v0 }
 0x1f9   :  { %2422 = vmatmul.msk.bf16.gmra.mxu0 %vm76_vm0, %v1238_v17  ;;  %v1083_v17 = vld [vmem:[#allocation2 + $0x3d] sm:$0xff] }
 0x1fa   :  { %2435 = vmatmul.msk.bf16.gmra.mxu1 %vm76_vm0, %v1316_v60  ;;  %v1092_v60 = vld [vmem:[#allocation2 + $0x3e] sm:$0xff]  ;;  %v1549_v59 = vpack.c.bf16 %v1084_v7, %v1083_v17 }
 0x207   :  { %2444 = vmatmul.msk.bf16.vlgmr.msra.gmra.mxu2 %vm76_vm0, %v1390_v9 }
 0x208   :  { %2457 = vmatmul.msk.bf16.vlgmr.msra.gmra.mxu3 %vm76_vm0, %v1468_v21  ;;  %v1082_v21 = vld [vmem:[#allocation2 + $0x35] sm:$0xff] }
 0x209   :  { %2470 = vmatmul.msk.bf16.vlgmr.msra.gmra.mxu0 %vm76_vm0, %v1546_v24  ;;  %v1548_v41 = vpack.c.bf16 %v1082_v21, %v1081_v52 }
 0x20a   :  { %2483 = vmatmul.msk.bf16.vlgmr.msra.gmra.mxu1 %vm76_vm0, %v1624_v22 }
 0x217   :  { %2445 = vmatmul.msk.bf16.gmra.mxu2 %vm76_vm0, %v1391_v55 }
 0x218   :  { %2458 = vmatmul.msk.bf16.gmra.mxu3 %vm76_vm0, %v1469_v46  ;;  %v1093_v46 = vld [vmem:[#allocation2 + $0x46] sm:$0xff] }
 0x219   :  { %2471 = vmatmul.msk.bf16.gmra.mxu0 %vm76_vm0, %v1547_v45  ;;  %v1627_v18 = vpack.c.bf16 %v1093_v46, %v1092_v60 }
 0x21a   :  { %2484 = vmatmul.msk.bf16.gmra.mxu1 %vm76_vm0, %v1625_v35 }
 0x227   :  { %2446 = vmatmul.msk.bf16.gmra.mxu2 %vm76_vm0, %v1392_v47 }
 0x228   :  { %2459 = vmatmul.msk.bf16.gmra.mxu3 %vm76_vm0, %v1470_v27 }
 0x229   :  { %2472 = vmatmul.msk.bf16.gmra.mxu0 %vm76_vm0, %v1548_v41 }
 0x22a   :  { %2485 = vmatmul.msk.bf16.gmra.mxu1 %vm76_vm0, %v1626_v39 }
 0x236   :  { %v3248_v34 = vpop.f32.mrf.mxu0 }
 0x237   :  { %v3250_v1 = vpop.f32.mrf.mxu1  ;;  %2447 = vmatmul.msk.bf16.gmra.mxu2 %vm76_vm0, %v1393_v20 }
 0x238   :  { %2460 = vmatmul.msk.bf16.gmra.mxu3 %vm76_vm0, %v1471_v5  ;;  %v1094_v5 = vld [vmem:[#allocation2 + $0x4e] sm:$0xff] }
 0x239   :  { %2473 = vmatmul.msk.bf16.gmra.mxu0 %vm76_vm0, %v1549_v59  ;;  %v1628_v15 = vpack.c.bf16 %v1094_v5, %v1094_v5 }
 0x23a   :  { %2486 = vmatmul.msk.bf16.gmra.mxu1 %vm76_vm0, %v1627_v18  ;;  %v1150_v53 = vpop.f32.mrf.mxu2 }
 0x23b   :  { %v1210_v26 = vpop.f32.mrf.mxu3 }
 0x23c   :  { %v3259_v27 = vadd.f32 %v1210_v26, %v1150_v53 }
 0x23e   :  { %v3261_v50 = vpop.f32.mrf.mxu0  ;;  %v1303_v57 = vadd.f32 %v3248_v34, %v3259_v27 }
 0x23f   :  { %v3263_v8 = vpop.f32.mrf.mxu1 }
 0x242   :  { %v3265_v9 = vpop.f32.mrf.mxu2 }
 0x243   :  { %v3267_v16 = vpop.f32.mrf.mxu3 }
 0x246   :  { %v3269_v24 = vpop.f32.mrf.mxu0 }
 0x247   :  { %v3271_v22 = vpop.f32.mrf.mxu1  ;;  %2448 = vmatmul.msk.bf16.gmra.mxu2 %vm76_vm0, %v1394_v32 }
 0x248   :  { %2461 = vmatmul.msk.bf16.gmra.mxu3 %vm76_vm0, %v1472_v23 }
 0x249   :  { %2474 = vmatmul.msk.bf16.gmra.mxu0 %vm76_vm0, %v1550_v31 }
 0x24a   :  { %2487 = vmatmul.msk.bf16.gmra.mxu1 %vm76_vm0, %v1628_v15  ;;  %v1155_v10 = vpop.f32.mrf.mxu2 }
 0x24b   :  { %v1215_v55 = vpop.f32.mrf.mxu3 }
 0x24c   :  { %v3277_v6 = vadd.f32 %v1215_v55, %v1155_v10  ;;  %v2580_v55 = vld [vmem:[%s3591_s8 + $0x8] sm:$0xff] }
 0x24d   :  { %1844 = vmatpush.bf16.msrb.mxu3 %v2580_v55 }
 0x24e   :  { %v3279_v62 = vpop.f32.mrf.mxu0 }
 0x24f   :  { %v3281_v45 = vpop.f32.mrf.mxu1 }
 0x252   :  { %v3283_v35 = vpop.f32.mrf.mxu2 }
 0x253   :  { %v3285_v11 = vpop.f32.mrf.mxu3 }
 0x256   :  { %v3287_v21 = vpop.f32.mrf.mxu0 }
 0x257   :  { %v3289_v49 = vpop.f32.mrf.mxu1  ;;  %2496 = vmatmul.msk.bf16.vlgmr.msrb.gmra.mxu2 %vm76_vm0, %v1702_v36 }
 0x25a   :  { %v1160_v44 = vpop.f32.mrf.mxu2 }
 0x25b   :  { %v1220_v47 = vpop.f32.mrf.mxu3 }
 0x25c   :  { %v3295_v52 = vadd.f32 %v1220_v47, %v1160_v44 }
 0x25e   :  { %v1291_v43 = vpop.f32.mrf.mxu0 }
 0x25f   :  { %v1369_v41 = vpop.f32.mrf.mxu1 }
 0x262   :  { %v1162_v39 = vpop.f32.mrf.mxu2 }
 0x263   :  { %v1222_v13 = vpop.f32.mrf.mxu3 }
 0x264   :  { %v1223_v7 = vadd.f32 %v1222_v13, %v1162_v39  ;;  %v1381_v39 = vadd.f32 %v3250_v1, %v1303_v57  ;;  %v1305_v1 = vadd.f32 %v3269_v24, %v3277_v6 }
 0x266   :  { %v1308_v46 = vadd.f32 %v1291_v43, %v1223_v7  ;;  %v1294_v0 = vpop.f32.mrf.mxu0 }
 0x267   :  { %v1372_v20 = vpop.f32.mrf.mxu1  ;;  %2497 = vmatmul.msk.bf16.gmra.mxu2 %vm76_vm0, %v1703_v4 }
 0x268   :  { %v3301_v12 = vadd.f32 %v1369_v41, %v1308_v46  ;;  %v1213_v41 = vadd.f32 %v3267_v16, %v3265_v9 }
 0x26a   :  { %v1165_v19 = vpop.f32.mrf.mxu2 }
 0x26b   :  { %v1225_v36 = vpop.f32.mrf.mxu3 }
 0x26c   :  { %v1226_v17 = vadd.f32 %v1225_v36, %v1165_v19 }
 0x26e   :  { %v1309_v60 = vadd.f32 %v1294_v0, %v1226_v17  ;;  %v1296_v59 = vpop.f32.mrf.mxu0  ;;  %v1304_v0 = vadd.f32 %v3261_v50, %v1213_v41 }
 0x26f   :  { %v1374_v18 = vpop.f32.mrf.mxu1 }
 0x270   :  { %v3303_v53 = vadd.f32 %v1372_v20, %v1309_v60  ;;  %v1382_v36 = vadd.f32 %v3263_v8, %v1304_v0  ;;  %v1383_v8 = vadd.f32 %v3271_v22, %v1305_v1  ;;  %v1307_v22 = vadd.f32 %v3287_v21, %v3295_v52 }
 0x272   :  { %v1167_v26 = vpop.f32.mrf.mxu2  ;;  %v1385_v57 = vadd.f32 %v3289_v49, %v1307_v22 }
 0x273   :  { %v1227_v2 = vpop.f32.mrf.mxu3 }
 0x274   :  { %v1228_v63 = vadd.f32 %v1227_v2, %v1167_v26  ;;  %v1218_v26 = vadd.f32 %v3285_v11, %v3283_v35 }
 0x276   :  { %v1310_v29 = vadd.f32 %v1296_v59, %v1228_v63  ;;  %v1299_v5 = vpop.f32.mrf.mxu0 }
 0x277   :  { %v1377_v32 = vpop.f32.mrf.mxu1  ;;  %2498 = vmatmul.msk.bf16.gmra.mxu2 %vm76_vm0, %v1704_v38 }
 0x278   :  { %v3309_v40 = vadd.f32 %v1374_v18, %v1310_v29 }
 0x27a   :  { %v1170_v37 = vpop.f32.mrf.mxu2 }
 0x27b   :  { %v1230_v4 = vpop.f32.mrf.mxu3 }
 0x27c   :  { %v1231_v23 = vadd.f32 %v1230_v4, %v1170_v37 }
 0x27e   :  { %v1311_v31 = vadd.f32 %v1299_v5, %v1231_v23  ;;  %v1301_v15 = vpop.f32.mrf.mxu0 }
 0x27f   :  { %v1379_v10 = vpop.f32.mrf.mxu1 }
 0x280   :  { %v3314_v44 = vadd.f32 %v1377_v32, %v1311_v31  ;;  %v1306_v32 = vadd.f32 %v3279_v62, %v1218_v26  ;;  %v2579_v62 = vld [vmem:[%s3591_s8] sm:$0xff] }
 0x281   :  { %1845 = vmatpush.bf16.msrb.mxu3 %v2579_v62 }
 0x282   :  { %v1172_v47 = vpop.f32.mrf.mxu2  ;;  %v1384_v23 = vadd.f32 %v3281_v45, %v1306_v32 }
 0x283   :  { %v1232_v43 = vpop.f32.mrf.mxu3 }
 0x286   :  { %v1591_v33 = vpop.f32.mrf.mxu0 }
 0x287   :  { %v1669_v38 = vpop.f32.mrf.mxu1  ;;  %2499 = vmatmul.msk.bf16.gmra.mxu2 %vm76_vm0, %v1705_v56  ;;  %v1095_v56 = vld [vmem:[#allocation2 + $0x4f] sm:$0xff] }
 0x288   :  { %v1706_v18 = vpack.c.bf16 %v1095_v56, %v1095_v56 }
 0x28a   :  { %v1435_v13 = vpop.f32.mrf.mxu2 }
 0x28b   :  { %v1513_v7 = vpop.f32.mrf.mxu3  ;;  %v1459_v46 = vadd.f32 %v1435_v13, %v1381_v39 }
 0x28d   :  { %v1537_v20 = vadd.f32 %v1513_v7, %v1459_v46 }
 0x28e   :  { %v1593_v19 = vpop.f32.mrf.mxu0 }
 0x28f   :  { %v1671_v34 = vpop.f32.mrf.mxu1  ;;  %v1615_v27 = vadd.f32 %v1591_v33, %v1537_v20 }
 0x291   :  { %v3327_v17 = vadd.f32 %v1669_v38, %v1615_v27 }
 0x292   :  { %v1437_v54 = vpop.f32.mrf.mxu2 }
 0x293   :  { %v1515_v30 = vpop.f32.mrf.mxu3  ;;  %v1460_v60 = vadd.f32 %v1437_v54, %v1382_v36 }
 0x295   :  { %v1538_v9 = vadd.f32 %v1515_v30, %v1460_v60 }
 0x296   :  { %v1596_v16 = vpop.f32.mrf.mxu0 }
 0x297   :  { %v1674_v59 = vpop.f32.mrf.mxu1  ;;  %v1616_v50 = vadd.f32 %v1593_v19, %v1538_v9  ;;  %2500 = vmatmul.msk.bf16.gmra.mxu2 %vm76_vm0, %v1706_v18 }
 0x299   :  { %v3335_v2 = vadd.f32 %v1671_v34, %v1616_v50 }
 0x29a   :  { %v1440_v63 = vpop.f32.mrf.mxu2 }
 0x29b   :  { %v1518_v29 = vpop.f32.mrf.mxu3  ;;  %v1461_v5 = vadd.f32 %v1440_v63, %v1383_v8 }
 0x29d   :  { %v1539_v24 = vadd.f32 %v1518_v29, %v1461_v5 }
 0x29e   :  { %v1598_v6 = vpop.f32.mrf.mxu0 }
 0x29f   :  { %v1676_v37 = vpop.f32.mrf.mxu1  ;;  %v1617_v4 = vadd.f32 %v1596_v16, %v1539_v24 }
 0x2a1   :  { %v3339_v31 = vadd.f32 %v1674_v59, %v1617_v4 }
 0x2a2   :  { %v1442_v15 = vpop.f32.mrf.mxu2 }
 0x2a3   :  { %v1520_v10 = vpop.f32.mrf.mxu3  ;;  %v1462_v35 = vadd.f32 %v1442_v15, %v1384_v23 }
 0x2a5   :  { %v1540_v11 = vadd.f32 %v1520_v10, %v1462_v35 }
 0x2a6   :  { %v1601_v55 = vpop.f32.mrf.mxu0 }
 0x2a7   :  { %v1679_v47 = vpop.f32.mrf.mxu1  ;;  %v1618_v43 = vadd.f32 %v1598_v6, %v1540_v11 }
 0x2a9   :  { %v1696_v45 = vadd.f32 %v1676_v37, %v1618_v43 }
 0x2aa   :  { %v1445_v33 = vpop.f32.mrf.mxu2 }
 0x2ab   :  { %v1523_v38 = vpop.f32.mrf.mxu3  ;;  %v1463_v41 = vadd.f32 %v1445_v33, %v1385_v57 }
 0x2ad   :  { %v1541_v39 = vadd.f32 %v1523_v38, %v1463_v41 }
 0x2ae   :  { %v1603_v13 = vpop.f32.mrf.mxu0 }
 0x2af   :  { %v1681_v7 = vpop.f32.mrf.mxu1  ;;  %v1619_v46 = vadd.f32 %v1601_v55, %v1541_v39 }
 0x2b1   :  { %v1697_v21 = vadd.f32 %v1679_v47, %v1619_v46 }
 0x2b2   :  { %v1447_v52 = vpop.f32.mrf.mxu2 }
 0x2b3   :  { %v1525_v0 = vpop.f32.mrf.mxu3  ;;  %v1464_v20 = vadd.f32 %v1447_v52, %v3301_v12 }
 0x2b5   :  { %v1542_v19 = vadd.f32 %v1525_v0, %v1464_v20 }
 0x2b6   :  { %v1606_v34 = vpop.f32.mrf.mxu0 }
 0x2b7   :  { %v1684_v27 = vpop.f32.mrf.mxu1  ;;  %v1620_v36 = vadd.f32 %v1603_v13, %v1542_v19 }
 0x2b9   :  { %v1698_v54 = vadd.f32 %v1681_v7, %v1620_v36 }
 0x2ba   :  { %v1450_v49 = vpop.f32.mrf.mxu2 }
 0x2bb   :  { %v1528_v30 = vpop.f32.mrf.mxu3  ;;  %v1465_v56 = vadd.f32 %v1450_v49, %v3303_v53 }
 0x2bd   :  { %v1543_v60 = vadd.f32 %v1528_v30, %v1465_v56 }
 0x2be   :  { %v1608_v1 = vpop.f32.mrf.mxu0 }
 0x2bf   :  { %v1686_v9 = vpop.f32.mrf.mxu1  ;;  %v1621_v16 = vadd.f32 %v1606_v34, %v1543_v60  ;;  %v1897_v34 = vld [vmem:[%s3593_s10 + $0x18] sm:$0xff]  ;;  %v1896_v60 = vld [vmem:[%s3593_s10 + $0x10] sm:$0xff] }
 0x2c0   :  { %1937 = vmatpush.msrb.mxu0 %v1897_v34 }
 0x2c1   :  { %v1699_v59 = vadd.f32 %v1684_v27, %v1621_v16 }
 0x2c2   :  { %v1452_v18 = vpop.f32.mrf.mxu2  ;;  %1938 = vmatpush.msrb.mxu0 %v1896_v60 }
 0x2c3   :  { %v1530_v50 = vpop.f32.mrf.mxu3  ;;  %v1466_v26 = vadd.f32 %v1452_v18, %v3309_v40  ;;  %v2592_v40 = vld [vmem:[%s3590_s7] ss:$0 sm:$0xff] }
 0x2c5   :  { %v1544_v8 = vadd.f32 %v1530_v50, %v1466_v26 }
 0x2c6   :  { %v1611_v12 = vpop.f32.mrf.mxu0 }
 0x2c7   :  { %v1689_v63 = vpop.f32.mrf.mxu1  ;;  %v1622_v29 = vadd.f32 %v1608_v1, %v1544_v8 }
 0x2c9   :  { %v1700_v5 = vadd.f32 %v1686_v9, %v1622_v29 }
 0x2ca   :  { %v1455_v32 = vpop.f32.mrf.mxu2 }
 0x2cb   :  { %v1533_v24 = vpop.f32.mrf.mxu3  ;;  %v1467_v6 = vadd.f32 %v1455_v32, %v3314_v44 }
 0x2cd   :  { %v1545_v37 = vadd.f32 %v1533_v24, %v1467_v6 }
 0x2ce   :  { %v1613_v53 = vpop.f32.mrf.mxu0 }
 0x2cf   :  { %v1691_v4 = vpop.f32.mrf.mxu1  ;;  %v1623_v23 = vadd.f32 %v1611_v12, %v1545_v37 }
 0x2d1   :  { %v1701_v15 = vadd.f32 %v1689_v63, %v1623_v23 }
 0x2d2   :  { %v1457_v10 = vpop.f32.mrf.mxu2 }
 0x2d3   :  { %v1535_v35 = vpop.f32.mrf.mxu3 }
 0x2da   :  { %v1747_v22 = vpop.f32.mrf.mxu2 }
 0x2db   :  { %v1771_v11 = vadd.f32 %v1747_v22, %v3327_v17 }
 0x2dd   :  { %v1784_v47 = vadd.f32 %v2592_v40, %v1771_v11 }
 0x2df   :  { %v1793_v44 = vmax.f32 %v1784_v47, 0.0 }
 0x2e2   :  { %v1749_v55 = vpop.f32.mrf.mxu2 }
 0x2e3   :  { %v1772_v43 = vadd.f32 %v1749_v55, %v3335_v2 }
 0x2e5   :  { %v1785_v62 = vadd.f32 %v2592_v40, %v1772_v43 }
 0x2e7   :  { %v1794_v57 = vmax.f32 %v1785_v62, 0.0 }
 0x2e9   :  { %v1802_v33 = vpack.c.bf16 %v1794_v57, %v1793_v44 }
 0x2ea   :  { %v1752_v38 = vpop.f32.mrf.mxu2 }
 0x2eb   :  { %2509 = vmatmul.msk.bf16.vlgmr.msrb.gmra.mxu3 %vm76_vm0, %v1802_v33  ;;  %v1773_v41 = vadd.f32 %v1752_v38, %v3339_v31 }
 0x2ed   :  { %v1786_v13 = vadd.f32 %v2592_v40, %v1773_v41 }
 0x2ef   :  { %v1795_v46 = vmax.f32 %v1786_v13, 0.0 }
 0x2f2   :  { %v1754_v39 = vpop.f32.mrf.mxu2 }
 0x2f3   :  { %v1774_v17 = vadd.f32 %v1754_v39, %v1696_v45 }
 0x2f5   :  { %v1787_v7 = vadd.f32 %v2592_v40, %v1774_v17 }
 0x2f7   :  { %v1796_v52 = vmax.f32 %v1787_v7, 0.0 }
 0x2f9   :  { %v1803_v0 = vpack.c.bf16 %v1796_v52, %v1795_v46 }
 0x2fa   :  { %v1757_v20 = vpop.f32.mrf.mxu2 }
 0x2fb   :  { %2510 = vmatmul.msk.bf16.gmra.mxu3 %vm76_vm0, %v1803_v0  ;;  %v1775_v2 = vadd.f32 %v1757_v20, %v1697_v21  ;;  %v1895_v21 = vld [vmem:[%s3593_s10 + $0x8] sm:$0xff] }
 0x2fc   :  { %1939 = vmatpush.msrb.mxu0 %v1895_v21 }
 0x2fd   :  { %v1788_v27 = vadd.f32 %v2592_v40, %v1775_v2 }
 0x2ff   :  { %v1797_v49 = vmax.f32 %v1788_v27, 0.0 }
 0x302   :  { %v1759_v19 = vpop.f32.mrf.mxu2 }
 0x303   :  { %v1776_v36 = vadd.f32 %v1759_v19, %v1698_v54  ;;  %v1894_v54 = vld [vmem:[%s3593_s10] sm:$0xff] }
 0x304   :  { %1940 = vmatpush.msrb.mxu0 %v1894_v54 }
 0x305   :  { %v1789_v31 = vadd.f32 %v2592_v40, %v1776_v36 }
 0x307   :  { %v1798_v30 = vmax.f32 %v1789_v31, 0.0 }
 0x309   :  { %v1804_v45 = vpack.c.bf16 %v1798_v30, %v1797_v49 }
 0x30a   :  { %v1762_v56 = vpop.f32.mrf.mxu2 }
 0x30b   :  { %2511 = vmatmul.msk.bf16.gmra.mxu3 %vm76_vm0, %v1804_v45  ;;  %v1777_v1 = vadd.f32 %v1762_v56, %v1699_v59  ;;  %v2593_v59 = vld [vmem:[%s3592_s9] ss:$0 sm:$0xff] }
 0x30d   :  { %v1790_v16 = vadd.f32 %v2592_v40, %v1777_v1 }
 0x30f   :  { %v1799_v26 = vmax.f32 %v1790_v16, 0.0 }
 0x312   :  { %v1764_v9 = vpop.f32.mrf.mxu2 }
 0x313   :  { %v1778_v18 = vadd.f32 %v1764_v9, %v1700_v5  ;;  %v2008_v9 = vlaneseq }
 0x315   :  { %v1791_v50 = vadd.f32 %v2592_v40, %v1778_v18  ;;  %v3398_v16 = vand.u32 127, %v2008_v9 }
 0x317   :  { %v1800_v8 = vmax.f32 %v1791_v50, 0.0 }
 0x319   :  { %v1805_v12 = vpack.c.bf16 %v1800_v8, %v1799_v26 }
 0x31a   :  { %v1767_v63 = vpop.f32.mrf.mxu2 }
 0x31b   :  { %v1779_v29 = vadd.f32 %v1767_v63, %v1701_v15  ;;  %2512 = vmatmul.msk.bf16.gmra.mxu3 %vm76_vm0, %v1805_v12 }
 0x31d   :  { %v1792_v32 = vadd.f32 %v2592_v40, %v1779_v29 }
 0x31f   :  { %v1801_v6 = vmax.f32 %v1792_v32, 0.0 }
 0x321   :  { %v1806_v37 = vpack.c.bf16 %v1801_v6, %v1801_v6 }
 0x322   :  { %v1769_v24 = vpop.f32.mrf.mxu2 }
 0x32b   :  { %2513 = vmatmul.msk.bf16.gmra.mxu3 %vm76_vm0, %v1806_v37 }
 0x36e   :  { %v1847_v53 = vpop.f32.mrf.mxu3 }
 0x36f   :  { %v1871_v5 = vadd.f32 %v1847_v53, %v3054_v51 }
 0x371   :  { %v1884_v4 = vadd.f32 %v2593_v59, %v1871_v5 }
 0x373   :  { %2514 = vmatmul.msk.f32.vlgmr.msrb.gmra.mxu0 %vm76_vm0, %v1884_v4 }
 0x376   :  { %v1849_v23 = vpop.f32.mrf.mxu3 }
 0x377   :  { %v1872_v15 = vadd.f32 %v1849_v23, %v3060_v42 }
 0x379   :  { %v1885_v10 = vadd.f32 %v2593_v59, %v1872_v15 }
 0x37b   :  { %2515 = vmatmul.msk.f32.gmra.mxu0 %vm76_vm0, %v1885_v10 }
 0x37e   :  { %v1852_v35 = vpop.f32.mrf.mxu3 }
 0x37f   :  { %v1873_v22 = vadd.f32 %v1852_v35, %v3066_v58 }
 0x381   :  { %v1886_v11 = vadd.f32 %v2593_v59, %v1873_v22 }
 0x383   :  { %2516 = vmatmul.msk.f32.gmra.mxu0 %vm76_vm0, %v1886_v11 }
 0x386   :  { %v1854_v40 = vpop.f32.mrf.mxu3 }
 0x387   :  { %v1874_v55 = vadd.f32 %v1854_v40, %v3078_v61 }
 0x389   :  { %v1887_v47 = vadd.f32 %v2593_v59, %v1874_v55 }
 0x38b   :  { %2517 = vmatmul.msk.f32.gmra.mxu0 %vm76_vm0, %v1887_v47 }
 0x38e   :  { %v1857_v51 = vpop.f32.mrf.mxu3 }
 0x38f   :  { %v1875_v43 = vadd.f32 %v1857_v51, %v3096_v25 }
 0x391   :  { %v1888_v62 = vadd.f32 %v2593_v59, %v1875_v43 }
 0x393   :  { %2518 = vmatmul.msk.f32.gmra.mxu0 %vm76_vm0, %v1888_v62 }
 0x396   :  { %v1859_v42 = vpop.f32.mrf.mxu3 }
 0x397   :  { %v1876_v44 = vadd.f32 %v1859_v42, %v3115_v28 }
 0x399   :  { %v1889_v57 = vadd.f32 %v2593_v59, %v1876_v44 }
 0x39b   :  { %2519 = vmatmul.msk.f32.gmra.mxu0 %vm76_vm0, %v1889_v57 }
 0x39e   :  { %v1862_v58 = vpop.f32.mrf.mxu3 }
 0x39f   :  { %v1877_v33 = vadd.f32 %v1862_v58, %v3135_v48  ;;  %v2594_v48 = vld [vmem:[%s3594_s12] ss:$0 sm:$0xff] }
 0x3a1   :  { %v1890_v38 = vadd.f32 %v2593_v59, %v1877_v33 }
 0x3a3   :  { %2520 = vmatmul.msk.f32.gmra.mxu0 %vm76_vm0, %v1890_v38 }
 0x3a6   :  { %v1864_v61 = vpop.f32.mrf.mxu3 }
 0x3a7   :  { %v1878_v41 = vadd.f32 %v1864_v61, %v3151_v3 }
 0x3a9   :  { %v1891_v39 = vadd.f32 %v2593_v59, %v1878_v41 }
 0x3ab   :  { %2521 = vmatmul.msk.f32.gmra.mxu0 %vm76_vm0, %v1891_v39 }
 0x3ae   :  { %v1867_v25 = vpop.f32.mrf.mxu3 }
 0x3af   :  { %v1879_v13 = vadd.f32 %v1867_v25, %v3189_v14 }
 0x3b1   :  { %v1892_v17 = vadd.f32 %v2593_v59, %v1879_v13 }
 0x3b3   :  { %2522 = vmatmul.msk.f32.gmra.mxu0 %vm76_vm0, %v1892_v17 }
 0x3b6   :  { %v1869_v28 = vpop.f32.mrf.mxu3 }
 0x3f0   :  { %v1942_v7 = vpop.f32.mrf.mxu0 }
 0x3f1   :  { %v1969_v46 = vmul.f32 2.0, %v1942_v7 }
 0x3f3   :  { %v1981_v52 = vsub.f32 %v2594_v48, %v1969_v46 }
 0x3f5   :  { %1990 = vmin.xlane.f32.xlu0 %v1981_v52 }
 0x3f8   :  { %v1945_v0 = vpop.f32.mrf.mxu0 }
 0x3f9   :  { %v1970_v3 = vmul.f32 2.0, %v1945_v0 }
 0x3fb   :  { %v1982_v20 = vsub.f32 %v2594_v48, %v1970_v3 }
 0x3fd   :  { %1992 = vmin.xlane.f32.xlu1 %v1982_v20 }
 0x400   :  { %v1948_v2 = vpop.f32.mrf.mxu0 }
 0x401   :  { %v1971_v19 = vmul.f32 2.0, %v1948_v2 }
 0x403   :  { %v1983_v34 = vsub.f32 %v2594_v48, %v1971_v19 }
 0x405   :  { %1994 = vmin.xlane.f32.xlu2 %v1983_v34 }
 0x408   :  { %v1951_v14 = vpop.f32.mrf.mxu0 }
 0x409   :  { %v1972_v27 = vmul.f32 2.0, %v1951_v14 }
 0x40b   :  { %v1984_v36 = vsub.f32 %v2594_v48, %v1972_v27 }
 0x40d   :  { %1996 = vmin.xlane.f32.xlu2 %v1984_v36 }
 0x410   :  { %v1954_v31 = vpop.f32.mrf.mxu0 }
 0x411   :  { %v1973_v49 = vmul.f32 2.0, %v1954_v31  ;;  %v2196_v31 = vld [vmem:[%s3595_s11 + $0x78] sm:$0xff] }
 0x412   :  { %2197 = vmatpush.msrb.mxu1 %v2196_v31 }
 0x413   :  { %v1985_v30 = vsub.f32 %v2594_v48, %v1973_v49  ;;  %v2195_v49 = vld [vmem:[%s3595_s11 + $0x70] sm:$0xff] }
 0x414   :  { %2198 = vmatpush.msrb.mxu1 %v2195_v49 }
 0x415   :  { %1998 = vmin.xlane.f32.xlu0 %v1985_v30 }
 0x418   :  { %v1957_v45 = vpop.f32.mrf.mxu0 }
 0x419   :  { %v1974_v56 = vmul.f32 2.0, %v1957_v45 }
 0x41b   :  { %v1986_v60 = vsub.f32 %v2594_v48, %v1974_v56  ;;  %v2194_v56 = vld [vmem:[%s3595_s11 + $0x68] sm:$0xff] }
 0x41c   :  { %2199 = vmatpush.msrb.mxu1 %v2194_v56 }
 0x41d   :  { %2000 = vmin.xlane.f32.xlu1 %v1986_v60 }
 0x420   :  { %v1960_v21 = vpop.f32.mrf.mxu0 }
 0x421   :  { %v1975_v54 = vmul.f32 2.0, %v1960_v21 }
 0x423   :  { %v1987_v1 = vsub.f32 %v2594_v48, %v1975_v54 }
 0x425   :  { %2002 = vmin.xlane.f32.xlu0 %v1987_v1 }
 0x428   :  { %v1963_v8 = vpop.f32.mrf.mxu0 }
 0x429   :  { %v1976_v29 = vmul.f32 2.0, %v1963_v8  ;;  %v2189_v8 = vld [vmem:[%s3595_s11 + $0x40] sm:$0xff] }
 0x42b   :  { %v1988_v37 = vsub.f32 %v2594_v48, %v1976_v29  ;;  %v2188_v29 = vld [vmem:[%s3595_s11 + $0x38] sm:$0xff] }
 0x430   :  { %v1966_v59 = vpop.f32.mrf.mxu0 }
 0x431   :  { %v1977_v5 = vmul.f32 2.0, %v1966_v59  ;;  %v2185_v59 = vld [vmem:[%s3595_s11 + $0x20] sm:$0xff] }
 0x433   :  { %v1989_v10 = vsub.f32 %v2594_v48, %v1977_v5 }
 0x468   :  { %v1991_v18 = vpop.xlane.xlu0 %1990 }
 0x469   :  { %vm2010_vm1 = vcmp.le.f32.partialorder %v1981_v52, %v1991_v18  ;;  %v2191_v18 = vld [vmem:[%s3595_s11 + $0x50] sm:$0xff] }
 0x46a   :  { %v2019_v50 = vsel %vm2010_vm1, %v3398_v16, 128 }
 0x46b   :  { %v2029_v26 = vshra.s32 %v2019_v50, 16  ;;  %v2028_v41 = vand.u32 65535, %v2019_v50 }
 0x46d   :  { %v2031_v12 = vcvt.s32.f32 %v2029_v26  ;;  %v2030_v25 = vcvt.s32.f32 %v2028_v41  ;;  %v2190_v26 = vld [vmem:[%s3595_s11 + $0x48] sm:$0xff] }
 0x46f   :  { %2032 = vmin.xlane.f32.xlu2 %v2031_v12 }
 0x470   :  { %v1993_v63 = vpop.xlane.xlu1 %1992 }
 0x471   :  { %vm2011_vm2 = vcmp.le.f32.partialorder %v1982_v20, %v1993_v63 }
 0x472   :  { %v2020_v32 = vsel %vm2011_vm2, %v3398_v16, 128 }
 0x473   :  { %v2043_v24 = vshra.s32 %v2020_v32, 16  ;;  %v2042_v17 = vand.u32 65535, %v2020_v32 }
 0x475   :  { %v2045_v6 = vcvt.s32.f32 %v2043_v24  ;;  %v2044_v7 = vcvt.s32.f32 %v2042_v17  ;;  %v2187_v24 = vld [vmem:[%s3595_s11 + $0x30] sm:$0xff] }
 0x477   :  { %2046 = vmin.xlane.f32.xlu1 %v2045_v6  ;;  %2004 = vmin.xlane.f32.xlu2 %v1988_v37 }
 0x478   :  { %v1995_v53 = vpop.xlane.xlu2 %1994 }
 0x479   :  { %vm2012_vm3 = vcmp.le.f32.partialorder %v1983_v34, %v1995_v53 }
 0x47a   :  { %v2021_v4 = vsel %vm2012_vm3, %v3398_v16, 128 }
 0x47b   :  { %v2057_v23 = vshra.s32 %v2021_v4, 16  ;;  %v2056_v3 = vand.u32 65535, %v2021_v4  ;;  %v2184_v4 = vld [vmem:[%s3595_s11 + $0x18] sm:$0xff] }
 0x47d   :  { %v2059_v15 = vcvt.s32.f32 %v2057_v23  ;;  %v2058_v34 = vcvt.s32.f32 %v2056_v3 }
 0x47f   :  { %2060 = vmin.xlane.f32.xlu0 %v2059_v15  ;;  %2006 = vmin.xlane.f32.xlu1 %v1989_v10 }
 0x480   :  { %v1997_v35 = vpop.xlane.xlu2 %1996 }
 0x481   :  { %vm2013_vm4 = vcmp.le.f32.partialorder %v1984_v36, %v1997_v35 }
 0x482   :  { %v2022_v22 = vsel %vm2013_vm4, %v3398_v16, 128 }
 0x483   :  { %v2071_v11 = vshra.s32 %v2022_v22, 16 }
 0x485   :  { %v3404_v40 = vcvt.s32.f32 %v2071_v11  ;;  %v2183_v11 = vld [vmem:[%s3595_s11 + $0x10] sm:$0xff] }
 0x487   :  { %2074 = vmin.xlane.f32.xlu2 %v3404_v40 }
 0x488   :  { %v1999_v55 = vpop.xlane.xlu0 %1998 }
 0x489   :  { %vm2014_vm5 = vcmp.le.f32.partialorder %v1985_v30, %v1999_v55  ;;  %v2070_v30 = vand.u32 65535, %v2022_v22  ;;  %v2181_v55 = vld [vmem:[%s3595_s11] sm:$0xff] }
 0x48a   :  { %v3408_v47 = vsel %vm2014_vm5, %v3398_v16, 128 }
 0x48b   :  { %v2085_v51 = vshra.s32 %v3408_v47, 16  ;;  %v2072_v54 = vcvt.s32.f32 %v2070_v30  ;;  %v2084_v50 = vand.u32 65535, %v3408_v47 }
 0x48d   :  { %v3411_v43 = vcvt.s32.f32 %v2085_v51  ;;  %v2086_v63 = vcvt.s32.f32 %v2084_v50 }
 0x48f   :  { %2088 = vmin.xlane.f32.xlu0 %v3411_v43 }
 0x490   :  { %v2001_v62 = vpop.xlane.xlu1 %2000 }
 0x491   :  { %vm2015_vm6 = vcmp.le.f32.partialorder %v1986_v60, %v2001_v62  ;;  %v2193_v60 = vld [vmem:[%s3595_s11 + $0x60] sm:$0xff] }
 0x492   :  { %v3415_v42 = vsel %vm2015_vm6, %v3398_v16, 128  ;;  %2200 = vmatpush.msrb.mxu1 %v2193_v60 }
 0x493   :  { %v2099_v44 = vshra.s32 %v3415_v42, 16 }
 0x495   :  { %v3418_v57 = vcvt.s32.f32 %v2099_v44 }
 0x497   :  { %2102 = vmin.xlane.f32.xlu1 %v3418_v57 }
 0x498   :  { %v2003_v58 = vpop.xlane.xlu0 %2002 }
 0x499   :  { %vm2016_vm7 = vcmp.le.f32.partialorder %v1987_v1, %v2003_v58  ;;  %v2192_v1 = vld [vmem:[%s3595_s11 + $0x58] sm:$0xff] }
 0x49a   :  { %v3422_v33 = vsel %vm2016_vm7, %v3398_v16, 128  ;;  %2201 = vmatpush.msrb.mxu1 %v2192_v1 }
 0x49b   :  { %v2113_v38 = vshra.s32 %v3422_v33, 16 }
 0x49c   :  { %2202 = vmatpush.msrb.mxu1 %v2191_v18 }
 0x49d   :  { %v3425_v61 = vcvt.s32.f32 %v2113_v38 }
 0x49e   :  { %2203 = vmatpush.msrb.mxu1 %v2190_v26 }
 0x49f   :  { %2116 = vmin.xlane.f32.xlu0 %v3425_v61 }
 0x4a0   :  { %2204 = vmatpush.msrb.mxu1 %v2189_v8 }
 0x4a2   :  { %2205 = vmatpush.msrb.mxu1 %v2188_v29 }
 0x4a4   :  { %2206 = vmatpush.msrb.mxu1 %v2187_v24 }
 0x4e2   :  { %v3428_v39 = vpop.xlane.xlu2 %2032 }
 0x4e3   :  { %vm2034_vm8 = vcmp.eq.f32.partialorder %v2031_v12, %v3428_v39  ;;  %v2039_v47 = vcvt.f32.s32 %v3428_v39 }
 0x4e4   :  { %v2035_v13 = vsel %vm2034_vm8, %v2030_v25, inf }
 0x4e5   :  { %2036 = vmin.xlane.f32.xlu2 %v2035_v13 }
 0x4ea   :  { %v3431_v28 = vpop.xlane.xlu1 %2046  ;;  %v2005_v48 = vpop.xlane.xlu2 %2004 }
 0x4eb   :  { %vm2017_vm9 = vcmp.le.f32.partialorder %v1988_v37, %v2005_v48  ;;  %vm2048_vm10 = vcmp.eq.f32.partialorder %v2045_v6, %v3431_v28  ;;  %v2098_v6 = vand.u32 65535, %v3415_v42  ;;  %v2186_v37 = vld [vmem:[%s3595_s11 + $0x28] sm:$0xff]  ;;  %v2053_v44 = vcvt.f32.s32 %v3431_v28 }
 0x4ec   :  { %v3435_v46 = vsel %vm2017_vm9, %v3398_v16, 128  ;;  %v2049_v52 = vsel %vm2048_vm10, %v2044_v7, inf  ;;  %2207 = vmatpush.msrb.mxu1 %v2186_v37 }
 0x4ed   :  { %2050 = vmin.xlane.f32.xlu1 %v2049_v52  ;;  %v2127_v0 = vshra.s32 %v3435_v46, 16  ;;  %v2100_v5 = vcvt.s32.f32 %v2098_v6  ;;  %v2126_v58 = vand.u32 65535, %v3435_v46  ;;  %v2054_v38 = vshll.u32 %v2053_v44, 16 }
 0x4ee   :  { %2208 = vmatpush.msrb.mxu1 %v2185_v59 }
 0x4ef   :  { %v3438_v20 = vcvt.s32.f32 %v2127_v0  ;;  %v2128_v13 = vcvt.s32.f32 %v2126_v58 }
 0x4f0   :  { %2209 = vmatpush.msrb.mxu1 %v2184_v4 }
 0x4f1   :  { %2130 = vmin.xlane.f32.xlu2 %v3438_v20 }
 0x4f2   :  { %v3441_v2 = vpop.xlane.xlu0 %2060  ;;  %v2007_v19 = vpop.xlane.xlu1 %2006  ;;  %2210 = vmatpush.msrb.mxu1 %v2183_v11 }
 0x4f3   :  { %vm2018_vm11 = vcmp.le.f32.partialorder %v1989_v10, %v2007_v19  ;;  %vm2062_vm12 = vcmp.eq.f32.partialorder %v2059_v15, %v3441_v2  ;;  %v2112_v15 = vand.u32 65535, %v3422_v33  ;;  %v2067_v39 = vcvt.f32.s32 %v3441_v2 }
 0x4f4   :  { %v3445_v14 = vsel %vm2018_vm11, %v3398_v16, 128  ;;  %v2063_v27 = vsel %vm2062_vm12, %v2058_v34, inf }
 0x4f5   :  { %2064 = vmin.xlane.f32.xlu0 %v2063_v27  ;;  %v2141_v36 = vshra.s32 %v3445_v14, 16  ;;  %v2114_v35 = vcvt.s32.f32 %v2112_v15  ;;  %v2140_v28 = vand.u32 65535, %v3445_v14  ;;  %v2068_v7 = vshll.u32 %v2067_v39, 16 }
 0x4f7   :  { %v3454_v45 = vcvt.s32.f32 %v2141_v36  ;;  %v2142_v3 = vcvt.s32.f32 %v2140_v28 }
 0x4f9   :  { %2144 = vmin.xlane.f32.xlu1 %v3454_v45 }
 0x4fa   :  { %v3463_v21 = vpop.xlane.xlu2 %2074 }
 0x4fb   :  { %vm2076_vm13 = vcmp.eq.f32.partialorder %v3404_v40, %v3463_v21  ;;  %v2182_v40 = vld [vmem:[%s3595_s11 + $0x8] sm:$0xff]  ;;  %v2081_v19 = vcvt.f32.s32 %v3463_v21 }
 0x4fc   :  { %v2077_v9 = vsel %vm2076_vm13, %v2072_v54, inf  ;;  %2211 = vmatpush.msrb.mxu1 %v2182_v40 }
 0x4fd   :  { %2078 = vmin.xlane.f32.xlu2 %v2077_v9  ;;  %v2082_v34 = vshll.u32 %v2081_v19, 16 }
 0x4fe   :  { %2212 = vmatpush.msrb.mxu1 %v2181_v55 }
 0x502   :  { %v3480_v12 = vpop.xlane.xlu0 %2088 }
 0x503   :  { %vm2090_vm14 = vcmp.eq.f32.partialorder %v3411_v43, %v3480_v12  ;;  %v2040_v43 = vshll.u32 %v2039_v47, 16  ;;  %v2095_v36 = vcvt.f32.s32 %v3480_v12 }
 0x504   :  { %v2091_v32 = vsel %vm2090_vm14, %v2086_v63, inf }
 0x505   :  { %2092 = vmin.xlane.f32.xlu0 %v2091_v32  ;;  %v2096_v49 = vshll.u32 %v2095_v36, 16 }
 0x50a   :  { %v3497_v53 = vpop.xlane.xlu1 %2102 }
 0x50b   :  { %vm2104_vm15 = vcmp.eq.f32.partialorder %v3418_v57, %v3497_v53  ;;  %v2596_v57 = vmov 1.0  }
 0x50c   :  { %v2105_v23 = vsel %vm2104_vm15, %v2100_v5, inf }
 0x50d   :  { %2106 = vmin.xlane.f32.xlu1 %v2105_v23 }
 0x512   :  { %v3505_v10 = vpop.xlane.xlu0 %2116 }
 0x513   :  { %vm2118_vm1 = vcmp.eq.f32.partialorder %v3425_v61, %v3505_v10  ;;  %v2123_v9 = vcvt.f32.s32 %v3505_v10 }
 0x514   :  { %v2119_v22 = vsel %vm2118_vm1, %v2114_v35, inf }
 0x515   :  { %2120 = vmin.xlane.f32.xlu2 %v2119_v22  ;;  %v2124_v50 = vshll.u32 %v2123_v9, 16 }
 0x558   :  { %v2037_v51 = vpop.xlane.xlu2 %2036 }
 0x559   :  { %v2038_v62 = vcvt.f32.s32 %v2037_v51 }
 0x55b   :  { %v2041_v42 = vadd.s32 %v2040_v43, %v2038_v62 }
 0x55d   :  { %vm2154_vm2 = vcmp.eq.s32.totalorder %v3398_v16, %v2041_v42 }
 0x55e   :  { %2532 = vmatmul.msk.f32.vlgmr.msrb.gmra.mxu1 %vm2154_vm2, %v2596_v57 }
 0x560   :  { %v2051_v33 = vpop.xlane.xlu1 %2050 }
 0x561   :  { %v2052_v61 = vcvt.f32.s32 %v2051_v33 }
 0x563   :  { %v2055_v41 = vadd.s32 %v2054_v38, %v2052_v61 }
 0x564   :  { %v2131_v25 = vpop.xlane.xlu2 %2130 }
 0x565   :  { %vm2155_vm3 = vcmp.eq.s32.totalorder %v3398_v16, %v2055_v41  ;;  %vm2132_vm4 = vcmp.eq.f32.partialorder %v3438_v20, %v2131_v25  ;;  %v2137_v12 = vcvt.f32.s32 %v2131_v25 }
 0x566   :  { %2533 = vmatmul.msk.f32.gmra.mxu1 %vm2155_vm3, %v2596_v57  ;;  %v2133_v17 = vsel %vm2132_vm4, %v2128_v13, inf }
 0x567   :  { %2134 = vmin.xlane.f32.xlu0 %v2133_v17  ;;  %v2138_v29 = vshll.u32 %v2137_v12, 16 }
 0x568   :  { %v2065_v48 = vpop.xlane.xlu0 %2064 }
 0x569   :  { %v2066_v46 = vcvt.f32.s32 %v2065_v48 }
 0x56b   :  { %v2069_v52 = vadd.s32 %v2068_v7, %v2066_v46 }
 0x56c   :  { %v2145_v0 = vpop.xlane.xlu1 %2144 }
 0x56d   :  { %vm2156_vm5 = vcmp.eq.s32.totalorder %v3398_v16, %v2069_v52  ;;  %vm2146_vm6 = vcmp.eq.f32.partialorder %v3454_v45, %v2145_v0  ;;  %v2109_v45 = vcvt.f32.s32 %v3497_v53  ;;  %v2151_v37 = vcvt.f32.s32 %v2145_v0 }
 0x56e   :  { %2534 = vmatmul.msk.f32.gmra.mxu1 %vm2156_vm5, %v2596_v57  ;;  %v2147_v20 = vsel %vm2146_vm6, %v2142_v3, inf }
 0x56f   :  { %2148 = vmin.xlane.f32.xlu1 %v2147_v20  ;;  %v2110_v21 = vshll.u32 %v2109_v45, 16  ;;  %v2152_v53 = vshll.u32 %v2151_v37, 16 }
 0x570   :  { %v2079_v2 = vpop.xlane.xlu2 %2078 }
 0x571   :  { %v2080_v27 = vcvt.f32.s32 %v2079_v2 }
 0x573   :  { %v2083_v14 = vadd.s32 %v2082_v34, %v2080_v27 }
 0x575   :  { %vm2157_vm7 = vcmp.eq.s32.totalorder %v3398_v16, %v2083_v14 }
 0x576   :  { %2535 = vmatmul.msk.f32.gmra.mxu1 %vm2157_vm7, %v2596_v57 }
 0x578   :  { %v2093_v31 = vpop.xlane.xlu0 %2092 }
 0x579   :  { %v2094_v30 = vcvt.f32.s32 %v2093_v31 }
 0x57b   :  { %v2097_v56 = vadd.s32 %v2096_v49, %v2094_v30 }
 0x57d   :  { %vm2158_vm8 = vcmp.eq.s32.totalorder %v3398_v16, %v2097_v56 }
 0x57e   :  { %2536 = vmatmul.msk.f32.gmra.mxu1 %vm2158_vm8, %v2596_v57 }
 0x580   :  { %v2107_v60 = vpop.xlane.xlu1 %2106 }
 0x581   :  { %v2108_v54 = vcvt.f32.s32 %v2107_v60 }
 0x583   :  { %v2111_v1 = vadd.s32 %v2110_v21, %v2108_v54 }
 0x585   :  { %vm2159_vm9 = vcmp.eq.s32.totalorder %v3398_v16, %v2111_v1 }
 0x586   :  { %2537 = vmatmul.msk.f32.gmra.mxu1 %vm2159_vm9, %v2596_v57 }
 0x588   :  { %v2121_v18 = vpop.xlane.xlu2 %2120 }
 0x589   :  { %v2122_v26 = vcvt.f32.s32 %v2121_v18 }
 0x58b   :  { %v2125_v8 = vadd.s32 %v2124_v50, %v2122_v26 }
 0x58d   :  { %vm2160_vm10 = vcmp.eq.s32.totalorder %v3398_v16, %v2125_v8 }
 0x58e   :  { %2538 = vmatmul.msk.f32.gmra.mxu1 %vm2160_vm10, %v2596_v57 }
 0x5da   :  { %v2135_v63 = vpop.xlane.xlu0 %2134 }
 0x5db   :  { %v2136_v32 = vcvt.f32.s32 %v2135_v63  ;;  %v2214_v24 = vpop.f32.mrf.mxu1 }
 0x5dc   :  { %2241 = vst.msk [vmem:[%s3596_s13] sm:$0xff] %vm76_vm0, %v2214_v24 }
 0x5dd   :  { %v2139_v6 = vadd.s32 %v2138_v29, %v2136_v32 }
 0x5df   :  { %vm2161_vm11 = vcmp.eq.s32.totalorder %v3398_v16, %v2139_v6 }
 0x5e0   :  { %2539 = vmatmul.msk.f32.gmra.mxu1 %vm2161_vm11, %v2596_v57 }
 0x5e2   :  { %v2149_v59 = vpop.xlane.xlu1 %2148 }
 0x5e3   :  { %v2150_v5 = vcvt.f32.s32 %v2149_v59  ;;  %v2217_v4 = vpop.f32.mrf.mxu1 }
 0x5e4   :  { %2242 = vst.msk [vmem:[%s3596_s13 + $0x8] sm:$0xff] %vm76_vm0, %v2217_v4 }
 0x5e5   :  { %v2153_v23 = vadd.s32 %v2152_v53, %v2150_v5 }
 0x5e7   :  { %vm2162_vm12 = vcmp.eq.s32.totalorder %v3398_v16, %v2153_v23 }
 0x5e8   :  { %2540 = vmatmul.msk.f32.gmra.mxu1 %vm2162_vm12, %v2596_v57 }
 0x5eb   :  { %v2220_v15 = vpop.f32.mrf.mxu1 }
 0x5ec   :  { %2243 = vst.msk [vmem:[%s3596_s13 + $0x10] sm:$0xff] %vm76_vm0, %v2220_v15 }
 0x5f3   :  { %v2223_v10 = vpop.f32.mrf.mxu1 }
 0x5f4   :  { %2244 = vst.msk [vmem:[%s3596_s13 + $0x18] sm:$0xff] %vm76_vm0, %v2223_v10 }
 0x5fb   :  { %v2226_v35 = vpop.f32.mrf.mxu1 }
 0x5fc   :  { %2245 = vst.msk [vmem:[%s3596_s13 + $0x20] sm:$0xff] %vm76_vm0, %v2226_v35 }
 0x603   :  { %v2229_v16 = vpop.f32.mrf.mxu1 }
 0x604   :  { %2246 = vst.msk [vmem:[%s3596_s13 + $0x28] sm:$0xff] %vm76_vm0, %v2229_v16 }
 0x60b   :  { %v2232_v22 = vpop.f32.mrf.mxu1 }
 0x60c   :  { %2247 = vst.msk [vmem:[%s3596_s13 + $0x30] sm:$0xff] %vm76_vm0, %v2232_v22 }
 0x65d   :  { %v2235_v11 = vpop.f32.mrf.mxu1 }
 0x65e   :  { %2248 = vst.msk [vmem:[%s3596_s13 + $0x38] sm:$0xff] %vm76_vm0, %v2235_v11 }
 0x665   :  { %v2238_v40 = vpop.f32.mrf.mxu1 }
 0x666   :  { %2249 = vst.msk [vmem:[%s3596_s13 + $0x40] sm:$0xff] %vm76_vm0, %v2238_v40 }

</bundles_post_ra>
